<compile_context>
chip_gen: v7x
topology: tpu7x:2x2x1
jax: 0.10.0
libtpu: 0.0.40
codegen_flags: <defaults>
</compile_context>

<pallas_src>
import functools

import jax
import jax.numpy as jnp
from jax import lax
from jax.experimental import pallas as pl
from jax.experimental.pallas import tpu as pltpu


def _round_up(x, m):
    return (x + m - 1) // m * m


def _dsconv_kernel(x_ref, w_ref, o_ref, patch_ref, *, Cin_p, PLANE, Wp, L):
    """One (batch, depth-tile) step of the fused depthwise-separable conv.

    x_ref     : (1, 1, Cin_p, TILE_LEN)  flattened zero-padded slab
                (lanes = flat (d, h, w) of the padded volume, + slack)
    w_ref     : (Cout, 27*Cin_p)         fused weights W_eff
    o_ref     : (1, 1, Cout, L)          lane-dense output slab
    patch_ref : (27*Cin_p, L)            VMEM scratch: im2col^T patches
    """
    # Build im2col^T: each tap (kd, kh, kw) is one contiguous lane slice of the
    # flat slab, covering all TD output planes at once.  Stores are 8-sublane
    # aligned and full lane width.
    for kd in range(3):
        for kh in range(3):
            for kw in range(3):
                t = kd * 9 + kh * 3 + kw
                off = kd * PLANE + kh * Wp + kw
                patch_ref[t * Cin_p:(t + 1) * Cin_p, :] = (
                    x_ref[0, 0, :, off:off + L].astype(jnp.float32))

    # Single fused MXU matmul: (Cout, 27*Cin_p) @ (27*Cin_p, L).
    out = jnp.dot(w_ref[...].astype(jnp.float32), patch_ref[...],
                  preferred_element_type=jnp.float32)
    o_ref[0, 0] = out.astype(o_ref.dtype)


def _pick_depth_tile(D, Cin_p, Cout, PLANE, Wp, budget_bytes):
    """Largest divisor of D whose per-step VMEM footprint fits the budget."""
    for td in range(D, 0, -1):
        if D % td:
            continue
        l_out = _round_up(td * PLANE, 128)
        tile_len = _round_up(l_out + 2 * PLANE + 2 * Wp + 2, 128)
        patch = 27 * Cin_p * l_out * 4
        slab = 2 * Cin_p * tile_len * 4          # double-buffered input block
        outb = 2 * Cout * l_out * 4              # double-buffered output block
        wb = Cout * 27 * Cin_p * 4
        if patch + slab + outb + wb <= budget_bytes:
            return td
    return 1


def depth_separable_conv(x_ncdhw, dw_oidhw, pw_oidhw,
                         *, vmem_budget_bytes=8 * 1024 * 1024):
    """PyTorch-layout entry point.

    x_ncdhw : (N, Cin, D, H, W)
    dw      : (Cin, 1, 3, 3, 3)     depthwise weights (groups=Cin, bias=False)
    pw      : (Cout, Cin, 1, 1, 1)  pointwise weights (bias=False)
    returns : (N, Cout, D, H, W)
    """
    N, Cin, D, H, W = x_ncdhw.shape
    Cout = pw_oidhw.shape[0]
    Dp, Hp, Wp = D + 2, H + 2, W + 2
    PLANE = Hp * Wp
    Cin_p = _round_up(Cin, 8)

    TD = _pick_depth_tile(D, Cin_p, Cout, PLANE, Wp, vmem_budget_bytes)
    nDT = D // TD
    L = TD * PLANE                      # valid output lanes per tile
    L_out = _round_up(L, 128)           # lane-dense (unmasked-vst) output width
    MAX_OFF = 2 * PLANE + 2 * Wp + 2    # largest tap shift
    TILE_LEN = _round_up(L_out + MAX_OFF, 128)

    # ---- one-time layout prep (fused XLA relayout) ---------------------------
    # Zero-pad spatial dims, zero-pad channels to Cin_p, flatten (D,H,W) onto
    # the lane axis (NCDHW already has C before DHW, so no transpose needed).
    xp = jnp.pad(x_ncdhw,
                 ((0, 0), (0, Cin_p - Cin), (1, 1), (1, 1), (1, 1)))
    xflat = xp.reshape(N, Cin_p, Dp * PLANE)
    tail = TILE_LEN - (TD + 2) * PLANE  # slack so every tap slice is in-bounds
    xflat = jnp.pad(xflat, ((0, 0), (0, 0), (0, tail)))

    if nDT == 1:
        xt = xflat[:, None]                                     # no halo copy
    else:
        xt = jnp.stack(
            [xflat[:, :, dt * TD * PLANE: dt * TD * PLANE + TILE_LEN]
             for dt in range(nDT)], axis=1)                     # halo'd tiles
    # xt : (N, nDT, Cin_p, TILE_LEN)

    # Fused weights: W_eff[co, t*Cin_p + ci] = dw[ci, kd, kh, kw] * pw[co, ci].
    dwk = jnp.transpose(dw_oidhw[:, 0], (1, 2, 3, 0)).reshape(27, Cin)
    dwk = jnp.pad(dwk, ((0, 0), (0, Cin_p - Cin)))
    pwk = jnp.pad(pw_oidhw[:, :, 0, 0, 0], ((0, 0), (0, Cin_p - Cin)))
    w_eff = (dwk[None] * pwk[:, None]).reshape(Cout, 27 * Cin_p)
    w_eff = w_eff.astype(jnp.float32)

    kernel = functools.partial(_dsconv_kernel,
                               Cin_p=Cin_p, PLANE=PLANE, Wp=Wp, L=L_out)

    out = pl.pallas_call(
        kernel,
        out_shape=jax.ShapeDtypeStruct((N, nDT, Cout, L_out), x_ncdhw.dtype),
        grid_spec=pltpu.PrefetchScalarGridSpec(
            num_scalar_prefetch=0,
            grid=(N, nDT),
            in_specs=[
                pl.BlockSpec((1, 1, Cin_p, TILE_LEN),
                             lambda n, dt: (n, dt, 0, 0)),
                pl.BlockSpec((Cout, 27 * Cin_p), lambda n, dt: (0, 0)),
            ],
            out_specs=pl.BlockSpec((1, 1, Cout, L_out),
                                   lambda n, dt: (n, dt, 0, 0)),
            scratch_shapes=[pltpu.VMEM((27 * Cin_p, L_out), jnp.float32)],
        ),
        compiler_params=pltpu.CompilerParams(
            dimension_semantics=("parallel", "parallel")),
    )(xt, w_eff)

    # (N, nDT, Cout, L_out) -> drop slack / padded rows+cols -> NCDHW.
    out = out[..., :L].reshape(N, nDT, Cout, TD, Hp, Wp)[..., :H, :W]
    out = jnp.transpose(out, (0, 2, 1, 3, 4, 5)).reshape(N, Cout, D, H, W)
    return out


def _reference_ncdhw(x_ncdhw, dw_oidhw, pw_oidhw):
    """Independent reference using lax.conv (PyTorch NCDHW semantics)."""
    Cin = x_ncdhw.shape[1]
    dn = ("NCDHW", "OIDHW", "NCDHW")
    depth = lax.conv_general_dilated(
        x_ncdhw, dw_oidhw, window_strides=(1, 1, 1),
        padding=((1, 1), (1, 1), (1, 1)), dimension_numbers=dn,
        feature_group_count=Cin, precision=lax.Precision.HIGHEST)
    point = lax.conv_general_dilated(
        depth, pw_oidhw, window_strides=(1, 1, 1),
        padding=((0, 0), (0, 0), (0, 0)), dimension_numbers=dn,
        precision=lax.Precision.HIGHEST)
    return point


if __name__ == "__main__":
    # Small shapes consistent with the module (Conv3d => 5-D NCDHW input).
    N, Cin, Cout, D, H, W = 2, 4, 8, 8, 16, 16

    key = jax.random.PRNGKey(0)
    kx, kdw, kpw = jax.random.split(key, 3)

    x_ncdhw = jax.random.normal(kx, (N, Cin, D, H, W), dtype=jnp.float32)
    dw_oidhw = jax.random.normal(kdw, (Cin, 1, 3, 3, 3), dtype=jnp.float32) * 0.1
    pw_oidhw = jax.random.normal(kpw, (Cout, Cin, 1, 1, 1), dtype=jnp.float32) * 0.1

    fwd = jax.jit(depth_separable_conv)
    out_ncdhw = jax.block_until_ready(fwd(x_ncdhw, dw_oidhw, pw_oidhw))

    ref_ncdhw = _reference_ncdhw(x_ncdhw, dw_oidhw, pw_oidhw)
    assert out_ncdhw.shape == (N, Cout, D, H, W)
    max_err = float(jnp.max(jnp.abs(out_ncdhw - ref_ncdhw)))
    assert jnp.allclose(out_ncdhw, ref_ncdhw, atol=1e-3, rtol=1e-3), max_err

    print("KERNEL_OK")
</pallas_src>

<mosaic_0001>
module attributes {stable_mosaic.version = 11 : i64} {
  func.func @_dsconv_kernel(%arg0: i32, %arg1: i32, %arg2: memref<1x1x8x3456xf32, #tpu.memory_space<vmem>>, %arg3: memref<8x216xf32, #tpu.memory_space<vmem>>, %arg4: memref<1x1x8x2688xf32, #tpu.memory_space<vmem>>, %arg5: memref<216x2688xf32, #tpu.memory_space<vmem>>) attributes {dimension_semantics = [#tpu.dimension_semantics<parallel>, #tpu.dimension_semantics<parallel>], iteration_bounds = array<i64: 2, 1>, scalar_prefetch = 0 : i64, scratch_operands = 1 : i64, tpu.core_type = #tpu.core_type<tc>, window_params = [{transform_indices = @transform_0, window_bounds = array<i64: 1, 1, 8, 3456>}, {pipeline_mode = #tpu.pipeline_mode<synchronous>, transform_indices = @transform_1, window_bounds = array<i64: 8, 216>}, {transform_indices = @transform_2, window_bounds = array<i64: 1, 1, 8, 2688>}]} {
    %c0 = arith.constant 0 : index
    %c0_0 = arith.constant 0 : index
    %c0_1 = arith.constant 0 : index
    %c0_2 = arith.constant 0 : index
    %0 = vector.load %arg2[%c0, %c0_0, %c0_1, %c0_2] : memref<1x1x8x3456xf32, #tpu.memory_space<vmem>>, vector<1x1x8x2688xf32>
    %1 = vector.shape_cast %0 : vector<1x1x8x2688xf32> to vector<8x2688xf32>
    %c0_3 = arith.constant 0 : index
    %c0_4 = arith.constant 0 : index
    %2 = vector.load %arg5[%c0_3, %c0_4] : memref<216x2688xf32, #tpu.memory_space<vmem>>, vector<8x2688xf32>
    tpu.vector_store %arg5[%c0_3, %c0_4], %1 {strides = array<i32>} : memref<216x2688xf32, #tpu.memory_space<vmem>>, vector<8x2688xf32>,
    %c0_5 = arith.constant 0 : index
    %c0_6 = arith.constant 0 : index
    %c0_7 = arith.constant 0 : index
    %c1 = arith.constant 1 : index
    %3 = vector.load %arg2[%c0_5, %c0_6, %c0_7, %c1] : memref<1x1x8x3456xf32, #tpu.memory_space<vmem>>, vector<1x1x8x2688xf32>
    %4 = vector.shape_cast %3 : vector<1x1x8x2688xf32> to vector<8x2688xf32>
    %c8 = arith.constant 8 : index
    %c0_8 = arith.constant 0 : index
    %5 = vector.load %arg5[%c8, %c0_8] : memref<216x2688xf32, #tpu.memory_space<vmem>>, vector<8x2688xf32>
    tpu.vector_store %arg5[%c8, %c0_8], %4 {strides = array<i32>} : memref<216x2688xf32, #tpu.memory_space<vmem>>, vector<8x2688xf32>,
    %c0_9 = arith.constant 0 : index
    %c0_10 = arith.constant 0 : index
    %c0_11 = arith.constant 0 : index
    %c2 = arith.constant 2 : index
    %6 = vector.load %arg2[%c0_9, %c0_10, %c0_11, %c2] : memref<1x1x8x3456xf32, #tpu.memory_space<vmem>>, vector<1x1x8x2688xf32>
    %7 = vector.shape_cast %6 : vector<1x1x8x2688xf32> to vector<8x2688xf32>
    %c16 = arith.constant 16 : index
    %c0_12 = arith.constant 0 : index
    %8 = vector.load %arg5[%c16, %c0_12] : memref<216x2688xf32, #tpu.memory_space<vmem>>, vector<8x2688xf32>
    tpu.vector_store %arg5[%c16, %c0_12], %7 {strides = array<i32>} : memref<216x2688xf32, #tpu.memory_space<vmem>>, vector<8x2688xf32>,
    %c0_13 = arith.constant 0 : index
    %c0_14 = arith.constant 0 : index
    %c0_15 = arith.constant 0 : index
    %c18 = arith.constant 18 : index
    %9 = vector.load %arg2[%c0_13, %c0_14, %c0_15, %c18] : memref<1x1x8x3456xf32, #tpu.memory_space<vmem>>, vector<1x1x8x2688xf32>
    %10 = vector.shape_cast %9 : vector<1x1x8x2688xf32> to vector<8x2688xf32>
    %c24 = arith.constant 24 : index
    %c0_16 = arith.constant 0 : index
    %11 = vector.load %arg5[%c24, %c0_16] : memref<216x2688xf32, #tpu.memory_space<vmem>>, vector<8x2688xf32>
    tpu.vector_store %arg5[%c24, %c0_16], %10 {strides = array<i32>} : memref<216x2688xf32, #tpu.memory_space<vmem>>, vector<8x2688xf32>,
    %c0_17 = arith.constant 0 : index
    %c0_18 = arith.constant 0 : index
    %c0_19 = arith.constant 0 : index
    %c19 = arith.constant 19 : index
    %12 = vector.load %arg2[%c0_17, %c0_18, %c0_19, %c19] : memref<1x1x8x3456xf32, #tpu.memory_space<vmem>>, vector<1x1x8x2688xf32>
    %13 = vector.shape_cast %12 : vector<1x1x8x2688xf32> to vector<8x2688xf32>
    %c32 = arith.constant 32 : index
    %c0_20 = arith.constant 0 : index
    %14 = vector.load %arg5[%c32, %c0_20] : memref<216x2688xf32, #tpu.memory_space<vmem>>, vector<8x2688xf32>
    tpu.vector_store %arg5[%c32, %c0_20], %13 {strides = array<i32>} : memref<216x2688xf32, #tpu.memory_space<vmem>>, vector<8x2688xf32>,
    %c0_21 = arith.constant 0 : index
    %c0_22 = arith.constant 0 : index
    %c0_23 = arith.constant 0 : index
    %c20 = arith.constant 20 : index
    %15 = vector.load %arg2[%c0_21, %c0_22, %c0_23, %c20] : memref<1x1x8x3456xf32, #tpu.memory_space<vmem>>, vector<1x1x8x2688xf32>
    %16 = vector.shape_cast %15 : vector<1x1x8x2688xf32> to vector<8x2688xf32>
    %c40 = arith.constant 40 : index
    %c0_24 = arith.constant 0 : index
    %17 = vector.load %arg5[%c40, %c0_24] : memref<216x2688xf32, #tpu.memory_space<vmem>>, vector<8x2688xf32>
    tpu.vector_store %arg5[%c40, %c0_24], %16 {strides = array<i32>} : memref<216x2688xf32, #tpu.memory_space<vmem>>, vector<8x2688xf32>,
    %c0_25 = arith.constant 0 : index
    %c0_26 = arith.constant 0 : index
    %c0_27 = arith.constant 0 : index
    %c36 = arith.constant 36 : index
    %18 = vector.load %arg2[%c0_25, %c0_26, %c0_27, %c36] : memref<1x1x8x3456xf32, #tpu.memory_space<vmem>>, vector<1x1x8x2688xf32>
    %19 = vector.shape_cast %18 : vector<1x1x8x2688xf32> to vector<8x2688xf32>
    %c48 = arith.constant 48 : index
    %c0_28 = arith.constant 0 : index
    %20 = vector.load %arg5[%c48, %c0_28] : memref<216x2688xf32, #tpu.memory_space<vmem>>, vector<8x2688xf32>
    tpu.vector_store %arg5[%c48, %c0_28], %19 {strides = array<i32>} : memref<216x2688xf32, #tpu.memory_space<vmem>>, vector<8x2688xf32>,
    %c0_29 = arith.constant 0 : index
    %c0_30 = arith.constant 0 : index
    %c0_31 = arith.constant 0 : index
    %c37 = arith.constant 37 : index
    %21 = vector.load %arg2[%c0_29, %c0_30, %c0_31, %c37] : memref<1x1x8x3456xf32, #tpu.memory_space<vmem>>, vector<1x1x8x2688xf32>
    %22 = vector.shape_cast %21 : vector<1x1x8x2688xf32> to vector<8x2688xf32>
    %c56 = arith.constant 56 : index
    %c0_32 = arith.constant 0 : index
    %23 = vector.load %arg5[%c56, %c0_32] : memref<216x2688xf32, #tpu.memory_space<vmem>>, vector<8x2688xf32>
    tpu.vector_store %arg5[%c56, %c0_32], %22 {strides = array<i32>} : memref<216x2688xf32, #tpu.memory_space<vmem>>, vector<8x2688xf32>,
    %c0_33 = arith.constant 0 : index
    %c0_34 = arith.constant 0 : index
    %c0_35 = arith.constant 0 : index
    %c38 = arith.constant 38 : index
    %24 = vector.load %arg2[%c0_33, %c0_34, %c0_35, %c38] : memref<1x1x8x3456xf32, #tpu.memory_space<vmem>>, vector<1x1x8x2688xf32>
    %25 = vector.shape_cast %24 : vector<1x1x8x2688xf32> to vector<8x2688xf32>
    %c64 = arith.constant 64 : index
    %c0_36 = arith.constant 0 : index
    %26 = vector.load %arg5[%c64, %c0_36] : memref<216x2688xf32, #tpu.memory_space<vmem>>, vector<8x2688xf32>
    tpu.vector_store %arg5[%c64, %c0_36], %25 {strides = array<i32>} : memref<216x2688xf32, #tpu.memory_space<vmem>>, vector<8x2688xf32>,
    %c0_37 = arith.constant 0 : index
    %c0_38 = arith.constant 0 : index
    %c0_39 = arith.constant 0 : index
    %c324 = arith.constant 324 : index
    %27 = vector.load %arg2[%c0_37, %c0_38, %c0_39, %c324] : memref<1x1x8x3456xf32, #tpu.memory_space<vmem>>, vector<1x1x8x2688xf32>
    %28 = vector.shape_cast %27 : vector<1x1x8x2688xf32> to vector<8x2688xf32>
    %c72 = arith.constant 72 : index
    %c0_40 = arith.constant 0 : index
    %29 = vector.load %arg5[%c72, %c0_40] : memref<216x2688xf32, #tpu.memory_space<vmem>>, vector<8x2688xf32>
    tpu.vector_store %arg5[%c72, %c0_40], %28 {strides = array<i32>} : memref<216x2688xf32, #tpu.memory_space<vmem>>, vector<8x2688xf32>,
    %c0_41 = arith.constant 0 : index
    %c0_42 = arith.constant 0 : index
    %c0_43 = arith.constant 0 : index
    %c325 = arith.constant 325 : index
    %30 = vector.load %arg2[%c0_41, %c0_42, %c0_43, %c325] : memref<1x1x8x3456xf32, #tpu.memory_space<vmem>>, vector<1x1x8x2688xf32>
    %31 = vector.shape_cast %30 : vector<1x1x8x2688xf32> to vector<8x2688xf32>
    %c80 = arith.constant 80 : index
    %c0_44 = arith.constant 0 : index
    %32 = vector.load %arg5[%c80, %c0_44] : memref<216x2688xf32, #tpu.memory_space<vmem>>, vector<8x2688xf32>
    tpu.vector_store %arg5[%c80, %c0_44], %31 {strides = array<i32>} : memref<216x2688xf32, #tpu.memory_space<vmem>>, vector<8x2688xf32>,
    %c0_45 = arith.constant 0 : index
    %c0_46 = arith.constant 0 : index
    %c0_47 = arith.constant 0 : index
    %c326 = arith.constant 326 : index
    %33 = vector.load %arg2[%c0_45, %c0_46, %c0_47, %c326] : memref<1x1x8x3456xf32, #tpu.memory_space<vmem>>, vector<1x1x8x2688xf32>
    %34 = vector.shape_cast %33 : vector<1x1x8x2688xf32> to vector<8x2688xf32>
    %c88 = arith.constant 88 : index
    %c0_48 = arith.constant 0 : index
    %35 = vector.load %arg5[%c88, %c0_48] : memref<216x2688xf32, #tpu.memory_space<vmem>>, vector<8x2688xf32>
    tpu.vector_store %arg5[%c88, %c0_48], %34 {strides = array<i32>} : memref<216x2688xf32, #tpu.memory_space<vmem>>, vector<8x2688xf32>,
    %c0_49 = arith.constant 0 : index
    %c0_50 = arith.constant 0 : index
    %c0_51 = arith.constant 0 : index
    %c342 = arith.constant 342 : index
    %36 = vector.load %arg2[%c0_49, %c0_50, %c0_51, %c342] : memref<1x1x8x3456xf32, #tpu.memory_space<vmem>>, vector<1x1x8x2688xf32>
    %37 = vector.shape_cast %36 : vector<1x1x8x2688xf32> to vector<8x2688xf32>
    %c96 = arith.constant 96 : index
    %c0_52 = arith.constant 0 : index
    %38 = vector.load %arg5[%c96, %c0_52] : memref<216x2688xf32, #tpu.memory_space<vmem>>, vector<8x2688xf32>
    tpu.vector_store %arg5[%c96, %c0_52], %37 {strides = array<i32>} : memref<216x2688xf32, #tpu.memory_space<vmem>>, vector<8x2688xf32>,
    %c0_53 = arith.constant 0 : index
    %c0_54 = arith.constant 0 : index
    %c0_55 = arith.constant 0 : index
    %c343 = arith.constant 343 : index
    %39 = vector.load %arg2[%c0_53, %c0_54, %c0_55, %c343] : memref<1x1x8x3456xf32, #tpu.memory_space<vmem>>, vector<1x1x8x2688xf32>
    %40 = vector.shape_cast %39 : vector<1x1x8x2688xf32> to vector<8x2688xf32>
    %c104 = arith.constant 104 : index
    %c0_56 = arith.constant 0 : index
    %41 = vector.load %arg5[%c104, %c0_56] : memref<216x2688xf32, #tpu.memory_space<vmem>>, vector<8x2688xf32>
    tpu.vector_store %arg5[%c104, %c0_56], %40 {strides = array<i32>} : memref<216x2688xf32, #tpu.memory_space<vmem>>, vector<8x2688xf32>,
    %c0_57 = arith.constant 0 : index
    %c0_58 = arith.constant 0 : index
    %c0_59 = arith.constant 0 : index
    %c344 = arith.constant 344 : index
    %42 = vector.load %arg2[%c0_57, %c0_58, %c0_59, %c344] : memref<1x1x8x3456xf32, #tpu.memory_space<vmem>>, vector<1x1x8x2688xf32>
    %43 = vector.shape_cast %42 : vector<1x1x8x2688xf32> to vector<8x2688xf32>
    %c112 = arith.constant 112 : index
    %c0_60 = arith.constant 0 : index
    %44 = vector.load %arg5[%c112, %c0_60] : memref<216x2688xf32, #tpu.memory_space<vmem>>, vector<8x2688xf32>
    tpu.vector_store %arg5[%c112, %c0_60], %43 {strides = array<i32>} : memref<216x2688xf32, #tpu.memory_space<vmem>>, vector<8x2688xf32>,
    %c0_61 = arith.constant 0 : index
    %c0_62 = arith.constant 0 : index
    %c0_63 = arith.constant 0 : index
    %c360 = arith.constant 360 : index
    %45 = vector.load %arg2[%c0_61, %c0_62, %c0_63, %c360] : memref<1x1x8x3456xf32, #tpu.memory_space<vmem>>, vector<1x1x8x2688xf32>
    %46 = vector.shape_cast %45 : vector<1x1x8x2688xf32> to vector<8x2688xf32>
    %c120 = arith.constant 120 : index
    %c0_64 = arith.constant 0 : index
    %47 = vector.load %arg5[%c120, %c0_64] : memref<216x2688xf32, #tpu.memory_space<vmem>>, vector<8x2688xf32>
    tpu.vector_store %arg5[%c120, %c0_64], %46 {strides = array<i32>} : memref<216x2688xf32, #tpu.memory_space<vmem>>, vector<8x2688xf32>,
    %c0_65 = arith.constant 0 : index
    %c0_66 = arith.constant 0 : index
    %c0_67 = arith.constant 0 : index
    %c361 = arith.constant 361 : index
    %48 = vector.load %arg2[%c0_65, %c0_66, %c0_67, %c361] : memref<1x1x8x3456xf32, #tpu.memory_space<vmem>>, vector<1x1x8x2688xf32>
    %49 = vector.shape_cast %48 : vector<1x1x8x2688xf32> to vector<8x2688xf32>
    %c128 = arith.constant 128 : index
    %c0_68 = arith.constant 0 : index
    %50 = vector.load %arg5[%c128, %c0_68] : memref<216x2688xf32, #tpu.memory_space<vmem>>, vector<8x2688xf32>
    tpu.vector_store %arg5[%c128, %c0_68], %49 {strides = array<i32>} : memref<216x2688xf32, #tpu.memory_space<vmem>>, vector<8x2688xf32>,
    %c0_69 = arith.constant 0 : index
    %c0_70 = arith.constant 0 : index
    %c0_71 = arith.constant 0 : index
    %c362 = arith.constant 362 : index
    %51 = vector.load %arg2[%c0_69, %c0_70, %c0_71, %c362] : memref<1x1x8x3456xf32, #tpu.memory_space<vmem>>, vector<1x1x8x2688xf32>
    %52 = vector.shape_cast %51 : vector<1x1x8x2688xf32> to vector<8x2688xf32>
    %c136 = arith.constant 136 : index
    %c0_72 = arith.constant 0 : index
    %53 = vector.load %arg5[%c136, %c0_72] : memref<216x2688xf32, #tpu.memory_space<vmem>>, vector<8x2688xf32>
    tpu.vector_store %arg5[%c136, %c0_72], %52 {strides = array<i32>} : memref<216x2688xf32, #tpu.memory_space<vmem>>, vector<8x2688xf32>,
    %c0_73 = arith.constant 0 : index
    %c0_74 = arith.constant 0 : index
    %c0_75 = arith.constant 0 : index
    %c648 = arith.constant 648 : index
    %54 = vector.load %arg2[%c0_73, %c0_74, %c0_75, %c648] : memref<1x1x8x3456xf32, #tpu.memory_space<vmem>>, vector<1x1x8x2688xf32>
    %55 = vector.shape_cast %54 : vector<1x1x8x2688xf32> to vector<8x2688xf32>
    %c144 = arith.constant 144 : index
    %c0_76 = arith.constant 0 : index
    %56 = vector.load %arg5[%c144, %c0_76] : memref<216x2688xf32, #tpu.memory_space<vmem>>, vector<8x2688xf32>
    tpu.vector_store %arg5[%c144, %c0_76], %55 {strides = array<i32>} : memref<216x2688xf32, #tpu.memory_space<vmem>>, vector<8x2688xf32>,
    %c0_77 = arith.constant 0 : index
    %c0_78 = arith.constant 0 : index
    %c0_79 = arith.constant 0 : index
    %c649 = arith.constant 649 : index
    %57 = vector.load %arg2[%c0_77, %c0_78, %c0_79, %c649] : memref<1x1x8x3456xf32, #tpu.memory_space<vmem>>, vector<1x1x8x2688xf32>
    %58 = vector.shape_cast %57 : vector<1x1x8x2688xf32> to vector<8x2688xf32>
    %c152 = arith.constant 152 : index
    %c0_80 = arith.constant 0 : index
    %59 = vector.load %arg5[%c152, %c0_80] : memref<216x2688xf32, #tpu.memory_space<vmem>>, vector<8x2688xf32>
    tpu.vector_store %arg5[%c152, %c0_80], %58 {strides = array<i32>} : memref<216x2688xf32, #tpu.memory_space<vmem>>, vector<8x2688xf32>,
    %c0_81 = arith.constant 0 : index
    %c0_82 = arith.constant 0 : index
    %c0_83 = arith.constant 0 : index
    %c650 = arith.constant 650 : index
    %60 = vector.load %arg2[%c0_81, %c0_82, %c0_83, %c650] : memref<1x1x8x3456xf32, #tpu.memory_space<vmem>>, vector<1x1x8x2688xf32>
    %61 = vector.shape_cast %60 : vector<1x1x8x2688xf32> to vector<8x2688xf32>
    %c160 = arith.constant 160 : index
    %c0_84 = arith.constant 0 : index
    %62 = vector.load %arg5[%c160, %c0_84] : memref<216x2688xf32, #tpu.memory_space<vmem>>, vector<8x2688xf32>
    tpu.vector_store %arg5[%c160, %c0_84], %61 {strides = array<i32>} : memref<216x2688xf32, #tpu.memory_space<vmem>>, vector<8x2688xf32>,
    %c0_85 = arith.constant 0 : index
    %c0_86 = arith.constant 0 : index
    %c0_87 = arith.constant 0 : index
    %c666 = arith.constant 666 : index
    %63 = vector.load %arg2[%c0_85, %c0_86, %c0_87, %c666] : memref<1x1x8x3456xf32, #tpu.memory_space<vmem>>, vector<1x1x8x2688xf32>
    %64 = vector.shape_cast %63 : vector<1x1x8x2688xf32> to vector<8x2688xf32>
    %c168 = arith.constant 168 : index
    %c0_88 = arith.constant 0 : index
    %65 = vector.load %arg5[%c168, %c0_88] : memref<216x2688xf32, #tpu.memory_space<vmem>>, vector<8x2688xf32>
    tpu.vector_store %arg5[%c168, %c0_88], %64 {strides = array<i32>} : memref<216x2688xf32, #tpu.memory_space<vmem>>, vector<8x2688xf32>,
    %c0_89 = arith.constant 0 : index
    %c0_90 = arith.constant 0 : index
    %c0_91 = arith.constant 0 : index
    %c667 = arith.constant 667 : index
    %66 = vector.load %arg2[%c0_89, %c0_90, %c0_91, %c667] : memref<1x1x8x3456xf32, #tpu.memory_space<vmem>>, vector<1x1x8x2688xf32>
    %67 = vector.shape_cast %66 : vector<1x1x8x2688xf32> to vector<8x2688xf32>
    %c176 = arith.constant 176 : index
    %c0_92 = arith.constant 0 : index
    %68 = vector.load %arg5[%c176, %c0_92] : memref<216x2688xf32, #tpu.memory_space<vmem>>, vector<8x2688xf32>
    tpu.vector_store %arg5[%c176, %c0_92], %67 {strides = array<i32>} : memref<216x2688xf32, #tpu.memory_space<vmem>>, vector<8x2688xf32>,
    %c0_93 = arith.constant 0 : index
    %c0_94 = arith.constant 0 : index
    %c0_95 = arith.constant 0 : index
    %c668 = arith.constant 668 : index
    %69 = vector.load %arg2[%c0_93, %c0_94, %c0_95, %c668] : memref<1x1x8x3456xf32, #tpu.memory_space<vmem>>, vector<1x1x8x2688xf32>
    %70 = vector.shape_cast %69 : vector<1x1x8x2688xf32> to vector<8x2688xf32>
    %c184 = arith.constant 184 : index
    %c0_96 = arith.constant 0 : index
    %71 = vector.load %arg5[%c184, %c0_96] : memref<216x2688xf32, #tpu.memory_space<vmem>>, vector<8x2688xf32>
    tpu.vector_store %arg5[%c184, %c0_96], %70 {strides = array<i32>} : memref<216x2688xf32, #tpu.memory_space<vmem>>, vector<8x2688xf32>,
    %c0_97 = arith.constant 0 : index
    %c0_98 = arith.constant 0 : index
    %c0_99 = arith.constant 0 : index
    %c684 = arith.constant 684 : index
    %72 = vector.load %arg2[%c0_97, %c0_98, %c0_99, %c684] : memref<1x1x8x3456xf32, #tpu.memory_space<vmem>>, vector<1x1x8x2688xf32>
    %73 = vector.shape_cast %72 : vector<1x1x8x2688xf32> to vector<8x2688xf32>
    %c192 = arith.constant 192 : index
    %c0_100 = arith.constant 0 : index
    %74 = vector.load %arg5[%c192, %c0_100] : memref<216x2688xf32, #tpu.memory_space<vmem>>, vector<8x2688xf32>
    tpu.vector_store %arg5[%c192, %c0_100], %73 {strides = array<i32>} : memref<216x2688xf32, #tpu.memory_space<vmem>>, vector<8x2688xf32>,
    %c0_101 = arith.constant 0 : index
    %c0_102 = arith.constant 0 : index
    %c0_103 = arith.constant 0 : index
    %c685 = arith.constant 685 : index
    %75 = vector.load %arg2[%c0_101, %c0_102, %c0_103, %c685] : memref<1x1x8x3456xf32, #tpu.memory_space<vmem>>, vector<1x1x8x2688xf32>
    %76 = vector.shape_cast %75 : vector<1x1x8x2688xf32> to vector<8x2688xf32>
    %c200 = arith.constant 200 : index
    %c0_104 = arith.constant 0 : index
    %77 = vector.load %arg5[%c200, %c0_104] : memref<216x2688xf32, #tpu.memory_space<vmem>>, vector<8x2688xf32>
    tpu.vector_store %arg5[%c200, %c0_104], %76 {strides = array<i32>} : memref<216x2688xf32, #tpu.memory_space<vmem>>, vector<8x2688xf32>,
    %c0_105 = arith.constant 0 : index
    %c0_106 = arith.constant 0 : index
    %c0_107 = arith.constant 0 : index
    %c686 = arith.constant 686 : index
    %78 = vector.load %arg2[%c0_105, %c0_106, %c0_107, %c686] : memref<1x1x8x3456xf32, #tpu.memory_space<vmem>>, vector<1x1x8x2688xf32>
    %79 = vector.shape_cast %78 : vector<1x1x8x2688xf32> to vector<8x2688xf32>
    %c208 = arith.constant 208 : index
    %c0_108 = arith.constant 0 : index
    %80 = vector.load %arg5[%c208, %c0_108] : memref<216x2688xf32, #tpu.memory_space<vmem>>, vector<8x2688xf32>
    tpu.vector_store %arg5[%c208, %c0_108], %79 {strides = array<i32>} : memref<216x2688xf32, #tpu.memory_space<vmem>>, vector<8x2688xf32>,
    %c0_109 = arith.constant 0 : index
    %c0_110 = arith.constant 0 : index
    %81 = vector.load %arg3[%c0_109, %c0_110] : memref<8x216xf32, #tpu.memory_space<vmem>>, vector<8x216xf32>
    %c0_111 = arith.constant 0 : index
    %c0_112 = arith.constant 0 : index
    %82 = vector.load %arg5[%c0_111, %c0_112] : memref<216x2688xf32, #tpu.memory_space<vmem>>, vector<216x2688xf32>
    %cst = arith.constant dense<0.000000e+00> : vector<8x2688xf32>
    %83 = tpu.matmul %81, %82, %cst {dimension_numbers = #tpu.dot_dimension_numbers<[1], [0], [0], [1], [0, 0, 1, 1], [], []>} : vector<8x216xf32>, vector<216x2688xf32>, vector<8x2688xf32> -> vector<8x2688xf32>
    %c0_113 = arith.constant 0 : index
    %c0_114 = arith.constant 0 : index
    %c0_115 = arith.constant 0 : index
    %c0_116 = arith.constant 0 : index
    %84 = vector.load %arg4[%c0_113, %c0_114, %c0_115, %c0_116] : memref<1x1x8x2688xf32, #tpu.memory_space<vmem>>, vector<1x1x8x2688xf32>
    %85 = vector.shape_cast %84 : vector<1x1x8x2688xf32> to vector<8x2688xf32>
    %86 = vector.shape_cast %83 : vector<8x2688xf32> to vector<1x1x8x2688xf32>
    tpu.vector_store %arg4[%c0_113, %c0_114, %c0_115, %c0_116], %86 {strides = array<i32>} : memref<1x1x8x2688xf32, #tpu.memory_space<vmem>>, vector<1x1x8x2688xf32>,
    return
  }
  func.func @transform_0(%arg0: i32, %arg1: i32) -> (i32, i32, i32, i32) {
    %c0_i32 = arith.constant 0 : i32
    %c0_i32_0 = arith.constant 0 : i32
    %c0_i32_1 = arith.constant 0 : i32
    return %arg0, %arg1, %c0_i32, %c0_i32_0 : i32, i32, i32, i32
  }
  func.func @transform_1(%arg0: i32, %arg1: i32) -> (i32, i32) {
    %c0_i32 = arith.constant 0 : i32
    %c0_i32_0 = arith.constant 0 : i32
    %c0_i32_1 = arith.constant 0 : i32
    return %c0_i32, %c0_i32_0 : i32, i32
  }
  func.func @transform_2(%arg0: i32, %arg1: i32) -> (i32, i32, i32, i32) {
    %c0_i32 = arith.constant 0 : i32
    %c0_i32_0 = arith.constant 0 : i32
    %c0_i32_1 = arith.constant 0 : i32
    return %arg0, %arg1, %c0_i32, %c0_i32_0 : i32, i32, i32, i32
  }
}

</mosaic_0001>

<bundles_post_ra>
// kernel: depth_separable_conv.1
= control target key start
LH: loop header
LB: loop body
LE: loop exit
PB: predicated region body
PF: predicated region fallthrough
CT: control target
= control target key end

     0   :  { %s7660_s9 = smov 0   ;;  %s7662_s10 = smov 0   ;;  %s11161_s0 = inlined_call_operand.vmem [shape: f32[2,1,8,3456], index: 0, kind: input, shape index: {}]   ;;  %s11162_s1 = inlined_call_operand.vmem [shape: f32[8,216], index: 1, kind: input, shape index: {}]   ;;  %s11163_s2 = inlined_call_operand.vmem [shape: f32[2,1,8,2688], index: 2, kind: output, shape index: {}]  }
   0x1   :  { %s7664_s11 = smov 0  }
   0x2 LB: > { %s24_s12 = sadd.s32 1, %s7611_s10  ;;  %p5644_p0 = scmp.ge.s32.totalorder %s7615_s11, 1  ;;  %s7615_s11 = sphi %s7664_s11, %s12_s11   ;;  %s7611_s10 = sphi %s7662_s10, %s11942_s10   ;;  %s7607_s9 = sphi %s7660_s9, %s11941_s9  }
   0x3   : > { %p26_p1 = scmp.ge.s32.totalorder %s24_s12, 2  ;;  %p132_p2 = scmp.lt.s32.totalorder %s7615_s11, 3 }
   0x5   : > { %s11944_s12 = smov (%p26_p1, %s24_s12), 0  ;;  %p133_p3 = pnand %p5644_p0, %p132_p2 }
   0x7   : > { %136 = sbr.rel (%p133_p3) target bundleno = 972 (0x3cc), region = 28 }
   0xe   : > { %p162_p4 = scmp.lt.s32.totalorder %s7607_s9, 1  ;;  %s7617_s17 = smov 127   ;;  %vm310_vm0 = vcmask 1039360   ;;  %vm462_vm1 = vcmask 1031168   ;;  %vm614_vm2 = vcmask 900096   ;;  %vm766_vm3 = vcmask 891904  }
   0xf   : > { %s7618_s18 = smov 126   ;;  %s7619_s19 = smov 110   ;;  %vm918_vm4 = vcmask 883712   ;;  %vm1070_vm5 = vcmask 752640   ;;  %vm1222_vm6 = vcmask 744448   ;;  %vm1374_vm7 = vcmask 736256  }
  0x10   : > { %s11946_s9 = smov (!%p162_p4, %s7607_s9), 1  ;;  %s7620_s20 = smov 109   ;;  %vm1526_vm8 = vcmask 490496   ;;  %vm1678_vm9 = vcmask 482304   ;;  %vm4743_vm10 = vcmask 719872   ;;  %vm1830_vm11 = vcmask 474112  }
  0x11   : > { %s6219_s13 = smul.u32 216, %s11946_s9  ;;  %s7621_s21 = smov 108   ;;  %vm1982_vm12 = vcmask 343040   ;;  %vm2134_vm13 = vcmask 334848   ;;  %vm2438_vm14 = vcmask 195584   ;;  %vm2286_vm15 = vcmask 326656  }
  0x12   : > { %s7622_s22 = smov 92   ;;  %s7623_s23 = smov 91  }
  0x13   : > { %s7684_s16 = scalar_lea.vmem %s11161_s0, %s6219_s13  ;;  %s7624_s24 = smov 90  }
  0x14   : > { %v226_v0 = vld [vmem:[%s7684_s16 + $0x20] sm:$0xff]  ;;  %v227_v1 = vld [vmem:[%s7684_s16 + $0x28] sm:$0xff]  ;;  %v228_v5 = vld [vmem:[%s7684_s16 + $0x30] sm:$0xff]  ;;  %s7625_s25 = smov 60   ;;  %s7626_s26 = smov 59  }
  0x15   : > { %v7689_v2 = vld [vmem:[%s7684_s16] sm:$0xff]  ;;  %v7691_v3 = vpack.i.bf16 %v227_v1, %v226_v0  ;;  %v7694_v4 = vld [vmem:[%s7684_s16 + $0x8] sm:$0xff]  ;;  %v229_v6 = vld [vmem:[%s7684_s16 + $0x38] sm:$0xff]  ;;  %s7627_s27 = smov 58   ;;  %s7628_s28 = smov 42  }
  0x16   : > { %v7700_v7 = vpack.i.bf16 %v7694_v4, %v7689_v2  ;;  %v7703_v8 = vld [vmem:[%s7684_s16 + $0x10] sm:$0xff]  ;;  %v7706_v9 = vld [vmem:[%s7684_s16 + $0x18] sm:$0xff]  ;;  %v7710_v10 = vpack.i.bf16 %v229_v6, %v228_v5  ;;  %v230_v14 = vld [vmem:[%s7684_s16 + $0x40] sm:$0xff]  ;;  %s7629_s29 = smov 41   ;;  %s7630_s30 = smov 40  }
  0x17   : > { %6284 = vrot.lane.b32.xlu1 %v7691_v3, %s7617_s17  ;;  %v7716_v11 = vpack.i.bf16 %v7706_v9, %v7703_v8  ;;  %v232_v12 = vld [vmem:[%s7684_s16 + $0x50] sm:$0xff]  ;;  %v233_v13 = vld [vmem:[%s7684_s16 + $0x58] sm:$0xff]  ;;  %v231_v15 = vld [vmem:[%s7684_s16 + $0x48] sm:$0xff]  ;;  %s7631_s3 = smov 24   ;;  %s7632_s4 = smov 23  }
  0x18   : > { %6274 = vrot.lane.b32.xlu0 %v7700_v7, %s7617_s17  ;;  %v7724_v16 = vpack.i.bf16 %v233_v13, %v232_v12  ;;  %v7728_v17 = vpack.i.bf16 %v231_v15, %v230_v14  ;;  %v236_v18 = vld [vmem:[%s7684_s16 + $0x70] sm:$0xff]  ;;  %v237_v19 = vld [vmem:[%s7684_s16 + $0x78] sm:$0xff]  ;;  %v234_v20 = vld [vmem:[%s7684_s16 + $0x60] sm:$0xff]  ;;  %s7633_s5 = smov 22   ;;  %s7634_s6 = smov 120  }
  0x19   : > { %v235_v21 = vld [vmem:[%s7684_s16 + $0x68] sm:$0xff]  ;;  %v7736_v22 = vpack.i.bf16 %v237_v19, %v236_v18  ;;  %v240_v24 = vld [vmem:[%s7684_s16 + $0x90] sm:$0xff]  ;;  %v241_v25 = vld [vmem:[%s7684_s16 + $0x98] sm:$0xff]  ;;  %s7635_s7 = smov 119   ;;  %s7636_s8 = smov 118  }
  0x1a   : > { %v7740_v23 = vpack.i.bf16 %v235_v21, %v234_v20  ;;  %v238_v26 = vld [vmem:[%s7684_s16 + $0x80] sm:$0xff]  ;;  %v239_v27 = vld [vmem:[%s7684_s16 + $0x88] sm:$0xff]  ;;  %v7748_v28 = vpack.i.bf16 %v241_v25, %v240_v24  ;;  %v1442_v14 = vld [vmem:[%s7684_s16 + $0x30] sm:$0xff]  ;;  %s7637_s13 = smov 102   ;;  %s7638_s14 = smov 101  }
  0x1b   : > { %6289 = vrot.lane.b32.xlu1 %v7710_v10, %s7617_s17  ;;  %v7752_v29 = vpack.i.bf16 %v239_v27, %v238_v26  ;;  %v242_v30 = vld [vmem:[%s7684_s16 + $0xa0] sm:$0xff]  ;;  %v243_v31 = vld [vmem:[%s7684_s16 + $0xa8] sm:$0xff]  ;;  %v1443_v15 = vld [vmem:[%s7684_s16 + $0x38] sm:$0xff]  ;;  %s7639_s15 = smov 100  }
  0x1c   : > { %6279 = vrot.lane.b32.xlu0 %v7716_v11, %s7617_s17  ;;  %v7760_v32 = vpack.i.bf16 %v243_v31, %v242_v30  ;;  %v1441_v13 = vld [vmem:[%s7684_s16 + $0x28] sm:$0xff]  ;;  %v7908_v31 = vpack.i.bf16 %v1443_v15, %v1442_v14 }
  0x1f   : > { %6299 = vrot.lane.b32.xlu1 %v7724_v16, %s7617_s17 }
  0x20   : > { %6294 = vrot.lane.b32.xlu0 %v7728_v17, %s7617_s17 }
  0x23   : > { %6309 = vrot.lane.b32.xlu1 %v7736_v22, %s7617_s17 }
  0x24   : > { %6304 = vrot.lane.b32.xlu0 %v7740_v23, %s7617_s17 }
  0x27   : > { %6319 = vrot.lane.b32.xlu1 %v7748_v28, %s7617_s17 }
  0x28   : > { %6314 = vrot.lane.b32.xlu0 %v7752_v29, %s7617_s17 }
  0x2b   : > { %6329 = vrot.lane.b32.xlu1 %v7700_v7, %s7618_s18 }
  0x2c   : > { %6324 = vrot.lane.b32.xlu0 %v7760_v32, %s7617_s17  ;;  %s7640_s17 = smov 84  }
  0x2f   : > { %6339 = vrot.lane.b32.xlu1 %v7691_v3, %s7618_s18 }
  0x30   : > { %6334 = vrot.lane.b32.xlu0 %v7716_v11, %s7618_s18 }
  0x33   : > { %6349 = vrot.lane.b32.xlu1 %v7728_v17, %s7618_s18 }
  0x34   : > { %6344 = vrot.lane.b32.xlu0 %v7710_v10, %s7618_s18 }
  0x37   : > { %6359 = vrot.lane.b32.xlu1 %v7740_v23, %s7618_s18 }
  0x38   : > { %6354 = vrot.lane.b32.xlu0 %v7724_v16, %s7618_s18 }
  0x3b   : > { %6369 = vrot.lane.b32.xlu1 %v7752_v29, %s7618_s18 }
  0x3c   : > { %6364 = vrot.lane.b32.xlu0 %v7736_v22, %s7618_s18 }
  0x3f   : > { %6379 = vrot.lane.b32.xlu1 %v7760_v32, %s7618_s18 }
  0x40   : > { %6374 = vrot.lane.b32.xlu0 %v7748_v28, %s7618_s18  ;;  %s7641_s18 = smov 83  }
  0x43   : > { %6389 = vrot.lane.b32.xlu1 %v7716_v11, %s7619_s19 }
  0x44   : > { %6384 = vrot.lane.b32.xlu0 %v7700_v7, %s7619_s19 }
  0x47   : > { %6399 = vrot.lane.b32.xlu1 %v7710_v10, %s7619_s19 }
  0x48   : > { %6394 = vrot.lane.b32.xlu0 %v7691_v3, %s7619_s19 }
  0x4b   : > { %6409 = vrot.lane.b32.xlu1 %v7724_v16, %s7619_s19 }
  0x4c   : > { %6404 = vrot.lane.b32.xlu0 %v7728_v17, %s7619_s19 }
  0x4f   : > { %6419 = vrot.lane.b32.xlu1 %v7736_v22, %s7619_s19 }
  0x50   : > { %6414 = vrot.lane.b32.xlu0 %v7740_v23, %s7619_s19 }
  0x53   : > { %6429 = vrot.lane.b32.xlu1 %v7748_v28, %s7619_s19 }
  0x54   : > { %6424 = vrot.lane.b32.xlu0 %v7752_v29, %s7619_s19 }
  0x57   : > { %6439 = vrot.lane.b32.xlu1 %v7700_v7, %s7620_s20 }
  0x58   : > { %6434 = vrot.lane.b32.xlu0 %v7760_v32, %s7619_s19 }
  0x5b   : > { %6449 = vrot.lane.b32.xlu1 %v7691_v3, %s7620_s20 }
  0x5c   : > { %6444 = vrot.lane.b32.xlu0 %v7716_v11, %s7620_s20 }
  0x5f   : > { %6459 = vrot.lane.b32.xlu1 %v7728_v17, %s7620_s20 }
  0x60   : > { %6454 = vrot.lane.b32.xlu0 %v7710_v10, %s7620_s20 }
  0x63   : > { %6469 = vrot.lane.b32.xlu1 %v7740_v23, %s7620_s20 }
  0x64   : > { %6464 = vrot.lane.b32.xlu0 %v7724_v16, %s7620_s20 }
  0x67   : > { %6479 = vrot.lane.b32.xlu1 %v7752_v29, %s7620_s20 }
  0x68   : > { %6474 = vrot.lane.b32.xlu0 %v7736_v22, %s7620_s20 }
  0x6b   : > { %6489 = vrot.lane.b32.xlu1 %v7760_v32, %s7620_s20 }
  0x6c   : > { %6484 = vrot.lane.b32.xlu0 %v7748_v28, %s7620_s20 }
  0x6f   : > { %6499 = vrot.lane.b32.xlu1 %v7716_v11, %s7621_s21 }
  0x70   : > { %6494 = vrot.lane.b32.xlu0 %v7700_v7, %s7621_s21 }
  0x73   : > { %6509 = vrot.lane.b32.xlu1 %v7710_v10, %s7621_s21 }
  0x74   : > { %6504 = vrot.lane.b32.xlu0 %v7691_v3, %s7621_s21 }
  0x77   : > { %6519 = vrot.lane.b32.xlu1 %v7724_v16, %s7621_s21 }
  0x78   : > { %6514 = vrot.lane.b32.xlu0 %v7728_v17, %s7621_s21 }
  0x7b   : > { %6529 = vrot.lane.b32.xlu1 %v7736_v22, %s7621_s21 }
  0x7c   : > { %6524 = vrot.lane.b32.xlu0 %v7740_v23, %s7621_s21 }
  0x7f   : > { %6539 = vrot.lane.b32.xlu1 %v7748_v28, %s7621_s21 }
  0x80   : > { %6534 = vrot.lane.b32.xlu0 %v7752_v29, %s7621_s21 }
  0x83   : > { %6549 = vrot.lane.b32.xlu1 %v7700_v7, %s7622_s22 }
  0x84   : > { %6544 = vrot.lane.b32.xlu0 %v7760_v32, %s7621_s21  ;;  %s7642_s21 = smov 82  }
  0x87   : > { %6559 = vrot.lane.b32.xlu1 %v7691_v3, %s7622_s22 }
  0x88   : > { %6554 = vrot.lane.b32.xlu0 %v7716_v11, %s7622_s22 }
  0x89   : > { %v7814_v33 = vpop.permute.xlu1 %6284 }
  0x8a   : > { %v11164_v34 = vunpack.i.h.bf16 %v7814_v33  ;;  %v6286_v35 = vunpack.i.l.bf16 %v7814_v33  ;;  %v6275_v36 = vpop.permute.xlu0 %6274 }
  0x8b   : > { %6569 = vrot.lane.b32.xlu1 %v7728_v17, %s7622_s22  ;;  %v6277_v38 = vunpack.i.h.bf16 %v6275_v36  ;;  %v6276_v39 = vunpack.i.l.bf16 %v6275_v36 }
  0x8c   : > { %v7823_v37 = vsel %vm310_vm0, %v6286_v35, %v11164_v34  ;;  %6564 = vrot.lane.b32.xlu0 %v7710_v10, %s7622_s22  ;;  %v1457_v34 = vld [vmem:[%s7684_s16 + $0xa8] sm:$0xff] }
  0x8d   : > { %v7827_v40 = vpop.permute.xlu1 %6289  ;;  %v311_v44 = vsel %vm310_vm0, %v6276_v39, %v6277_v38 }
  0x8e   : > { %v6280_v41 = vpop.permute.xlu0 %6279  ;;  %v5662_v52 = vpack.c.bf16 %v311_v44, %v7689_v2 }
  0x8f   : > { %v6282_v42 = vunpack.i.h.bf16 %v6280_v41  ;;  %v6281_v43 = vunpack.i.l.bf16 %v6280_v41  ;;  %6579 = vrot.lane.b32.xlu1 %v7740_v23, %s7622_s22 }
  0x90   : > { %6574 = vrot.lane.b32.xlu0 %v7724_v16, %s7622_s22 }
  0x91   : > { %v7834_v45 = vpop.permute.xlu1 %6299  ;;  %v312_v46 = vsel %vm310_vm0, %v6277_v38, %v6281_v43  ;;  %v314_v47 = vsel %vm310_vm0, %v6282_v42, %v6286_v35  ;;  %v313_v48 = vsel %vm310_vm0, %v6281_v43, %v6282_v42 }
  0x92   : > { %11394 = vst [vmem:[#allocation3_spill] sm:$0xff] %v7834_v45  ;;  %v7839_v49 = vpop.permute.xlu0 %6294  ;;  %v5660_v50 = vpack.c.bf16 %v312_v46, %v7694_v4  ;;  %v5712_v51 = vpack.c.bf16 %v314_v47, %v7706_v9  ;;  %v5714_v53 = vpack.c.bf16 %v313_v48, %v7703_v8  ;;  %v7890_v9 = vld [vmem:[%s7684_s16 + $0x20] sm:$0xff] }
  0x93   : > { %11395 = vst [vmem:[#allocation4_spill] sm:$0xff] %v7839_v49  ;;  %6589 = vrot.lane.b32.xlu1 %v7752_v29, %s7622_s22  ;;  %v7906_v30 = vpack.i.bf16 %v1441_v13, %v7890_v9 }
  0x94   : > { %6584 = vrot.lane.b32.xlu0 %v7736_v22, %s7622_s22  ;;  %5661 = vmatprep.subr.bf16.mxu0 %v5660_v50 }
  0x95   : > { %5713 = vmatprep.subr.bf16.mxu1 %v5712_v51  ;;  %5663 = vmatpush1.bf16.msra.mxu0 %v5662_v52  ;;  %v7849_v54 = vpop.permute.xlu1 %6309 }
  0x96   : > { %11396 = vst [vmem:[#allocation5_spill] sm:$0xff] %v7849_v54  ;;  %5715 = vmatpush1.bf16.msra.mxu1 %v5714_v53  ;;  %v7851_v55 = vpop.permute.xlu0 %6304 }
  0x97   : > { %11397 = vst [vmem:[#allocation6_spill] sm:$0xff] %v7851_v55  ;;  %6599 = vrot.lane.b32.xlu1 %v7760_v32, %s7622_s22 }
  0x98   : > { %6594 = vrot.lane.b32.xlu0 %v7748_v28, %s7622_s22 }
  0x99   : > { %v7857_v56 = vpop.permute.xlu1 %6319 }
  0x9a   : > { %11398 = vst [vmem:[#allocation7_spill] sm:$0xff] %v7857_v56  ;;  %v7859_v57 = vpop.permute.xlu0 %6314 }
  0x9b   : > { %11399 = vst [vmem:[#allocation8_spill] sm:$0xff] %v7859_v57  ;;  %6609 = vrot.lane.b32.xlu1 %v7716_v11, %s7623_s23 }
  0x9c   : > { %6604 = vrot.lane.b32.xlu0 %v7700_v7, %s7623_s23 }
  0x9d   : > { %v6330_v58 = vpop.permute.xlu1 %6329 }
  0x9e   : > { %v7863_v59 = vpop.permute.xlu0 %6324  ;;  %v6332_v18 = vunpack.i.h.bf16 %v6330_v58  ;;  %v6331_v19 = vunpack.i.l.bf16 %v6330_v58 }
  0x9f   : > { %11400 = vst [vmem:[#allocation9_spill] sm:$0xff] %v7863_v59  ;;  %6619 = vrot.lane.b32.xlu1 %v7710_v10, %s7623_s23 }
  0xa0   : > { %6614 = vrot.lane.b32.xlu0 %v7691_v3, %s7623_s23  ;;  %v463_v44 = vsel %vm462_vm1, %v6331_v19, %v6332_v18 }
  0xa1   : > { %v6340_v60 = vpop.permute.xlu1 %6339 }
  0xa2   : > { %v6342_v61 = vunpack.i.h.bf16 %v6340_v60  ;;  %v6341_v62 = vunpack.i.l.bf16 %v6340_v60  ;;  %v6335_v63 = vpop.permute.xlu0 %6334 }
  0xa3   : > { %6629 = vrot.lane.b32.xlu1 %v7724_v16, %s7623_s23  ;;  %v6337_v20 = vunpack.i.h.bf16 %v6335_v63  ;;  %v6336_v21 = vunpack.i.l.bf16 %v6335_v63 }
  0xa4   : > { %v7869_v0 = vsel %vm462_vm1, %v6341_v62, %v6342_v61  ;;  %6624 = vrot.lane.b32.xlu0 %v7728_v17, %s7623_s23 }
  0xa5   : > { %v7872_v1 = vpop.permute.xlu1 %6349  ;;  %v464_v43 = vsel %vm462_vm1, %v6332_v18, %v6336_v21  ;;  %v466_v46 = vsel %vm462_vm1, %v6337_v20, %v6341_v62  ;;  %v465_v51 = vsel %vm462_vm1, %v6336_v21, %v6337_v20 }
  0xa6   : > { %v6345_v2 = vpop.permute.xlu0 %6344  ;;  %v6352_v25 = vunpack.i.h.bf16 %v7872_v1  ;;  %v6351_v26 = vunpack.i.l.bf16 %v7872_v1 }
  0xa7   : > { %6639 = vrot.lane.b32.xlu1 %v7736_v22, %s7623_s23  ;;  %v6346_v27 = vunpack.i.l.bf16 %v6345_v2 }
  0xa8   : > { %6634 = vrot.lane.b32.xlu0 %v7740_v23, %s7623_s23  ;;  %v7918_v47 = vsel %vm462_vm1, %v6351_v26, %v6352_v25 }
  0xa9   : > { %v7876_v4 = vpop.permute.xlu1 %6359  ;;  %11401 = vst [vmem:[#allocation10_spill] sm:$0xff] %v7918_v47  ;;  %v7929_v58 = vsel %vm462_vm1, %v6342_v61, %v6346_v27 }
  0xaa   : > { %v7878_v5 = vpop.permute.xlu0 %6354  ;;  %v6362_v35 = vunpack.i.h.bf16 %v7876_v4  ;;  %v6361_v36 = vunpack.i.l.bf16 %v7876_v4 }
  0xab   : > { %6649 = vrot.lane.b32.xlu1 %v7748_v28, %s7623_s23  ;;  %v6357_v38 = vunpack.i.h.bf16 %v7878_v5  ;;  %v6356_v39 = vunpack.i.l.bf16 %v7878_v5 }
  0xac   : > { %6644 = vrot.lane.b32.xlu0 %v7752_v29, %s7623_s23  ;;  %v7937_v62 = vsel %vm462_vm1, %v6361_v36, %v6362_v35 }
  0xad   : > { %v7882_v6 = vpop.permute.xlu1 %6369  ;;  %11404 = vst [vmem:[#allocation13_spill] sm:$0xff] %v7937_v62  ;;  %v7940_v63 = vsel %vm462_vm1, %v6356_v39, %v6357_v38  ;;  %v7947_v20 = vsel %vm462_vm1, %v6352_v25, %v6356_v39  ;;  %v7950_v21 = vsel %vm462_vm1, %v6357_v38, %v6361_v36 }
  0xae   : > { %v7884_v8 = vpop.permute.xlu0 %6364  ;;  %11405 = vst [vmem:[#allocation14_spill] sm:$0xff] %v7940_v63  ;;  %11406 = vst [vmem:[#allocation15_spill] sm:$0xff] %v7947_v20 }
  0xaf   : > { %6659 = vrot.lane.b32.xlu1 %v7700_v7, %s7624_s24  ;;  %v6347_v7 = vunpack.i.h.bf16 %v6345_v2  ;;  %11407 = vst [vmem:[#allocation16_spill] sm:$0xff] %v7950_v21 }
  0xb0   : > { %6654 = vrot.lane.b32.xlu0 %v7760_v32, %s7623_s23 }
  0xb1   : > { %v7892_v12 = vpop.permute.xlu1 %6379  ;;  %v7924_v52 = vsel %vm462_vm1, %v6346_v27, %v6347_v7  ;;  %v7932_v60 = vsel %vm462_vm1, %v6347_v7, %v6351_v26  ;;  %v6367_v26 = vunpack.i.h.bf16 %v7884_v8  ;;  %v6366_v7 = vunpack.i.l.bf16 %v7884_v8 }
  0xb2   : > { %v7897_v24 = vpop.permute.xlu0 %6374  ;;  %11402 = vst [vmem:[#allocation11_spill] sm:$0xff] %v7924_v52  ;;  %11403 = vst [vmem:[#allocation12_spill] sm:$0xff] %v7932_v60 }
  0xb3   : > { %6669 = vrot.lane.b32.xlu1 %v7691_v3, %s7624_s24 }
  0xb4   : > { %6664 = vrot.lane.b32.xlu0 %v7716_v11, %s7624_s24 }
  0xb5   : > { %v6390_v3 = vpop.permute.xlu1 %6389 }
  0xb6   : > { %v6391_v41 = vunpack.i.l.bf16 %v6390_v3  ;;  %v6385_v42 = vpop.permute.xlu0 %6384  ;;  %v6392_v53 = vunpack.i.h.bf16 %v6390_v3 }
  0xb7   : > { %v6387_v48 = vunpack.i.h.bf16 %v6385_v42  ;;  %v6386_v50 = vunpack.i.l.bf16 %v6385_v42  ;;  %6679 = vrot.lane.b32.xlu1 %v7728_v17, %s7624_s24 }
  0xb8   : > { %6674 = vrot.lane.b32.xlu0 %v7710_v10, %s7624_s24  ;;  %v617_v3 = vsel %vm614_vm2, %v6391_v41, %v6392_v53 }
  0xb9   : > { %v6400_v1 = vpop.permute.xlu1 %6399  ;;  %v616_v2 = vsel %vm614_vm2, %v6387_v48, %v6391_v41  ;;  %v615_v5 = vsel %vm614_vm2, %v6386_v50, %v6387_v48 }
  0xba   : > { %v6402_v10 = vunpack.i.h.bf16 %v6400_v1  ;;  %v6401_v13 = vunpack.i.l.bf16 %v6400_v1  ;;  %v6395_v61 = vpop.permute.xlu0 %6394  ;;  %v5664_v14 = vpack.c.bf16 %v616_v2, %v464_v43  ;;  %v5666_v15 = vpack.c.bf16 %v615_v5, %v463_v44 }
  0xbb   : > { %v6397_v18 = vunpack.i.h.bf16 %v6395_v61  ;;  %v6396_v19 = vunpack.i.l.bf16 %v6395_v61  ;;  %6689 = vrot.lane.b32.xlu1 %v7740_v23, %s7624_s24  ;;  %v6372_v44 = vunpack.i.h.bf16 %v7882_v6  ;;  %v6371_v1 = vunpack.i.l.bf16 %v7882_v6 }
  0xbc   : > { %v7955_v27 = vsel %vm614_vm2, %v6401_v13, %v6402_v10  ;;  %6684 = vrot.lane.b32.xlu0 %v7724_v16, %s7624_s24  ;;  %5665 = vmatprep.subr.bf16.mxu0 %v5664_v14  ;;  %v7976_v2 = vsel %vm462_vm1, %v6366_v7, %v6367_v26  ;;  %v1448_v14 = vld [vmem:[%s7684_s16 + $0x60] sm:$0xff] }
  0xbd   : > { %11408 = vst [vmem:[#allocation17_spill] sm:$0xff] %v7955_v27  ;;  %v7961_v23 = vsel %vm614_vm2, %v6396_v19, %v6397_v18  ;;  %5667 = vmatpush1.bf16.msra.mxu0 %v5666_v15  ;;  %v6410_v25 = vpop.permute.xlu1 %6409  ;;  %v618_v36 = vsel %vm614_vm2, %v6392_v53, %v6396_v19  ;;  %v7965_v38 = vsel %vm614_vm2, %v6397_v18, %v6401_v13  ;;  %11409 = vst [vmem:[#allocation18_spill] sm:$0xff] %v7976_v2  ;;  %v1453_v19 = vld [vmem:[%s7684_s16 + $0x88] sm:$0xff] }
  0xbe   : > { %v6412_v39 = vunpack.i.h.bf16 %v6410_v25  ;;  %v6411_v42 = vunpack.i.l.bf16 %v6410_v25  ;;  %v6405_v43 = vpop.permute.xlu0 %6404  ;;  %v5716_v16 = vpack.c.bf16 %v618_v36, %v466_v46  ;;  %v5718_v53 = vpack.c.bf16 %v617_v3, %v465_v51  ;;  %v1447_v3 = vld [vmem:[%s7684_s16 + $0x58] sm:$0xff] }
  0xbf   : > { %v6407_v48 = vunpack.i.h.bf16 %v6405_v43  ;;  %v6406_v50 = vunpack.i.l.bf16 %v6405_v43  ;;  %6699 = vrot.lane.b32.xlu1 %v7752_v29, %s7624_s24  ;;  %v6377_v43 = vunpack.i.h.bf16 %v7897_v24 }
  0xc0   : > { %v7979_v5 = vsel %vm614_vm2, %v6411_v42, %v6412_v39  ;;  %6694 = vrot.lane.b32.xlu0 %v7736_v22, %s7624_s24  ;;  %5717 = vmatprep.subr.bf16.mxu1 %v5716_v16  ;;  %v6376_v16 = vunpack.i.l.bf16 %v7897_v24 }
  0xc1   : > { %11410 = vst [vmem:[#allocation19_spill] sm:$0xff] %v7979_v5  ;;  %v7986_v13 = vsel %vm614_vm2, %v6406_v50, %v6407_v48  ;;  %5719 = vmatpush1.bf16.msra.mxu1 %v5718_v53  ;;  %v6420_v29 = vpop.permute.xlu1 %6419  ;;  %v7989_v51 = vsel %vm614_vm2, %v6402_v10, %v6406_v50  ;;  %v7992_v61 = vsel %vm614_vm2, %v6407_v48, %v6411_v42  ;;  %v1446_v10 = vld [vmem:[%s7684_s16 + $0x50] sm:$0xff] }
  0xc2   : > { %11411 = vst [vmem:[#allocation20_spill] sm:$0xff] %v7986_v13  ;;  %11412 = vst [vmem:[#allocation21_spill] sm:$0xff] %v7989_v51  ;;  %v6422_v15 = vunpack.i.h.bf16 %v6420_v29  ;;  %v6421_v22 = vunpack.i.l.bf16 %v6420_v29  ;;  %v6415_v18 = vpop.permute.xlu0 %6414  ;;  %v8007_v42 = vsel %vm462_vm1, %v6362_v35, %v6366_v7  ;;  %v8041_v24 = vsel %vm462_vm1, %v6376_v16, %v6377_v43 }
  0xc3   : > { %11413 = vst [vmem:[#allocation22_spill] sm:$0xff] %v7992_v61  ;;  %v6417_v25 = vunpack.i.h.bf16 %v6415_v18  ;;  %v6416_v36 = vunpack.i.l.bf16 %v6415_v18  ;;  %6709 = vrot.lane.b32.xlu1 %v7760_v32, %s7624_s24  ;;  %11414 = vst [vmem:[#allocation23_spill] sm:$0xff] %v8007_v42  ;;  %v8017_v32 = vsel %vm462_vm1, %v6367_v26, %v6371_v1  ;;  %v8053_v26 = vsel %vm462_vm1, %v6372_v44, %v6376_v16 }
  0xc4   : > { %v8012_v48 = vsel %vm614_vm2, %v6421_v22, %v6422_v15  ;;  %6704 = vrot.lane.b32.xlu0 %v7748_v28, %s7624_s24  ;;  %11416 = vst [vmem:[#allocation25_spill] sm:$0xff] %v8017_v32  ;;  %11420 = vst [vmem:[#allocation29_spill] sm:$0xff] %v8041_v24  ;;  %v8073_v16 = vsel %vm462_vm1, %v6371_v1, %v6372_v44  ;;  %v8087_v44 = vpack.i.bf16 %v1447_v3, %v1446_v10  ;;  %v1452_v1 = vld [vmem:[%s7684_s16 + $0x80] sm:$0xff]  ;;  %v8143_v24 = vld [vmem:[%s7684_s16 + $0x10] sm:$0xff] }
  0xc5   : > { %11415 = vst [vmem:[#allocation24_spill] sm:$0xff] %v8012_v48  ;;  %v8020_v50 = vsel %vm614_vm2, %v6416_v36, %v6417_v25  ;;  %v6430_v4 = vpop.permute.xlu1 %6429  ;;  %v8023_v35 = vsel %vm614_vm2, %v6412_v39, %v6416_v36  ;;  %v8026_v7 = vsel %vm614_vm2, %v6417_v25, %v6421_v22  ;;  %v6382_v39 = vunpack.i.h.bf16 %v7892_v12  ;;  %11422 = vst [vmem:[#allocation31_spill] sm:$0xff] %v8053_v26 }
  0xc6   : > { %11417 = vst [vmem:[#allocation26_spill] sm:$0xff] %v8020_v50  ;;  %11418 = vst [vmem:[#allocation27_spill] sm:$0xff] %v8023_v35  ;;  %v6432_v53 = vunpack.i.h.bf16 %v6430_v4  ;;  %v6431_v28 = vunpack.i.l.bf16 %v6430_v4  ;;  %v6425_v29 = vpop.permute.xlu0 %6424  ;;  %v6381_v4 = vunpack.i.l.bf16 %v7892_v12 }
  0xc7   : > { %11419 = vst [vmem:[#allocation28_spill] sm:$0xff] %v8026_v7  ;;  %v6427_v22 = vunpack.i.h.bf16 %v6425_v29  ;;  %v6426_v25 = vunpack.i.l.bf16 %v6425_v29  ;;  %6719 = vrot.lane.b32.xlu1 %v7906_v30, %s7625_s25  ;;  %v1449_v29 = vld [vmem:[%s7684_s16 + $0x68] sm:$0xff]  ;;  %11426 = vst [vmem:[#allocation35_spill] sm:$0xff] %v8073_v16  ;;  %v8173_v16 = vld [vmem:[%s7684_s16 + $0x40] sm:$0xff] }
  0xc8   : > { %v8044_v18 = vsel %vm614_vm2, %v6431_v28, %v6432_v53  ;;  %6714 = vrot.lane.b32.xlu0 %v7716_v11, %s7625_s25  ;;  %v8092_v41 = vsel %vm462_vm1, %v6381_v4, %v6382_v39 }
  0xc9   : > { %11421 = vst [vmem:[#allocation30_spill] sm:$0xff] %v8044_v18  ;;  %v8056_v36 = vsel %vm614_vm2, %v6426_v25, %v6427_v22  ;;  %v8058_v12 = vpop.permute.xlu1 %6439  ;;  %v8063_v8 = vsel %vm614_vm2, %v6422_v15, %v6426_v25  ;;  %v8066_v11 = vsel %vm614_vm2, %v6427_v22, %v6431_v28  ;;  %v8081_v22 = vpack.i.bf16 %v1449_v29, %v1448_v14  ;;  %v1451_v14 = vld [vmem:[%s7684_s16 + $0x78] sm:$0xff]  ;;  %v1458_v18 = vld [vmem:[%s7684_s16 + $0xb0] sm:$0xff] }
  0xca   : > { %11423 = vst [vmem:[#allocation32_spill] sm:$0xff] %v8056_v36  ;;  %11424 = vst [vmem:[#allocation33_spill] sm:$0xff] %v8063_v8  ;;  %v6435_v46 = vpop.permute.xlu0 %6434  ;;  %v8102_v29 = vsel %vm462_vm1, %v6377_v43, %v6381_v4  ;;  %v8117_v43 = vpack.i.bf16 %v1453_v19, %v1452_v1  ;;  %v1597_v36 = vld [vmem:[%s7684_s16 + $0x48] sm:$0xff]  ;;  %v6442_v26 = vunpack.i.h.bf16 %v8058_v12  ;;  %vm2590_vm1 = vcmask 187392  }
  0xcb   : > { %11425 = vst [vmem:[#allocation34_spill] sm:$0xff] %v8066_v11  ;;  %v6437_v25 = vunpack.i.h.bf16 %v6435_v46  ;;  %v6436_v28 = vunpack.i.l.bf16 %v6435_v46  ;;  %6729 = vrot.lane.b32.xlu1 %v7728_v17, %s7625_s25  ;;  %11427 = vst [vmem:[#allocation36_spill] sm:$0xff] %v8092_v41  ;;  %v1450_v17 = vld [vmem:[%s7684_s16 + $0x70] sm:$0xff] }
  0xcc   : > { %6724 = vrot.lane.b32.xlu0 %v7908_v31, %s7625_s25  ;;  %11429 = vst [vmem:[#allocation38_spill] sm:$0xff] %v8102_v29  ;;  %v8126_v4 = vpack.i.bf16 %v1451_v14, %v1450_v17  ;;  %v1454_v41 = vld [vmem:[%s7684_s16 + $0x90] sm:$0xff]  ;;  %v8146_v17 = vld [vmem:[%s7684_s16 + $0x18] sm:$0xff] }
  0xcd   : > { %v8095_v46 = vsel %vm614_vm2, %v6436_v28, %v6437_v25  ;;  %v8097_v15 = vpop.permute.xlu1 %6449  ;;  %v8105_v3 = vsel %vm614_vm2, %v6432_v53, %v6436_v28  ;;  %v1456_v28 = vld [vmem:[%s7684_s16 + $0xa0] sm:$0xff]  ;;  %v1459_v29 = vld [vmem:[%s7684_s16 + $0xb8] sm:$0xff]  ;;  %vm2742_vm2 = vcmask 179200  }
  0xce   : > { %11428 = vst [vmem:[#allocation37_spill] sm:$0xff] %v8095_v46  ;;  %11430 = vst [vmem:[#allocation39_spill] sm:$0xff] %v8105_v3  ;;  %v11167_v10 = vunpack.i.h.bf16 %v8097_v15  ;;  %v6451_v39 = vunpack.i.l.bf16 %v8097_v15  ;;  %v8109_v25 = vpop.permute.xlu0 %6444  ;;  %v1455_v46 = vld [vmem:[%s7684_s16 + $0x98] sm:$0xff]  ;;  %v8136_v1 = vpack.i.bf16 %v1457_v34, %v1456_v28  ;;  %v8156_v34 = vpack.i.bf16 %v8146_v17, %v8143_v24 }
  0xcf   : > { %6739 = vrot.lane.b32.xlu1 %v8081_v22, %s7625_s25  ;;  %v6446_v11 = vunpack.i.l.bf16 %v8109_v25 }
  0xd0   : > { %v8122_v53 = vsel %vm766_vm3, %v6451_v39, %v11167_v10  ;;  %6734 = vrot.lane.b32.xlu0 %v8087_v44, %s7625_s25  ;;  %v8140_v10 = vpack.i.bf16 %v1455_v46, %v1454_v41  ;;  %v8160_v41 = vpack.i.bf16 %v1459_v29, %v1458_v18  ;;  %v6441_v18 = vunpack.i.l.bf16 %v8058_v12 }
  0xd1   : > { %v8130_v6 = vpop.permute.xlu1 %6459  ;;  %v6447_v29 = vunpack.i.h.bf16 %v8109_v25  ;;  %v8189_v12 = vpack.i.bf16 %v1597_v36, %v8173_v16  ;;  %v768_v63 = vsel %vm766_vm3, %v6442_v26, %v6446_v11 }
  0xd2   : > { %v6455_v19 = vpop.permute.xlu0 %6454  ;;  %v6462_v48 = vunpack.i.h.bf16 %v8130_v6  ;;  %v6461_v32 = vunpack.i.l.bf16 %v8130_v6 }
  0xd3   : > { %6749 = vrot.lane.b32.xlu1 %v8117_v43, %s7625_s25  ;;  %v6457_v8 = vunpack.i.h.bf16 %v6455_v19  ;;  %v6456_v56 = vunpack.i.l.bf16 %v6455_v19  ;;  %v767_v19 = vsel %vm766_vm3, %v6441_v18, %v6442_v26  ;;  %v770_v5 = vsel %vm766_vm3, %v6447_v29, %v6451_v39 }
  0xd4   : > { %6744 = vrot.lane.b32.xlu0 %v8126_v4, %s7625_s25  ;;  %v8197_v21 = vsel %vm766_vm3, %v6461_v32, %v6462_v48  ;;  %v769_v25 = vsel %vm766_vm3, %v6446_v11, %v6447_v29  ;;  %v11433_v26 = vunpack.i.h.bf16 %v8097_v15 }
  0xd5   : > { %v8148_v14 = vpop.permute.xlu1 %6469  ;;  %11431 = vst [vmem:[#allocation40_spill] sm:$0xff] %v8197_v21  ;;  %v8213_v18 = vsel %vm766_vm3, %v6457_v8, %v6461_v32 }
  0xd6   : > { %v6465_v3 = vpop.permute.xlu0 %6464  ;;  %v6471_v57 = vunpack.i.l.bf16 %v8148_v14  ;;  %v8210_v39 = vsel %vm766_vm3, %v11433_v26, %v6456_v56  ;;  %11434 = vst [vmem:[#allocation42_spill] sm:$0xff] %v8213_v18 }
  0xd7   : > { %6759 = vrot.lane.b32.xlu1 %v8136_v1, %s7625_s25  ;;  %v6467_v62 = vunpack.i.h.bf16 %v6465_v3  ;;  %v6466_v50 = vunpack.i.l.bf16 %v6465_v3  ;;  %v8203_v3 = vsel %vm766_vm3, %v6456_v56, %v6457_v8 }
  0xd8   : > { %6754 = vrot.lane.b32.xlu0 %v8140_v10, %s7625_s25  ;;  %11432 = vst [vmem:[#allocation41_spill] sm:$0xff] %v8203_v3 }
  0xd9   : > { %v8162_v46 = vpop.permute.xlu1 %6479  ;;  %v8221_v11 = vsel %vm766_vm3, %v6466_v50, %v6467_v62  ;;  %v8231_v61 = vsel %vm766_vm3, %v6467_v62, %v6471_v57 }
  0xda   : > { %v8164_v28 = vpop.permute.xlu0 %6474  ;;  %11437 = vst [vmem:[#allocation44_spill] sm:$0xff] %v8221_v11  ;;  %11439 = vst [vmem:[#allocation46_spill] sm:$0xff] %v8231_v61 }
  0xdb   : > { %6769 = vrot.lane.b32.xlu1 %v8156_v34, %s7626_s26  ;;  %v6477_v52 = vunpack.i.h.bf16 %v8164_v28 }
  0xdc   : > { %6764 = vrot.lane.b32.xlu0 %v8160_v41, %s7625_s25 }
  0xdd   : > { %v8170_v59 = vpop.permute.xlu1 %6489 }
  0xde   : > { %v8180_v2 = vpop.permute.xlu0 %6484  ;;  %v6492_v21 = vunpack.i.h.bf16 %v8170_v59 }
  0xdf   : > { %6779 = vrot.lane.b32.xlu1 %v7908_v31, %s7626_s26 }
  0xe0   : > { %6774 = vrot.lane.b32.xlu0 %v7906_v30, %s7626_s26 }
  0xe1   : > { %v6500_v42 = vpop.permute.xlu1 %6499 }
  0xe2   : > { %v6501_v6 = vunpack.i.l.bf16 %v6500_v42  ;;  %v6495_v7 = vpop.permute.xlu0 %6494  ;;  %v6502_v54 = vunpack.i.h.bf16 %v6500_v42 }
  0xe3   : > { %v6497_v36 = vunpack.i.h.bf16 %v6495_v7  ;;  %v6496_v35 = vunpack.i.l.bf16 %v6495_v7  ;;  %6789 = vrot.lane.b32.xlu1 %v8087_v44, %s7626_s26  ;;  %v11435_v7 = vunpack.i.h.bf16 %v8148_v14 }
  0xe4   : > { %6784 = vrot.lane.b32.xlu0 %v8189_v12, %s7626_s26 }
  0xe5   : > { %v8218_v55 = vsel %vm766_vm3, %v6471_v57, %v11435_v7  ;;  %v6510_v42 = vpop.permute.xlu1 %6509  ;;  %v920_v29 = vsel %vm918_vm4, %v6497_v36, %v6501_v6  ;;  %v919_v47 = vsel %vm918_vm4, %v6496_v35, %v6497_v36  ;;  %v8228_v7 = vsel %vm766_vm3, %v6462_v48, %v6466_v50 }
  0xe6   : > { %11436 = vst [vmem:[#allocation43_spill] sm:$0xff] %v8218_v55  ;;  %v6512_v15 = vunpack.i.h.bf16 %v6510_v42  ;;  %v6511_v13 = vunpack.i.l.bf16 %v6510_v42  ;;  %v6505_v56 = vpop.permute.xlu0 %6504  ;;  %v5668_v26 = vpack.c.bf16 %v920_v29, %v768_v63  ;;  %v5670_v20 = vpack.c.bf16 %v919_v47, %v767_v19  ;;  %11438 = vst [vmem:[#allocation45_spill] sm:$0xff] %v8228_v7 }
  0xe7   : > { %v6507_v8 = vunpack.i.h.bf16 %v6505_v56  ;;  %v6506_v32 = vunpack.i.l.bf16 %v6505_v56  ;;  %6799 = vrot.lane.b32.xlu1 %v8126_v4, %s7626_s26  ;;  %v6476_v35 = vunpack.i.l.bf16 %v8164_v28  ;;  %v921_v47 = vsel %vm918_vm4, %v6501_v6, %v6502_v54 }
  0xe8   : > { %v8236_v36 = vsel %vm918_vm4, %v6511_v13, %v6512_v15  ;;  %6794 = vrot.lane.b32.xlu0 %v8081_v22, %s7626_s26  ;;  %5669 = vmatprep.subr.bf16.mxu0 %v5668_v26 }
  0xe9   : > { %11440 = vst [vmem:[#allocation47_spill] sm:$0xff] %v8236_v36  ;;  %v8242_v63 = vsel %vm918_vm4, %v6506_v32, %v6507_v8  ;;  %5671 = vmatpush1.bf16.msra.mxu0 %v5670_v20  ;;  %v6520_v48 = vpop.permute.xlu1 %6519  ;;  %v922_v57 = vsel %vm918_vm4, %v6502_v54, %v6506_v32  ;;  %v8246_v62 = vsel %vm918_vm4, %v6507_v8, %v6511_v13  ;;  %v6482_v13 = vunpack.i.h.bf16 %v8162_v46 }
  0xea   : > { %v6522_v28 = vunpack.i.h.bf16 %v6520_v48  ;;  %v6521_v19 = vunpack.i.l.bf16 %v6520_v48  ;;  %v6515_v42 = vpop.permute.xlu0 %6514  ;;  %v5720_v29 = vpack.c.bf16 %v922_v57, %v770_v5  ;;  %v5722_v20 = vpack.c.bf16 %v921_v47, %v769_v25 }
  0xeb   : > { %v6517_v56 = vunpack.i.h.bf16 %v6515_v42  ;;  %v6516_v26 = vunpack.i.l.bf16 %v6515_v42  ;;  %6809 = vrot.lane.b32.xlu1 %v8140_v10, %s7626_s26  ;;  %v6481_v8 = vunpack.i.l.bf16 %v8162_v46  ;;  %v8259_v32 = vsel %vm766_vm3, %v6476_v35, %v6477_v52 }
  0xec   : > { %11441 = vst [vmem:[#allocation48_spill] sm:$0xff] %v8259_v32  ;;  %v8262_v5 = vsel %vm918_vm4, %v6521_v19, %v6522_v28  ;;  %6804 = vrot.lane.b32.xlu0 %v8117_v43, %s7626_s26  ;;  %5721 = vmatprep.subr.bf16.mxu1 %v5720_v29 }
  0xed   : > { %11442 = vst [vmem:[#allocation49_spill] sm:$0xff] %v8262_v5  ;;  %v8267_v48 = vsel %vm918_vm4, %v6516_v26, %v6517_v56  ;;  %5723 = vmatpush1.bf16.msra.mxu1 %v5722_v20  ;;  %v6530_v25 = vpop.permute.xlu1 %6529  ;;  %v8270_v47 = vsel %vm918_vm4, %v6512_v15, %v6516_v26  ;;  %v8273_v46 = vsel %vm918_vm4, %v6517_v56, %v6521_v19  ;;  %v11446_v19 = vunpack.i.h.bf16 %v8148_v14 }
  0xee   : > { %11443 = vst [vmem:[#allocation50_spill] sm:$0xff] %v8267_v48  ;;  %11444 = vst [vmem:[#allocation51_spill] sm:$0xff] %v8270_v47  ;;  %v6532_v42 = vunpack.i.h.bf16 %v6530_v25  ;;  %v6531_v50 = vunpack.i.l.bf16 %v6530_v25  ;;  %v6525_v54 = vpop.permute.xlu0 %6524  ;;  %v6487_v26 = vunpack.i.h.bf16 %v8180_v2  ;;  %v6486_v25 = vunpack.i.l.bf16 %v8180_v2 }
  0xef   : > { %11445 = vst [vmem:[#allocation52_spill] sm:$0xff] %v8273_v46  ;;  %v6527_v20 = vunpack.i.h.bf16 %v6525_v54  ;;  %v6526_v3 = vunpack.i.l.bf16 %v6525_v54  ;;  %6819 = vrot.lane.b32.xlu1 %v8160_v41, %s7626_s26  ;;  %v8288_v56 = vsel %vm766_vm3, %v11446_v19, %v6476_v35  ;;  %v8298_v54 = vsel %vm766_vm3, %v6477_v52, %v6481_v8 }
  0xf0   : > { %11447 = vst [vmem:[#allocation53_spill] sm:$0xff] %v8288_v56  ;;  %v8293_v57 = vsel %vm918_vm4, %v6531_v50, %v6532_v42  ;;  %6814 = vrot.lane.b32.xlu0 %v8136_v1, %s7626_s26  ;;  %11449 = vst [vmem:[#allocation55_spill] sm:$0xff] %v8298_v54  ;;  %v8346_v32 = vsel %vm766_vm3, %v6481_v8, %v6482_v13 }
  0xf1   : > { %11448 = vst [vmem:[#allocation54_spill] sm:$0xff] %v8293_v57  ;;  %v8301_v15 = vsel %vm918_vm4, %v6526_v3, %v6527_v20  ;;  %v6540_v14 = vpop.permute.xlu1 %6539  ;;  %v8304_v35 = vsel %vm918_vm4, %v6522_v28, %v6526_v3  ;;  %v8307_v19 = vsel %vm918_vm4, %v6527_v20, %v6531_v50  ;;  %v6491_v28 = vunpack.i.l.bf16 %v8170_v59  ;;  %11459 = vst [vmem:[#allocation65_spill] sm:$0xff] %v8346_v32 }
  0xf2   : > { %11450 = vst [vmem:[#allocation56_spill] sm:$0xff] %v8301_v15  ;;  %11451 = vst [vmem:[#allocation57_spill] sm:$0xff] %v8304_v35  ;;  %v6542_v6 = vunpack.i.h.bf16 %v6540_v14  ;;  %v6541_v29 = vunpack.i.l.bf16 %v6540_v14  ;;  %v6535_v11 = vpop.permute.xlu0 %6534  ;;  %v8322_v20 = vsel %vm766_vm3, %v6486_v25, %v6487_v26 }
  0xf3   : > { %11452 = vst [vmem:[#allocation58_spill] sm:$0xff] %v8307_v19  ;;  %v6537_v48 = vunpack.i.h.bf16 %v6535_v11  ;;  %v6536_v3 = vunpack.i.l.bf16 %v6535_v11  ;;  %6829 = vrot.lane.b32.xlu1 %v7906_v30, %s7627_s27  ;;  %11453 = vst [vmem:[#allocation59_spill] sm:$0xff] %v8322_v20  ;;  %v8330_v11 = vsel %vm766_vm3, %v6482_v13, %v6486_v25  ;;  %v8359_v13 = vsel %vm766_vm3, %v6491_v28, %v6492_v21 }
  0xf4   : > { %v8325_v14 = vsel %vm918_vm4, %v6541_v29, %v6542_v6  ;;  %6824 = vrot.lane.b32.xlu0 %v8156_v34, %s7627_s27  ;;  %11455 = vst [vmem:[#allocation61_spill] sm:$0xff] %v8330_v11  ;;  %11460 = vst [vmem:[#allocation66_spill] sm:$0xff] %v8359_v13 }
  0xf5   : > { %11454 = vst [vmem:[#allocation60_spill] sm:$0xff] %v8325_v14  ;;  %v8333_v2 = vsel %vm918_vm4, %v6536_v3, %v6537_v48  ;;  %v8335_v5 = vpop.permute.xlu1 %6549  ;;  %v8338_v50 = vsel %vm918_vm4, %v6532_v42, %v6536_v3  ;;  %v8341_v59 = vsel %vm918_vm4, %v6537_v48, %v6541_v29  ;;  %v8365_v29 = vsel %vm766_vm3, %v6487_v26, %v6491_v28 }
  0xf6   : > { %11456 = vst [vmem:[#allocation62_spill] sm:$0xff] %v8333_v2  ;;  %11457 = vst [vmem:[#allocation63_spill] sm:$0xff] %v8338_v50  ;;  %v6545_v57 = vpop.permute.xlu0 %6544  ;;  %v6552_v25 = vunpack.i.h.bf16 %v8335_v5  ;;  %v6551_v13 = vunpack.i.l.bf16 %v8335_v5  ;;  %vm2894_vm3 = vcmask 982016  }
  0xf7   : > { %11458 = vst [vmem:[#allocation64_spill] sm:$0xff] %v8341_v59  ;;  %v6547_v15 = vunpack.i.h.bf16 %v6545_v57  ;;  %v6546_v56 = vunpack.i.l.bf16 %v6545_v57  ;;  %6839 = vrot.lane.b32.xlu1 %v8189_v12, %s7627_s27  ;;  %11462 = vst [vmem:[#allocation68_spill] sm:$0xff] %v8365_v29 }
  0xf8   : > { %6834 = vrot.lane.b32.xlu0 %v7908_v31, %s7627_s27  ;;  %v1071_v61 = vsel %vm1070_vm5, %v6551_v13, %v6552_v25 }
  0xf9   : > { %v8362_v8 = vsel %vm918_vm4, %v6546_v56, %v6547_v15  ;;  %v6560_v42 = vpop.permute.xlu1 %6559  ;;  %v8368_v57 = vsel %vm918_vm4, %v6542_v6, %v6546_v56  ;;  %vm3046_vm4 = vcmask 973824  }
  0xfa   : > { %11461 = vst [vmem:[#allocation67_spill] sm:$0xff] %v8362_v8  ;;  %11463 = vst [vmem:[#allocation69_spill] sm:$0xff] %v8368_v57  ;;  %v6562_v3 = vunpack.i.h.bf16 %v6560_v42  ;;  %v6561_v52 = vunpack.i.l.bf16 %v6560_v42  ;;  %v6555_v55 = vpop.permute.xlu0 %6554 }
  0xfb   : > { %6849 = vrot.lane.b32.xlu1 %v8081_v22, %s7627_s27  ;;  %v6557_v8 = vunpack.i.h.bf16 %v6555_v55  ;;  %v6556_v20 = vunpack.i.l.bf16 %v6555_v55 }
  0xfc   : > { %v8377_v15 = vsel %vm1070_vm5, %v6561_v52, %v6562_v3  ;;  %6844 = vrot.lane.b32.xlu0 %v8087_v44, %s7627_s27 }
  0xfd   : > { %v6570_v6 = vpop.permute.xlu1 %6569  ;;  %v1074_v35 = vsel %vm1070_vm5, %v6557_v8, %v6561_v52  ;;  %v1073_v11 = vsel %vm1070_vm5, %v6556_v20, %v6557_v8 }
  0xfe   : > { %v6565_v56 = vpop.permute.xlu0 %6564  ;;  %v6572_v29 = vunpack.i.h.bf16 %v6570_v6  ;;  %v6571_v57 = vunpack.i.l.bf16 %v6570_v6  ;;  %v1072_v6 = vsel %vm1070_vm5, %v6552_v25, %v6556_v20 }
  0xff   : > { %6859 = vrot.lane.b32.xlu1 %v8117_v43, %s7627_s27  ;;  %v6567_v32 = vunpack.i.h.bf16 %v6565_v56  ;;  %v6566_v2 = vunpack.i.l.bf16 %v6565_v56 }
 0x100   : > { %6854 = vrot.lane.b32.xlu0 %v8126_v4, %s7627_s27  ;;  %v8415_v56 = vsel %vm1070_vm5, %v6571_v57, %v6572_v29 }
 0x101   : > { %v8385_v26 = vpop.permute.xlu1 %6579  ;;  %11464 = vst [vmem:[#allocation70_spill] sm:$0xff] %v8415_v56  ;;  %v8426_v25 = vsel %vm1070_vm5, %v6562_v3, %v6566_v2  ;;  %v8429_v52 = vsel %vm1070_vm5, %v6567_v32, %v6571_v57 }
 0x102   : > { %v6575_v28 = vpop.permute.xlu0 %6574  ;;  %v6581_v59 = vunpack.i.l.bf16 %v8385_v26  ;;  %11466 = vst [vmem:[#allocation72_spill] sm:$0xff] %v8429_v52 }
 0x103   : > { %6869 = vrot.lane.b32.xlu1 %v8136_v1, %s7627_s27  ;;  %v6577_v5 = vunpack.i.h.bf16 %v6575_v28  ;;  %v6576_v54 = vunpack.i.l.bf16 %v6575_v28  ;;  %v8421_v28 = vsel %vm1070_vm5, %v6566_v2, %v6567_v32 }
 0x104   : > { %6864 = vrot.lane.b32.xlu0 %v8140_v10, %s7627_s27  ;;  %11465 = vst [vmem:[#allocation71_spill] sm:$0xff] %v8421_v28 }
 0x105   : > { %v8391_v42 = vpop.permute.xlu1 %6589  ;;  %v8437_v20 = vsel %vm1070_vm5, %v6576_v54, %v6577_v5  ;;  %v8447_v51 = vsel %vm1070_vm5, %v6577_v5, %v6581_v59 }
 0x106   : > { %v8393_v21 = vpop.permute.xlu0 %6584  ;;  %11469 = vst [vmem:[#allocation74_spill] sm:$0xff] %v8437_v20  ;;  %11471 = vst [vmem:[#allocation76_spill] sm:$0xff] %v8447_v51 }
 0x107   : > { %6879 = vrot.lane.b32.xlu1 %v8156_v34, %s7628_s28  ;;  %v6587_v45 = vunpack.i.h.bf16 %v8393_v21 }
 0x108   : > { %6874 = vrot.lane.b32.xlu0 %v8160_v41, %s7627_s27 }
 0x109   : > { %v8399_v48 = vpop.permute.xlu1 %6599 }
 0x10a   : > { %v8403_v14 = vpop.permute.xlu0 %6594  ;;  %v6602_v56 = vunpack.i.h.bf16 %v8399_v48 }
 0x10b   : > { %6889 = vrot.lane.b32.xlu1 %v7908_v31, %s7628_s28 }
 0x10c   : > { %6884 = vrot.lane.b32.xlu0 %v7906_v30, %s7628_s28 }
 0x10d   : > { %v6610_v55 = vpop.permute.xlu1 %6609 }
 0x10e   : > { %v6611_v50 = vunpack.i.l.bf16 %v6610_v55  ;;  %v6605_v19 = vpop.permute.xlu0 %6604  ;;  %v6612_v36 = vunpack.i.h.bf16 %v6610_v55 }
 0x10f   : > { %v6607_v7 = vunpack.i.h.bf16 %v6605_v19  ;;  %v6606_v46 = vunpack.i.l.bf16 %v6605_v19  ;;  %6899 = vrot.lane.b32.xlu1 %v8087_v44, %s7628_s28  ;;  %v11467_v19 = vunpack.i.h.bf16 %v8385_v26 }
 0x110   : > { %6894 = vrot.lane.b32.xlu0 %v8189_v12, %s7628_s28 }
 0x111   : > { %v8434_v13 = vsel %vm1070_vm5, %v6581_v59, %v11467_v19  ;;  %v6620_v8 = vpop.permute.xlu1 %6619  ;;  %v1224_v55 = vsel %vm1222_vm6, %v6607_v7, %v6611_v50  ;;  %v1223_v18 = vsel %vm1222_vm6, %v6606_v46, %v6607_v7  ;;  %v8444_v19 = vsel %vm1070_vm5, %v6572_v29, %v6576_v54 }
 0x112   : > { %11468 = vst [vmem:[#allocation73_spill] sm:$0xff] %v8434_v13  ;;  %v6622_v47 = vunpack.i.h.bf16 %v6620_v8  ;;  %v6621_v27 = vunpack.i.l.bf16 %v6620_v8  ;;  %v6615_v2 = vpop.permute.xlu0 %6614  ;;  %v5672_v3 = vpack.c.bf16 %v1224_v55, %v1072_v6  ;;  %v5674_v60 = vpack.c.bf16 %v1223_v18, %v1071_v61  ;;  %11470 = vst [vmem:[#allocation75_spill] sm:$0xff] %v8444_v19 }
 0x113   : > { %v6617_v32 = vunpack.i.h.bf16 %v6615_v2  ;;  %v6616_v57 = vunpack.i.l.bf16 %v6615_v2  ;;  %6909 = vrot.lane.b32.xlu1 %v8126_v4, %s7628_s28  ;;  %v6586_v7 = vunpack.i.l.bf16 %v8393_v21  ;;  %v1225_v61 = vsel %vm1222_vm6, %v6611_v50, %v6612_v36 }
 0x114   : > { %v8452_v46 = vsel %vm1222_vm6, %v6621_v27, %v6622_v47  ;;  %6904 = vrot.lane.b32.xlu0 %v8081_v22, %s7628_s28  ;;  %5673 = vmatprep.subr.bf16.mxu0 %v5672_v3 }
 0x115   : > { %11472 = vst [vmem:[#allocation77_spill] sm:$0xff] %v8452_v46  ;;  %v8458_v18 = vsel %vm1222_vm6, %v6616_v57, %v6617_v32  ;;  %5675 = vmatpush1.bf16.msra.mxu0 %v5674_v60  ;;  %v6630_v54 = vpop.permute.xlu1 %6629  ;;  %v1226_v59 = vsel %vm1222_vm6, %v6612_v36, %v6616_v57  ;;  %v8462_v29 = vsel %vm1222_vm6, %v6617_v32, %v6621_v27  ;;  %v6592_v36 = vunpack.i.h.bf16 %v8391_v42 }
 0x116   : > { %v6632_v5 = vunpack.i.h.bf16 %v6630_v54  ;;  %v6631_v6 = vunpack.i.l.bf16 %v6630_v54  ;;  %v6625_v8 = vpop.permute.xlu0 %6624  ;;  %v5724_v55 = vpack.c.bf16 %v1226_v59, %v1074_v35  ;;  %v5726_v60 = vpack.c.bf16 %v1225_v61, %v1073_v11 }
 0x117   : > { %v6627_v2 = vunpack.i.h.bf16 %v6625_v8  ;;  %v6626_v3 = vunpack.i.l.bf16 %v6625_v8  ;;  %6919 = vrot.lane.b32.xlu1 %v8140_v10, %s7628_s28  ;;  %v6591_v32 = vunpack.i.l.bf16 %v8391_v42  ;;  %v8475_v57 = vsel %vm1070_vm5, %v6586_v7, %v6587_v45 }
 0x118   : > { %11473 = vst [vmem:[#allocation78_spill] sm:$0xff] %v8475_v57  ;;  %v8478_v35 = vsel %vm1222_vm6, %v6631_v6, %v6632_v5  ;;  %6914 = vrot.lane.b32.xlu0 %v8117_v43, %s7628_s28  ;;  %5725 = vmatprep.subr.bf16.mxu1 %v5724_v55 }
 0x119   : > { %11474 = vst [vmem:[#allocation79_spill] sm:$0xff] %v8478_v35  ;;  %v8483_v54 = vsel %vm1222_vm6, %v6626_v3, %v6627_v2  ;;  %5727 = vmatpush1.bf16.msra.mxu1 %v5726_v60  ;;  %v6640_v11 = vpop.permute.xlu1 %6639  ;;  %v8486_v61 = vsel %vm1222_vm6, %v6622_v47, %v6626_v3  ;;  %v8489_v42 = vsel %vm1222_vm6, %v6627_v2, %v6631_v6  ;;  %v11478_v6 = vunpack.i.h.bf16 %v8385_v26 }
 0x11a   : > { %11475 = vst [vmem:[#allocation80_spill] sm:$0xff] %v8483_v54  ;;  %11476 = vst [vmem:[#allocation81_spill] sm:$0xff] %v8486_v61  ;;  %v6642_v8 = vunpack.i.h.bf16 %v6640_v11  ;;  %v6641_v21 = vunpack.i.l.bf16 %v6640_v11  ;;  %v6635_v27 = vpop.permute.xlu0 %6634  ;;  %v6597_v3 = vunpack.i.h.bf16 %v8403_v14  ;;  %v6596_v11 = vunpack.i.l.bf16 %v8403_v14 }
 0x11b   : > { %11477 = vst [vmem:[#allocation82_spill] sm:$0xff] %v8489_v42  ;;  %v6637_v60 = vunpack.i.h.bf16 %v6635_v27  ;;  %v6636_v28 = vunpack.i.l.bf16 %v6635_v27  ;;  %6929 = vrot.lane.b32.xlu1 %v8160_v41, %s7628_s28  ;;  %v8504_v2 = vsel %vm1070_vm5, %v11478_v6, %v6586_v7  ;;  %v8514_v27 = vsel %vm1070_vm5, %v6587_v45, %v6591_v32 }
 0x11c   : > { %11479 = vst [vmem:[#allocation83_spill] sm:$0xff] %v8504_v2  ;;  %v8509_v59 = vsel %vm1222_vm6, %v6641_v21, %v6642_v8  ;;  %6924 = vrot.lane.b32.xlu0 %v8136_v1, %s7628_s28  ;;  %11481 = vst [vmem:[#allocation85_spill] sm:$0xff] %v8514_v27  ;;  %v8562_v57 = vsel %vm1070_vm5, %v6591_v32, %v6592_v36 }
 0x11d   : > { %11480 = vst [vmem:[#allocation84_spill] sm:$0xff] %v8509_v59  ;;  %v8517_v47 = vsel %vm1222_vm6, %v6636_v28, %v6637_v60  ;;  %v6650_v26 = vpop.permute.xlu1 %6649  ;;  %v8520_v7 = vsel %vm1222_vm6, %v6632_v5, %v6636_v28  ;;  %v8523_v6 = vsel %vm1222_vm6, %v6637_v60, %v6641_v21  ;;  %v6601_v5 = vunpack.i.l.bf16 %v8399_v48  ;;  %11491 = vst [vmem:[#allocation95_spill] sm:$0xff] %v8562_v57 }
 0x11e   : > { %11482 = vst [vmem:[#allocation86_spill] sm:$0xff] %v8517_v47  ;;  %11483 = vst [vmem:[#allocation87_spill] sm:$0xff] %v8520_v7  ;;  %v6652_v50 = vunpack.i.h.bf16 %v6650_v26  ;;  %v6651_v55 = vunpack.i.l.bf16 %v6650_v26  ;;  %v6645_v20 = vpop.permute.xlu0 %6644  ;;  %v8538_v60 = vsel %vm1070_vm5, %v6596_v11, %v6597_v3 }
 0x11f   : > { %11484 = vst [vmem:[#allocation88_spill] sm:$0xff] %v8523_v6  ;;  %v6647_v54 = vunpack.i.h.bf16 %v6645_v20  ;;  %v6646_v28 = vunpack.i.l.bf16 %v6645_v20  ;;  %6939 = vrot.lane.b32.xlu1 %v7906_v30, %s7629_s29  ;;  %11485 = vst [vmem:[#allocation89_spill] sm:$0xff] %v8538_v60  ;;  %v8546_v20 = vsel %vm1070_vm5, %v6592_v36, %v6596_v11  ;;  %v8575_v36 = vsel %vm1070_vm5, %v6601_v5, %v6602_v56  ;;  %v8636_v56 = vld [vmem:[%s7684_s16 + $0x30] sm:$0xff] }
 0x120   : > { %v8541_v26 = vsel %vm1222_vm6, %v6651_v55, %v6652_v50  ;;  %6934 = vrot.lane.b32.xlu0 %v8156_v34, %s7629_s29  ;;  %11487 = vst [vmem:[#allocation91_spill] sm:$0xff] %v8546_v20  ;;  %11492 = vst [vmem:[#allocation96_spill] sm:$0xff] %v8575_v36 }
 0x121   : > { %11486 = vst [vmem:[#allocation90_spill] sm:$0xff] %v8541_v26  ;;  %v8549_v14 = vsel %vm1222_vm6, %v6646_v28, %v6647_v54  ;;  %v8551_v35 = vpop.permute.xlu1 %6659  ;;  %v8554_v21 = vsel %vm1222_vm6, %v6642_v8, %v6646_v28  ;;  %v8557_v48 = vsel %vm1222_vm6, %v6647_v54, %v6651_v55  ;;  %v8583_v55 = vsel %vm1070_vm5, %v6597_v3, %v6601_v5 }
 0x122   : > { %11488 = vst [vmem:[#allocation92_spill] sm:$0xff] %v8549_v14  ;;  %11489 = vst [vmem:[#allocation93_spill] sm:$0xff] %v8554_v21  ;;  %v6655_v59 = vpop.permute.xlu0 %6654  ;;  %v6661_v54 = vunpack.i.l.bf16 %v8551_v35  ;;  %vm3198_vm5 = vcmask 965632  }
 0x123   : > { %11490 = vst [vmem:[#allocation94_spill] sm:$0xff] %v8557_v48  ;;  %v6657_v47 = vunpack.i.h.bf16 %v6655_v59  ;;  %v6656_v2 = vunpack.i.l.bf16 %v6655_v59  ;;  %6949 = vrot.lane.b32.xlu1 %v8189_v12, %s7629_s29  ;;  %11494 = vst [vmem:[#allocation98_spill] sm:$0xff] %v8583_v55 }
 0x124   : > { %6944 = vrot.lane.b32.xlu0 %v7908_v31, %s7629_s29  ;;  %v6662_v31 = vunpack.i.h.bf16 %v8551_v35 }
 0x125   : > { %v8578_v32 = vsel %vm1222_vm6, %v6656_v2, %v6657_v47  ;;  %v8580_v8 = vpop.permute.xlu1 %6669  ;;  %v8586_v59 = vsel %vm1222_vm6, %v6652_v50, %v6656_v2  ;;  %vm3350_vm6 = vcmask 834560  }
 0x126   : > { %11493 = vst [vmem:[#allocation97_spill] sm:$0xff] %v8578_v32  ;;  %11495 = vst [vmem:[#allocation99_spill] sm:$0xff] %v8586_v59  ;;  %v11242_v12 = vunpack.i.h.bf16 %v8580_v8  ;;  %v6671_v28 = vunpack.i.l.bf16 %v8580_v8  ;;  %v8590_v45 = vpop.permute.xlu0 %6664 }
 0x127   : > { %6959 = vrot.lane.b32.xlu1 %v8081_v22, %s7629_s29 }
 0x128   : > { %v8601_v50 = vsel %vm1374_vm7, %v6671_v28, %v11242_v12  ;;  %6954 = vrot.lane.b32.xlu0 %v8087_v44, %s7629_s29  ;;  %v7588_v12 = vld [vmem:[%s7684_s16 + $0x28] sm:$0xff] }
 0x129   : > { %11496 = vst [vmem:[#allocation100_spill] sm:$0xff] %v8601_v50  ;;  %v8605_v47 = vpop.permute.xlu1 %6679 }
 0x12a   : > { %v8607_v2 = vpop.permute.xlu0 %6674  ;;  %v6681_v60 = vunpack.i.l.bf16 %v8605_v47 }
 0x12b   : > { %6969 = vrot.lane.b32.xlu1 %v8117_v43, %s7629_s29  ;;  %v6998_v43 = vpack.i.bf16 %v7890_v9, %v8146_v17  ;;  %v6666_v9 = vunpack.i.l.bf16 %v8590_v45  ;;  %v6676_v26 = vunpack.i.l.bf16 %v8607_v2 }
 0x12c   : > { %6964 = vrot.lane.b32.xlu0 %v8126_v4, %s7629_s29  ;;  %v8630_v4 = vld [vmem:[%s7684_s16 + $0x28] sm:$0xff] }
 0x12d   : > { %v8613_v22 = vpop.permute.xlu1 %6689  ;;  %v8654_v36 = vpack.i.bf16 %v8630_v4, %v8143_v24  ;;  %v8672_v59 = vpack.i.bf16 %v8173_v16, %v8630_v4 }
 0x12e   : > { %v8615_v3 = vpop.permute.xlu0 %6684  ;;  %v6691_v55 = vunpack.i.l.bf16 %v8613_v22 }
 0x12f   : > { %6979 = vrot.lane.b32.xlu1 %v8136_v1, %s7629_s29  ;;  %v2656_v1 = vld [vmem:[%s7684_s16 + $0x20] sm:$0xff] }
 0x130   : > { %6974 = vrot.lane.b32.xlu0 %v8140_v10, %s7629_s29  ;;  %v8639_v10 = vld [vmem:[%s7684_s16 + $0x38] sm:$0xff]  ;;  %v7013_v35 = vpack.i.bf16 %v2656_v1, %v8146_v17  ;;  %v1375_v1 = vsel %vm1374_vm7, %v6661_v54, %v6662_v31 }
 0x131   : > { %v8621_v44 = vpop.permute.xlu1 %6699  ;;  %v8659_v32 = vpack.i.bf16 %v8639_v10, %v8636_v56 }
 0x132   : > { %v8623_v5 = vpop.permute.xlu0 %6694 }
 0x133   : > { %6989 = vrot.lane.b32.xlu1 %v8156_v34, %s7630_s30  ;;  %v6667_v34 = vunpack.i.h.bf16 %v8590_v45  ;;  %v6682_v45 = vunpack.i.h.bf16 %v8605_v47  ;;  %v6687_v47 = vunpack.i.h.bf16 %v8615_v3 }
 0x134   : > { %6984 = vrot.lane.b32.xlu0 %v8160_v41, %s7629_s29  ;;  %v7003_v41 = vpack.i.bf16 %v7588_v12, %v8143_v24  ;;  %v6677_v12 = vunpack.i.h.bf16 %v8607_v2  ;;  %v1376_v2 = vsel %vm1374_vm7, %v6662_v31, %v6666_v9 }
 0x135   : > { %v8643_v13 = vpop.permute.xlu1 %6709  ;;  %v1378_v20 = vsel %vm1374_vm7, %v6667_v34, %v6671_v28  ;;  %v8680_v54 = vsel %vm1374_vm7, %v6681_v60, %v6682_v45  ;;  %v1377_v31 = vsel %vm1374_vm7, %v6666_v9, %v6667_v34  ;;  %v11499_v28 = vunpack.i.h.bf16 %v8580_v8 }
 0x136   : > { %v8647_v11 = vpop.permute.xlu0 %6704  ;;  %11497 = vst [vmem:[#allocation101_spill] sm:$0xff] %v8680_v54  ;;  %v8683_v16 = vsel %vm1374_vm7, %v6676_v26, %v6677_v12  ;;  %v8700_v51 = vsel %vm1374_vm7, %v6677_v12, %v6681_v60 }
 0x137   : > { %6999 = vrot.lane.b32.xlu1 %v6998_v43, %s7631_s3  ;;  %11498 = vst [vmem:[#allocation102_spill] sm:$0xff] %v8683_v16  ;;  %11502 = vst [vmem:[#allocation104_spill] sm:$0xff] %v8700_v51 }
 0x138   : > { %6994 = vrot.lane.b32.xlu0 %v7906_v30, %s7630_s30  ;;  %v6686_v30 = vunpack.i.l.bf16 %v8615_v3  ;;  %v8690_v3 = vsel %vm1374_vm7, %v11499_v28, %v6676_v26 }
 0x139   : > { %v6720_v17 = vpop.permute.xlu1 %6719 }
 0x13a   : > { %v6721_v57 = vunpack.i.l.bf16 %v6720_v17  ;;  %v6715_v14 = vpop.permute.xlu0 %6714  ;;  %v6722_v24 = vunpack.i.h.bf16 %v6720_v17  ;;  %v8703_v26 = vsel %vm1374_vm7, %v6686_v30, %v6687_v47 }
 0x13b   : > { %v6717_v48 = vunpack.i.h.bf16 %v6715_v14  ;;  %v6716_v27 = vunpack.i.l.bf16 %v6715_v14  ;;  %7009 = vrot.lane.b32.xlu1 %v6998_v43, %s7632_s4  ;;  %v11500_v14 = vunpack.i.h.bf16 %v8613_v22  ;;  %11503 = vst [vmem:[#allocation105_spill] sm:$0xff] %v8703_v26 }
 0x13c   : > { %7004 = vrot.lane.b32.xlu0 %v7003_v41, %s7631_s3 }
 0x13d   : > { %v8695_v17 = vsel %vm1374_vm7, %v6691_v55, %v11500_v14  ;;  %v6730_v43 = vpop.permute.xlu1 %6729  ;;  %v1528_v21 = vsel %vm1526_vm8, %v6717_v48, %v6721_v57  ;;  %v1527_v6 = vsel %vm1526_vm8, %v6716_v27, %v6717_v48  ;;  %v1529_v14 = vsel %vm1526_vm8, %v6721_v57, %v6722_v24 }
 0x13e   : > { %11501 = vst [vmem:[#allocation103_spill] sm:$0xff] %v8695_v17  ;;  %v6732_v41 = vunpack.i.h.bf16 %v6730_v43  ;;  %v6731_v34 = vunpack.i.l.bf16 %v6730_v43  ;;  %v6725_v9 = vpop.permute.xlu0 %6724  ;;  %v5676_v8 = vpack.c.bf16 %v1528_v21, %v1376_v2  ;;  %v5678_v7 = vpack.c.bf16 %v1527_v6, %v1375_v1 }
 0x13f   : > { %v6727_v28 = vunpack.i.h.bf16 %v6725_v9  ;;  %v6726_v19 = vunpack.i.l.bf16 %v6725_v9  ;;  %7019 = vrot.lane.b32.xlu1 %v8654_v36, %s7632_s4  ;;  %v8713_v21 = vsel %vm1374_vm7, %v6682_v45, %v6686_v30  ;;  %v8716_v6 = vsel %vm1374_vm7, %v6687_v47, %v6691_v55 }
 0x140   : > { %v8709_v27 = vsel %vm1526_vm8, %v6731_v34, %v6732_v41  ;;  %7014 = vrot.lane.b32.xlu0 %v7013_v35, %s7633_s5  ;;  %5677 = vmatprep.subr.bf16.mxu0 %v5676_v8  ;;  %11505 = vst [vmem:[#allocation107_spill] sm:$0xff] %v8713_v21  ;;  %11506 = vst [vmem:[#allocation108_spill] sm:$0xff] %v8716_v6  ;;  %v5730_v43 = vpack.c.bf16 %v1529_v14, %v1377_v31  ;;  %v6696_v9 = vunpack.i.l.bf16 %v8623_v5 }
 0x141   : > { %11504 = vst [vmem:[#allocation106_spill] sm:$0xff] %v8709_v27  ;;  %v8719_v60 = vsel %vm1526_vm8, %v6726_v19, %v6727_v28  ;;  %5679 = vmatpush1.bf16.msra.mxu0 %v5678_v7  ;;  %v6740_v48 = vpop.permute.xlu1 %6739  ;;  %v1530_v57 = vsel %vm1526_vm8, %v6722_v24, %v6726_v19  ;;  %v8723_v12 = vsel %vm1526_vm8, %v6727_v28, %v6731_v34  ;;  %v6702_v24 = vunpack.i.h.bf16 %v8621_v44 }
 0x142   : > { %11507 = vst [vmem:[#allocation109_spill] sm:$0xff] %v8719_v60  ;;  %v6742_v1 = vunpack.i.h.bf16 %v6740_v48  ;;  %v6741_v2 = vunpack.i.l.bf16 %v6740_v48  ;;  %v6735_v45 = vpop.permute.xlu0 %6734  ;;  %v5728_v30 = vpack.c.bf16 %v1530_v57, %v1378_v20  ;;  %v6697_v34 = vunpack.i.h.bf16 %v8623_v5 }
 0x143   : > { %v6737_v55 = vunpack.i.h.bf16 %v6735_v45  ;;  %v6736_v47 = vunpack.i.l.bf16 %v6735_v45  ;;  %7029 = vrot.lane.b32.xlu1 %v8659_v32, %s7634_s6  ;;  %v6701_v31 = vunpack.i.l.bf16 %v8621_v44  ;;  %v6707_v19 = vunpack.i.h.bf16 %v8647_v11 }
 0x144   : > { %v8737_v20 = vsel %vm1526_vm8, %v6741_v2, %v6742_v1  ;;  %7024 = vrot.lane.b32.xlu0 %v8654_v36, %s7633_s5  ;;  %5729 = vmatprep.subr.bf16.mxu1 %v5728_v30 }
 0x145   : > { %11508 = vst [vmem:[#allocation110_spill] sm:$0xff] %v8737_v20  ;;  %v8743_v8 = vsel %vm1526_vm8, %v6736_v47, %v6737_v55  ;;  %5731 = vmatpush1.bf16.msra.mxu1 %v5730_v43  ;;  %v6750_v28 = vpop.permute.xlu1 %6749  ;;  %v8746_v14 = vsel %vm1526_vm8, %v6732_v41, %v6736_v47  ;;  %v8749_v48 = vsel %vm1526_vm8, %v6737_v55, %v6741_v2  ;;  %v6706_v55 = vunpack.i.l.bf16 %v8647_v11 }
 0x146   : > { %11509 = vst [vmem:[#allocation111_spill] sm:$0xff] %v8743_v8  ;;  %11510 = vst [vmem:[#allocation112_spill] sm:$0xff] %v8746_v14  ;;  %v6752_v5 = vunpack.i.h.bf16 %v6750_v28  ;;  %v6751_v57 = vunpack.i.l.bf16 %v6750_v28  ;;  %v6745_v45 = vpop.permute.xlu0 %6744  ;;  %v8762_v43 = vsel %vm1374_vm7, %v6696_v9, %v6697_v34  ;;  %v11514_v28 = vunpack.i.h.bf16 %v8613_v22 }
 0x147   : > { %11511 = vst [vmem:[#allocation113_spill] sm:$0xff] %v8749_v48  ;;  %v6747_v30 = vunpack.i.h.bf16 %v6745_v45  ;;  %v6746_v35 = vunpack.i.l.bf16 %v6745_v45  ;;  %7039 = vrot.lane.b32.xlu1 %v8672_v59, %s7634_s6  ;;  %11512 = vst [vmem:[#allocation114_spill] sm:$0xff] %v8762_v43  ;;  %v8796_v11 = vsel %vm1374_vm7, %v6701_v31, %v6702_v24  ;;  %v6712_v43 = vunpack.i.h.bf16 %v8643_v13 }
 0x148   : > { %v8766_v47 = vsel %vm1526_vm8, %v6751_v57, %v6752_v5  ;;  %7034 = vrot.lane.b32.xlu0 %v8659_v32, %s7635_s7  ;;  %v8773_v45 = vsel %vm1374_vm7, %v11514_v28, %v6696_v9  ;;  %11519 = vst [vmem:[#allocation120_spill] sm:$0xff] %v8796_v11 }
 0x149   : > { %11513 = vst [vmem:[#allocation115_spill] sm:$0xff] %v8766_v47  ;;  %11515 = vst [vmem:[#allocation116_spill] sm:$0xff] %v8773_v45  ;;  %v8776_v41 = vsel %vm1526_vm8, %v6746_v35, %v6747_v30  ;;  %v6760_v2 = vpop.permute.xlu1 %6759  ;;  %v8779_v44 = vsel %vm1526_vm8, %v6742_v1, %v6746_v35  ;;  %v8782_v36 = vsel %vm1526_vm8, %v6747_v30, %v6751_v57  ;;  %v6711_v57 = vunpack.i.l.bf16 %v8643_v13 }
 0x14a   : > { %11516 = vst [vmem:[#allocation117_spill] sm:$0xff] %v8776_v41  ;;  %11517 = vst [vmem:[#allocation118_spill] sm:$0xff] %v8779_v44  ;;  %v6762_v26 = vunpack.i.h.bf16 %v6760_v2  ;;  %v6761_v22 = vunpack.i.l.bf16 %v6760_v2  ;;  %v6755_v20 = vpop.permute.xlu0 %6754  ;;  %v8816_v35 = vsel %vm1374_vm7, %v6702_v24, %v6706_v55 }
 0x14b   : > { %11518 = vst [vmem:[#allocation119_spill] sm:$0xff] %v8782_v36  ;;  %v6757_v28 = vunpack.i.h.bf16 %v6755_v20  ;;  %v6756_v54 = vunpack.i.l.bf16 %v6755_v20  ;;  %7049 = vrot.lane.b32.xlu1 %v8659_v32, %s7636_s8  ;;  %v8805_v20 = vsel %vm1374_vm7, %v6697_v34, %v6701_v31  ;;  %11524 = vst [vmem:[#allocation125_spill] sm:$0xff] %v8816_v35  ;;  %v8823_v34 = vsel %vm1374_vm7, %v6706_v55, %v6707_v19  ;;  %v8838_v55 = vld [vmem:[%s7684_s16 + $0x40] sm:$0xff] }
 0x14c   : > { %v8800_v30 = vsel %vm1526_vm8, %v6761_v22, %v6762_v26  ;;  %7044 = vrot.lane.b32.xlu0 %v8672_v59, %s7635_s7  ;;  %11521 = vst [vmem:[#allocation122_spill] sm:$0xff] %v8805_v20  ;;  %11526 = vst [vmem:[#allocation127_spill] sm:$0xff] %v8823_v34  ;;  %v8852_v24 = vsel %vm1374_vm7, %v6711_v57, %v6712_v43 }
 0x14d   : > { %11520 = vst [vmem:[#allocation121_spill] sm:$0xff] %v8800_v30  ;;  %v8808_v2 = vsel %vm1526_vm8, %v6756_v54, %v6757_v28  ;;  %v8810_v7 = vpop.permute.xlu1 %6769  ;;  %v8813_v1 = vsel %vm1526_vm8, %v6752_v5, %v6756_v54  ;;  %v8819_v9 = vsel %vm1526_vm8, %v6757_v28, %v6761_v22  ;;  %11530 = vst [vmem:[#allocation131_spill] sm:$0xff] %v8852_v24  ;;  %v8896_v30 = vld [vmem:[%s7684_s16 + $0x50] sm:$0xff] }
 0x14e   : > { %11522 = vst [vmem:[#allocation123_spill] sm:$0xff] %v8808_v2  ;;  %11523 = vst [vmem:[#allocation124_spill] sm:$0xff] %v8813_v1  ;;  %v6765_v31 = vpop.permute.xlu0 %6764  ;;  %v6771_v11 = vunpack.i.l.bf16 %v8810_v7 }
 0x14f   : > { %11525 = vst [vmem:[#allocation126_spill] sm:$0xff] %v8819_v9  ;;  %v6767_v54 = vunpack.i.h.bf16 %v6765_v31  ;;  %v6766_v5 = vunpack.i.l.bf16 %v6765_v31  ;;  %7059 = vrot.lane.b32.xlu1 %v8672_v59, %s7636_s8  ;;  %v8846_v31 = vsel %vm1374_vm7, %v6707_v19, %v6711_v57  ;;  %vm3502_vm7 = vcmask 826368  }
 0x150   : > { %7054 = vrot.lane.b32.xlu0 %v8659_v32, %s7637_s13  ;;  %11528 = vst [vmem:[#allocation129_spill] sm:$0xff] %v8846_v31  ;;  %v8901_v31 = vld [vmem:[%s11162_s1 + $0x8] sm:$0xff] }
 0x151   : > { %v8841_v22 = vsel %vm1526_vm8, %v6766_v5, %v6767_v54  ;;  %v8843_v28 = vpop.permute.xlu1 %6779  ;;  %v8849_v17 = vsel %vm1526_vm8, %v6762_v26, %v6766_v5  ;;  %v7078_v26 = vpack.i.bf16 %v8838_v55, %v8630_v4  ;;  %5647 = vmatprep.mubr.msk.f32.mxu0 %vm4743_vm10, %v8901_v31  ;;  %5648 = vmatprep.mubr.msk.f32.mxu1 %vm4743_vm10, %v8901_v31  ;;  %vm3654_vm8 = vcmask 818176  }
 0x152   : > { %11527 = vst [vmem:[#allocation128_spill] sm:$0xff] %v8841_v22  ;;  %11529 = vst [vmem:[#allocation130_spill] sm:$0xff] %v8849_v17  ;;  %v11266_v13 = vunpack.i.h.bf16 %v8843_v28  ;;  %v6781_v47 = vunpack.i.l.bf16 %v8843_v28  ;;  %v6775_v34 = vpop.permute.xlu0 %6774  ;;  %v8893_v22 = vld [vmem:[%s7684_s16 + $0x48] sm:$0xff]  ;;  %v6772_v17 = vunpack.i.h.bf16 %v8810_v7 }
 0x153   : > { %7069 = vrot.lane.b32.xlu1 %v8659_v32, %s7638_s14  ;;  %v6777_v2 = vunpack.i.h.bf16 %v6775_v34  ;;  %v6776_v35 = vunpack.i.l.bf16 %v6775_v34  ;;  %v8918_v34 = vpack.i.bf16 %v8893_v22, %v8838_v55  ;;  %v8922_v45 = vpack.i.bf16 %v8896_v30, %v8893_v22 }
 0x154   : > { %v8867_v43 = vsel %vm1678_vm9, %v6781_v47, %v11266_v13  ;;  %7064 = vrot.lane.b32.xlu0 %v8672_v59, %s7637_s13  ;;  %v1679_v21 = vsel %vm1678_vm9, %v6771_v11, %v6772_v17 }
 0x155   : > { %11531 = vst [vmem:[#allocation132_spill] sm:$0xff] %v8867_v43  ;;  %v8871_v57 = vpop.permute.xlu1 %6789  ;;  %v1682_v48 = vsel %vm1678_vm9, %v6777_v2, %v6781_v47  ;;  %v1681_v42 = vsel %vm1678_vm9, %v6776_v35, %v6777_v2 }
 0x156   : > { %v6785_v5 = vpop.permute.xlu0 %6784  ;;  %v6792_v20 = vunpack.i.h.bf16 %v8871_v57  ;;  %v6791_v1 = vunpack.i.l.bf16 %v8871_v57 }
 0x157   : > { %7079 = vrot.lane.b32.xlu1 %v7078_v26, %s7638_s14  ;;  %v6787_v7 = vunpack.i.h.bf16 %v6785_v5  ;;  %v6786_v41 = vunpack.i.l.bf16 %v6785_v5 }
 0x158   : > { %7074 = vrot.lane.b32.xlu0 %v8659_v32, %s7639_s15  ;;  %v8932_v16 = vsel %vm1678_vm9, %v6791_v1, %v6792_v20 }
 0x159   : > { %v8876_v19 = vpop.permute.xlu1 %6799  ;;  %11532 = vst [vmem:[#allocation133_spill] sm:$0xff] %v8932_v16  ;;  %v8948_v11 = vsel %vm1678_vm9, %v6787_v7, %v6791_v1 }
 0x15a   : > { %v8878_v54 = vpop.permute.xlu0 %6794  ;;  %v6801_v57 = vunpack.i.l.bf16 %v8876_v19  ;;  %11536 = vst [vmem:[#allocation136_spill] sm:$0xff] %v8948_v11 }
 0x15b   : > { %7089 = vrot.lane.b32.xlu1 %v8659_v32, %s7640_s17  ;;  %v6797_v6 = vunpack.i.h.bf16 %v8878_v54 }
 0x15c   : > { %7084 = vrot.lane.b32.xlu0 %v7078_v26, %s7639_s15 }
 0x15d   : > { %v8883_v59 = vpop.permute.xlu1 %6809  ;;  %v8966_v52 = vsel %vm1678_vm9, %v6797_v6, %v6801_v57 }
 0x15e   : > { %v8885_v13 = vpop.permute.xlu0 %6804  ;;  %11541 = vst [vmem:[#allocation140_spill] sm:$0xff] %v8966_v52 }
 0x15f   : > { %7099 = vrot.lane.b32.xlu1 %v7078_v26, %s7640_s17  ;;  %v6807_v61 = vunpack.i.h.bf16 %v8885_v13 }
 0x160   : > { %7094 = vrot.lane.b32.xlu0 %v8659_v32, %s7641_s18 }
 0x161   : > { %v8890_v24 = vpop.permute.xlu1 %6819 }
 0x162   : > { %v8905_v9 = vpop.permute.xlu0 %6814 }
 0x163   : > { %4068 = vrot.lane.b32.xlu1 %v8636_v56, %s7642_s21  ;;  %v6796_v56 = vunpack.i.l.bf16 %v8878_v54  ;;  %v8938_v54 = vsel %vm1678_vm9, %v6786_v41, %v6787_v7 }
 0x164   : > { %7104 = vrot.lane.b32.xlu0 %v7078_v26, %s7641_s18  ;;  %v1680_v26 = vsel %vm1678_vm9, %v6772_v17, %v6776_v35  ;;  %11533 = vst [vmem:[#allocation134_spill] sm:$0xff] %v8938_v54  ;;  %v11534_v17 = vunpack.i.h.bf16 %v8843_v28 }
 0x165   : > { %v6830_v44 = vpop.permute.xlu1 %6829  ;;  %v8956_v35 = vsel %vm1678_vm9, %v6796_v56, %v6797_v6 }
 0x166   : > { %v6831_v5 = vunpack.i.l.bf16 %v6830_v44  ;;  %v6825_v8 = vpop.permute.xlu0 %6824  ;;  %v6832_v51 = vunpack.i.h.bf16 %v6830_v44  ;;  %v8945_v47 = vsel %vm1678_vm9, %v11534_v17, %v6786_v41  ;;  %11539 = vst [vmem:[#allocation138_spill] sm:$0xff] %v8956_v35  ;;  %v9065_v35 = vld [vmem:[%s7684_s16 + $0x58] sm:$0xff] }
 0x167   : > { %v6827_v27 = vunpack.i.h.bf16 %v6825_v8  ;;  %v6826_v36 = vunpack.i.l.bf16 %v6825_v8  ;;  %4066 = vrot.lane.b32.xlu1 %v8630_v4, %s7642_s21  ;;  %11535 = vst [vmem:[#allocation135_spill] sm:$0xff] %v8945_v47  ;;  %v11537_v8 = vunpack.i.h.bf16 %v8876_v19 }
 0x168   : > { %4070 = vrot.lane.b32.xlu0 %v8639_v10, %s7642_s21 }
 0x169   : > { %v8953_v4 = vsel %vm1678_vm9, %v6801_v57, %v11537_v8  ;;  %v6840_v44 = vpop.permute.xlu1 %6839  ;;  %v1832_v2 = vsel %vm1830_vm11, %v6827_v27, %v6831_v5  ;;  %v1831_v10 = vsel %vm1830_vm11, %v6826_v36, %v6827_v27  ;;  %v8963_v8 = vsel %vm1678_vm9, %v6792_v20, %v6796_v56 }
 0x16a   : > { %11538 = vst [vmem:[#allocation137_spill] sm:$0xff] %v8953_v4  ;;  %v6842_v28 = vunpack.i.h.bf16 %v6840_v44  ;;  %v6841_v14 = vunpack.i.l.bf16 %v6840_v44  ;;  %v6835_v41 = vpop.permute.xlu0 %6834  ;;  %v5680_v17 = vpack.c.bf16 %v1832_v2, %v1680_v26  ;;  %v5682_v46 = vpack.c.bf16 %v1831_v10, %v1679_v21  ;;  %11540 = vst [vmem:[#allocation139_spill] sm:$0xff] %v8963_v8 }
 0x16b   : > { %v6837_v1 = vunpack.i.h.bf16 %v6835_v41  ;;  %v6836_v7 = vunpack.i.l.bf16 %v6835_v41  ;;  %7114 = vrot.lane.b32.xlu1 %v8659_v32, %s7631_s3  ;;  %v6806_v27 = vunpack.i.l.bf16 %v8885_v13  ;;  %v1833_v21 = vsel %vm1830_vm11, %v6831_v5, %v6832_v51 }
 0x16c   : > { %v8971_v36 = vsel %vm1830_vm11, %v6841_v14, %v6842_v28  ;;  %7109 = vrot.lane.b32.xlu0 %v8659_v32, %s7630_s30  ;;  %5681 = vmatprep.subr.bf16.mxu0 %v5680_v17 }
 0x16d   : > { %11542 = vst [vmem:[#allocation141_spill] sm:$0xff] %v8971_v36  ;;  %v8977_v26 = vsel %vm1830_vm11, %v6836_v7, %v6837_v1  ;;  %5683 = vmatpush1.bf16.msra.mxu0 %v5682_v46  ;;  %v6850_v20 = vpop.permute.xlu1 %6849  ;;  %v1834_v6 = vsel %vm1830_vm11, %v6832_v51, %v6836_v7  ;;  %v8981_v57 = vsel %vm1830_vm11, %v6837_v1, %v6841_v14  ;;  %v6812_v14 = vunpack.i.h.bf16 %v8883_v59 }
 0x16e   : > { %11543 = vst [vmem:[#allocation142_spill] sm:$0xff] %v8977_v26  ;;  %11544 = vst [vmem:[#allocation143_spill] sm:$0xff] %v8981_v57  ;;  %v6852_v56 = vunpack.i.h.bf16 %v6850_v20  ;;  %v6851_v44 = vunpack.i.l.bf16 %v6850_v20  ;;  %v6845_v2 = vpop.permute.xlu0 %6844  ;;  %v5732_v10 = vpack.c.bf16 %v1834_v6, %v1682_v48  ;;  %v5734_v46 = vpack.c.bf16 %v1833_v21, %v1681_v42 }
 0x16f   : > { %v6847_v41 = vunpack.i.h.bf16 %v6845_v2  ;;  %v6846_v17 = vunpack.i.l.bf16 %v6845_v2  ;;  %7124 = vrot.lane.b32.xlu1 %v8918_v34, %s7631_s3  ;;  %v6811_v1 = vunpack.i.l.bf16 %v8883_v59  ;;  %v8994_v7 = vsel %vm1678_vm9, %v6806_v27, %v6807_v61 }
 0x170   : > { %11545 = vst [vmem:[#allocation144_spill] sm:$0xff] %v8994_v7  ;;  %v8997_v48 = vsel %vm1830_vm11, %v6851_v44, %v6852_v56  ;;  %7119 = vrot.lane.b32.xlu0 %v8918_v34, %s7630_s30  ;;  %5733 = vmatprep.subr.bf16.mxu1 %v5732_v10 }
 0x171   : > { %11546 = vst [vmem:[#allocation145_spill] sm:$0xff] %v8997_v48  ;;  %v9002_v20 = vsel %vm1830_vm11, %v6846_v17, %v6847_v41  ;;  %5735 = vmatpush1.bf16.msra.mxu1 %v5734_v46  ;;  %v6860_v42 = vpop.permute.xlu1 %6859  ;;  %v9005_v21 = vsel %vm1830_vm11, %v6842_v28, %v6846_v17  ;;  %v9008_v59 = vsel %vm1830_vm11, %v6847_v41, %v6851_v44  ;;  %v11550_v44 = vunpack.i.h.bf16 %v8876_v19 }
 0x172   : > { %11547 = vst [vmem:[#allocation146_spill] sm:$0xff] %v9002_v20  ;;  %11548 = vst [vmem:[#allocation147_spill] sm:$0xff] %v9005_v21  ;;  %v6862_v2 = vunpack.i.h.bf16 %v6860_v42  ;;  %v6861_v13 = vunpack.i.l.bf16 %v6860_v42  ;;  %v6855_v51 = vpop.permute.xlu0 %6854  ;;  %v6817_v17 = vunpack.i.h.bf16 %v8905_v9  ;;  %v6816_v42 = vunpack.i.l.bf16 %v8905_v9 }
 0x173   : > { %11549 = vst [vmem:[#allocation148_spill] sm:$0xff] %v9008_v59  ;;  %v6857_v46 = vunpack.i.h.bf16 %v6855_v51  ;;  %v6856_v54 = vunpack.i.l.bf16 %v6855_v51  ;;  %7134 = vrot.lane.b32.xlu1 %v8659_v32, %s7633_s5  ;;  %v9023_v41 = vsel %vm1678_vm9, %v11550_v44, %v6806_v27  ;;  %v9033_v51 = vsel %vm1678_vm9, %v6807_v61, %v6811_v1 }
 0x174   : > { %11551 = vst [vmem:[#allocation149_spill] sm:$0xff] %v9023_v41  ;;  %v9028_v6 = vsel %vm1830_vm11, %v6861_v13, %v6862_v2  ;;  %7129 = vrot.lane.b32.xlu0 %v8659_v32, %s7632_s4  ;;  %11553 = vst [vmem:[#allocation151_spill] sm:$0xff] %v9033_v51  ;;  %v9071_v61 = vsel %vm1678_vm9, %v6812_v14, %v6816_v42  ;;  %v9087_v4 = vsel %vm1678_vm9, %v6811_v1, %v6812_v14 }
 0x175   : > { %11552 = vst [vmem:[#allocation150_spill] sm:$0xff] %v9028_v6  ;;  %v9036_v28 = vsel %vm1830_vm11, %v6856_v54, %v6857_v46  ;;  %v6870_v19 = vpop.permute.xlu1 %6869  ;;  %v9039_v27 = vsel %vm1830_vm11, %v6852_v56, %v6856_v54  ;;  %v9042_v44 = vsel %vm1830_vm11, %v6857_v46, %v6861_v13  ;;  %v6822_v54 = vunpack.i.h.bf16 %v8890_v24  ;;  %11559 = vst [vmem:[#allocation157_spill] sm:$0xff] %v9071_v61 }
 0x176   : > { %11554 = vst [vmem:[#allocation152_spill] sm:$0xff] %v9036_v28  ;;  %11555 = vst [vmem:[#allocation153_spill] sm:$0xff] %v9039_v27  ;;  %v6872_v5 = vunpack.i.h.bf16 %v6870_v19  ;;  %v6871_v32 = vunpack.i.l.bf16 %v6870_v19  ;;  %v6865_v10 = vpop.permute.xlu0 %6864  ;;  %v6821_v46 = vunpack.i.l.bf16 %v8890_v24  ;;  %v9057_v19 = vsel %vm1678_vm9, %v6816_v42, %v6817_v17 }
 0x177   : > { %11556 = vst [vmem:[#allocation154_spill] sm:$0xff] %v9042_v44  ;;  %v6867_v56 = vunpack.i.h.bf16 %v6865_v10  ;;  %v6866_v48 = vunpack.i.l.bf16 %v6865_v10  ;;  %7144 = vrot.lane.b32.xlu1 %v8918_v34, %s7633_s5  ;;  %11557 = vst [vmem:[#allocation155_spill] sm:$0xff] %v9057_v19  ;;  %v9068_v10 = vld [vmem:[%s7684_s16 + $0x60] sm:$0xff] }
 0x178   : > { %v9060_v9 = vsel %vm1830_vm11, %v6871_v32, %v6872_v5  ;;  %7139 = vrot.lane.b32.xlu0 %v8918_v34, %s7632_s4  ;;  %11563 = vst [vmem:[#allocation161_spill] sm:$0xff] %v9087_v4  ;;  %v9104_v1 = vsel %vm1678_vm9, %v6821_v46, %v6822_v54 }
 0x179   : > { %11558 = vst [vmem:[#allocation156_spill] sm:$0xff] %v9060_v9  ;;  %v9074_v13 = vsel %vm1830_vm11, %v6866_v48, %v6867_v56  ;;  %v9076_v24 = vpop.permute.xlu1 %6879  ;;  %v9079_v7 = vsel %vm1830_vm11, %v6862_v2, %v6866_v48  ;;  %v9082_v6 = vsel %vm1830_vm11, %v6867_v56, %v6871_v32  ;;  %v9097_v48 = vpack.i.bf16 %v9068_v10, %v9065_v35 }
 0x17a   : > { %11560 = vst [vmem:[#allocation158_spill] sm:$0xff] %v9074_v13  ;;  %11561 = vst [vmem:[#allocation159_spill] sm:$0xff] %v9079_v7  ;;  %v6875_v28 = vpop.permute.xlu0 %6874  ;;  %v9110_v32 = vsel %vm1678_vm9, %v6817_v17, %v6821_v46  ;;  %v6881_v19 = vunpack.i.l.bf16 %v9076_v24  ;;  %vm3806_vm9 = vcmask 687104  }
 0x17b   : > { %11562 = vst [vmem:[#allocation160_spill] sm:$0xff] %v9082_v6  ;;  %v6877_v44 = vunpack.i.h.bf16 %v6875_v28  ;;  %v6876_v52 = vunpack.i.l.bf16 %v6875_v28  ;;  %7154 = vrot.lane.b32.xlu1 %v8922_v45, %s7635_s7  ;;  %11564 = vst [vmem:[#allocation162_spill] sm:$0xff] %v9104_v1  ;;  %v9149_v1 = vld [vmem:[%s7684_s16 + $0x68] sm:$0xff] }
 0x17c   : > { %7149 = vrot.lane.b32.xlu0 %v8922_v45, %s7634_s6  ;;  %11566 = vst [vmem:[#allocation164_spill] sm:$0xff] %v9110_v32 }
 0x17d   : > { %v9107_v2 = vsel %vm1830_vm11, %v6876_v52, %v6877_v44  ;;  %v6890_v28 = vpop.permute.xlu1 %6889  ;;  %v9113_v56 = vsel %vm1830_vm11, %v6872_v5, %v6876_v52  ;;  %vm3958_vm11 = vcmask 678912  }
 0x17e   : > { %11565 = vst [vmem:[#allocation163_spill] sm:$0xff] %v9107_v2  ;;  %11567 = vst [vmem:[#allocation165_spill] sm:$0xff] %v9113_v56  ;;  %v6892_v34 = vunpack.i.h.bf16 %v6890_v28  ;;  %v6891_v41 = vunpack.i.l.bf16 %v6890_v28  ;;  %v6885_v42 = vpop.permute.xlu0 %6884  ;;  %v6882_v2 = vunpack.i.h.bf16 %v9076_v24  ;;  %v9163_v24 = vpack.i.bf16 %v9065_v35, %v8896_v30 }
 0x17f   : > { %7164 = vrot.lane.b32.xlu1 %v9097_v48, %s7635_s7  ;;  %v6887_v9 = vunpack.i.h.bf16 %v6885_v42  ;;  %v6886_v32 = vunpack.i.l.bf16 %v6885_v42  ;;  %v9167_v42 = vpack.i.bf16 %v9149_v1, %v9068_v10 }
 0x180   : > { %v9122_v17 = vsel %vm1982_vm12, %v6891_v41, %v6892_v34  ;;  %7159 = vrot.lane.b32.xlu0 %v9097_v48, %s7634_s6  ;;  %v1983_v59 = vsel %vm1982_vm12, %v6881_v19, %v6882_v2 }
 0x181   : > { %v9126_v52 = vpop.permute.xlu1 %6899  ;;  %v1984_v8 = vsel %vm1982_vm12, %v6882_v2, %v6886_v32  ;;  %v1986_v36 = vsel %vm1982_vm12, %v6887_v9, %v6891_v41  ;;  %v1985_v51 = vsel %vm1982_vm12, %v6886_v32, %v6887_v9 }
 0x182   : > { %v6895_v5 = vpop.permute.xlu0 %6894  ;;  %v6902_v4 = vunpack.i.h.bf16 %v9126_v52  ;;  %v6901_v13 = vunpack.i.l.bf16 %v9126_v52 }
 0x183   : > { %7174 = vrot.lane.b32.xlu1 %v8922_v45, %s7637_s13  ;;  %v6897_v61 = vunpack.i.h.bf16 %v6895_v5  ;;  %v6896_v6 = vunpack.i.l.bf16 %v6895_v5 }
 0x184   : > { %7169 = vrot.lane.b32.xlu0 %v8922_v45, %s7636_s8  ;;  %v9175_v11 = vsel %vm1982_vm12, %v6901_v13, %v6902_v4 }
 0x185   : > { %v9132_v44 = vpop.permute.xlu1 %6909  ;;  %11568 = vst [vmem:[#allocation166_spill] sm:$0xff] %v9175_v11  ;;  %v9186_v19 = vsel %vm1982_vm12, %v6892_v34, %v6896_v6  ;;  %v9189_v41 = vsel %vm1982_vm12, %v6897_v61, %v6901_v13 }
 0x186   : > { %v6905_v46 = vpop.permute.xlu0 %6904  ;;  %v6911_v52 = vunpack.i.l.bf16 %v9132_v44  ;;  %11570 = vst [vmem:[#allocation168_spill] sm:$0xff] %v9189_v41  ;;  %v11571_v2 = vunpack.i.h.bf16 %v9132_v44 }
 0x187   : > { %7184 = vrot.lane.b32.xlu1 %v9097_v48, %s7637_s13  ;;  %v6907_v7 = vunpack.i.h.bf16 %v6905_v46  ;;  %v6906_v27 = vunpack.i.l.bf16 %v6905_v46  ;;  %v9181_v46 = vsel %vm1982_vm12, %v6896_v6, %v6897_v61 }
 0x188   : > { %7179 = vrot.lane.b32.xlu0 %v9097_v48, %s7636_s8  ;;  %11569 = vst [vmem:[#allocation167_spill] sm:$0xff] %v9181_v46 }
 0x189   : > { %v9138_v28 = vpop.permute.xlu1 %6919  ;;  %v9197_v9 = vsel %vm1982_vm12, %v6906_v27, %v6907_v7  ;;  %v9207_v50 = vsel %vm1982_vm12, %v6907_v7, %v6911_v52 }
 0x18a   : > { %v9140_v54 = vpop.permute.xlu0 %6914  ;;  %11573 = vst [vmem:[#allocation170_spill] sm:$0xff] %v9197_v9  ;;  %11575 = vst [vmem:[#allocation172_spill] sm:$0xff] %v9207_v50 }
 0x18b   : > { %7194 = vrot.lane.b32.xlu1 %v8922_v45, %s7639_s15  ;;  %v6917_v60 = vunpack.i.h.bf16 %v9140_v54 }
 0x18c   : > { %7189 = vrot.lane.b32.xlu0 %v8922_v45, %s7638_s14 }
 0x18d   : > { %v9146_v14 = vpop.permute.xlu1 %6929 }
 0x18e   : > { %v9153_v56 = vpop.permute.xlu0 %6924 }
 0x18f   : > { %7204 = vrot.lane.b32.xlu1 %v9097_v48, %s7639_s15 }
 0x190   : > { %7199 = vrot.lane.b32.xlu0 %v9097_v48, %s7638_s14 }
 0x191   : > { %v6940_v16 = vpop.permute.xlu1 %6939 }
 0x192   : > { %v6941_v20 = vunpack.i.l.bf16 %v6940_v16  ;;  %v6935_v5 = vpop.permute.xlu0 %6934  ;;  %v6942_v43 = vunpack.i.h.bf16 %v6940_v16 }
 0x193   : > { %v6937_v21 = vunpack.i.h.bf16 %v6935_v5  ;;  %v6936_v49 = vunpack.i.l.bf16 %v6935_v5  ;;  %7214 = vrot.lane.b32.xlu1 %v8922_v45, %s7641_s18  ;;  %v9194_v5 = vsel %vm1982_vm12, %v6911_v52, %v11571_v2  ;;  %v9204_v2 = vsel %vm1982_vm12, %v6902_v4, %v6906_v27 }
 0x194   : > { %7209 = vrot.lane.b32.xlu0 %v8922_v45, %s7640_s17  ;;  %11572 = vst [vmem:[#allocation169_spill] sm:$0xff] %v9194_v5  ;;  %11574 = vst [vmem:[#allocation171_spill] sm:$0xff] %v9204_v2 }
 0x195   : > { %v6950_v32 = vpop.permute.xlu1 %6949  ;;  %v2136_v16 = vsel %vm2134_vm13, %v6937_v21, %v6941_v20  ;;  %v2135_v26 = vsel %vm2134_vm13, %v6936_v49, %v6937_v21  ;;  %v6916_v49 = vunpack.i.l.bf16 %v9140_v54 }
 0x196   : > { %v6952_v45 = vunpack.i.h.bf16 %v6950_v32  ;;  %v6951_v47 = vunpack.i.l.bf16 %v6950_v32  ;;  %v6945_v6 = vpop.permute.xlu0 %6944  ;;  %v5684_v34 = vpack.c.bf16 %v2136_v16, %v1984_v8  ;;  %v5686_v57 = vpack.c.bf16 %v2135_v26, %v1983_v59 }
 0x197   : > { %v6947_v61 = vunpack.i.h.bf16 %v6945_v6  ;;  %v6946_v13 = vunpack.i.l.bf16 %v6945_v6  ;;  %7224 = vrot.lane.b32.xlu1 %v9097_v48, %s7641_s18  ;;  %v2137_v8 = vsel %vm2134_vm13, %v6941_v20, %v6942_v43 }
 0x198   : > { %v9212_v21 = vsel %vm2134_vm13, %v6951_v47, %v6952_v45  ;;  %7219 = vrot.lane.b32.xlu0 %v9097_v48, %s7640_s17  ;;  %5685 = vmatprep.subr.bf16.mxu0 %v5684_v34  ;;  %v6921_v34 = vunpack.i.l.bf16 %v9138_v28 }
 0x199   : > { %11576 = vst [vmem:[#allocation173_spill] sm:$0xff] %v9212_v21  ;;  %v9218_v26 = vsel %vm2134_vm13, %v6946_v13, %v6947_v61  ;;  %5687 = vmatpush1.bf16.msra.mxu0 %v5686_v57  ;;  %v6960_v4 = vpop.permute.xlu1 %6959  ;;  %v2138_v7 = vsel %vm2134_vm13, %v6942_v43, %v6946_v13  ;;  %v9222_v59 = vsel %vm2134_vm13, %v6947_v61, %v6951_v47  ;;  %v6922_v47 = vunpack.i.h.bf16 %v9138_v28 }
 0x19a   : > { %v6962_v54 = vunpack.i.h.bf16 %v6960_v4  ;;  %v6961_v52 = vunpack.i.l.bf16 %v6960_v4  ;;  %v6955_v32 = vpop.permute.xlu0 %6954  ;;  %v5736_v48 = vpack.c.bf16 %v2138_v7, %v1986_v36  ;;  %v5738_v57 = vpack.c.bf16 %v2137_v8, %v1985_v51 }
 0x19b   : > { %v6957_v16 = vunpack.i.h.bf16 %v6955_v32  ;;  %v6956_v6 = vunpack.i.l.bf16 %v6955_v32  ;;  %4074 = vrot.lane.b32.xlu1 %v8893_v22, %s7642_s21  ;;  %v9235_v61 = vsel %vm1982_vm12, %v6916_v49, %v6917_v60  ;;  %v6932_v43 = vunpack.i.h.bf16 %v9146_v14 }
 0x19c   : > { %11577 = vst [vmem:[#allocation174_spill] sm:$0xff] %v9235_v61  ;;  %v9238_v36 = vsel %vm2134_vm13, %v6961_v52, %v6962_v54  ;;  %4072 = vrot.lane.b32.xlu0 %v8838_v55, %s7642_s21  ;;  %5737 = vmatprep.subr.bf16.mxu1 %v5736_v48  ;;  %v9320_v61 = vsel %vm1982_vm12, %v6921_v34, %v6922_v47 }
 0x19d   : > { %11578 = vst [vmem:[#allocation175_spill] sm:$0xff] %v9238_v36  ;;  %v9243_v22 = vsel %vm2134_vm13, %v6956_v6, %v6957_v16  ;;  %5739 = vmatpush1.bf16.msra.mxu1 %v5738_v57  ;;  %v6970_v51 = vpop.permute.xlu1 %6969  ;;  %v9246_v13 = vsel %vm2134_vm13, %v6952_v45, %v6956_v6  ;;  %v9249_v28 = vsel %vm2134_vm13, %v6957_v16, %v6961_v52  ;;  %v11582_v52 = vunpack.i.h.bf16 %v9132_v44 }
 0x19e   : > { %11579 = vst [vmem:[#allocation176_spill] sm:$0xff] %v9243_v22  ;;  %11580 = vst [vmem:[#allocation177_spill] sm:$0xff] %v9246_v13  ;;  %v6972_v4 = vunpack.i.h.bf16 %v6970_v51  ;;  %v6971_v7 = vunpack.i.l.bf16 %v6970_v51  ;;  %v6965_v32 = vpop.permute.xlu0 %6964  ;;  %v6927_v6 = vunpack.i.h.bf16 %v9153_v56  ;;  %v6926_v51 = vunpack.i.l.bf16 %v9153_v56 }
 0x19f   : > { %11581 = vst [vmem:[#allocation178_spill] sm:$0xff] %v9249_v28  ;;  %v6967_v57 = vunpack.i.h.bf16 %v6965_v32  ;;  %v6966_v27 = vunpack.i.l.bf16 %v6965_v32  ;;  %4078 = vrot.lane.b32.xlu1 %v9065_v35, %s7642_s21  ;;  %v9264_v16 = vsel %vm1982_vm12, %v11582_v52, %v6916_v49  ;;  %v9274_v35 = vsel %vm1982_vm12, %v6917_v60, %v6921_v34  ;;  %11595 = vst [vmem:[#allocation191_spill] sm:$0xff] %v9320_v61 }
 0x1a0   : > { %11583 = vst [vmem:[#allocation179_spill] sm:$0xff] %v9264_v16  ;;  %v9269_v8 = vsel %vm2134_vm13, %v6971_v7, %v6972_v4  ;;  %4076 = vrot.lane.b32.xlu0 %v8896_v30, %s7642_s21  ;;  %11585 = vst [vmem:[#allocation181_spill] sm:$0xff] %v9274_v35  ;;  %v9306_v56 = vsel %vm1982_vm12, %v6922_v47, %v6926_v51 }
 0x1a1   : > { %11584 = vst [vmem:[#allocation180_spill] sm:$0xff] %v9269_v8  ;;  %v9277_v32 = vsel %vm2134_vm13, %v6966_v27, %v6967_v57  ;;  %v6980_v44 = vpop.permute.xlu1 %6979  ;;  %v9280_v49 = vsel %vm2134_vm13, %v6962_v54, %v6966_v27  ;;  %v9283_v52 = vsel %vm2134_vm13, %v6967_v57, %v6971_v7  ;;  %v6931_v7 = vunpack.i.l.bf16 %v9146_v14  ;;  %11591 = vst [vmem:[#allocation187_spill] sm:$0xff] %v9306_v56 }
 0x1a2   : > { %11586 = vst [vmem:[#allocation182_spill] sm:$0xff] %v9277_v32  ;;  %11587 = vst [vmem:[#allocation183_spill] sm:$0xff] %v9280_v49  ;;  %v6982_v45 = vunpack.i.h.bf16 %v6980_v44  ;;  %v6981_v48 = vunpack.i.l.bf16 %v6980_v44  ;;  %v6975_v55 = vpop.permute.xlu0 %6974  ;;  %v9298_v57 = vsel %vm1982_vm12, %v6926_v51, %v6927_v6 }
 0x1a3   : > { %11588 = vst [vmem:[#allocation184_spill] sm:$0xff] %v9283_v52  ;;  %v6977_v20 = vunpack.i.h.bf16 %v6975_v55  ;;  %v6976_v27 = vunpack.i.l.bf16 %v6975_v55  ;;  %7234 = vrot.lane.b32.xlu1 %v9163_v24, %s7631_s3  ;;  %11589 = vst [vmem:[#allocation185_spill] sm:$0xff] %v9298_v57  ;;  %v9333_v47 = vsel %vm1982_vm12, %v6931_v7, %v6932_v43 }
 0x1a4   : > { %v9301_v44 = vsel %vm2134_vm13, %v6981_v48, %v6982_v45  ;;  %7229 = vrot.lane.b32.xlu0 %v9163_v24, %s7630_s30  ;;  %11596 = vst [vmem:[#allocation192_spill] sm:$0xff] %v9333_v47 }
 0x1a5   : > { %11590 = vst [vmem:[#allocation186_spill] sm:$0xff] %v9301_v44  ;;  %v9309_v55 = vsel %vm2134_vm13, %v6976_v27, %v6977_v20  ;;  %v6990_v30 = vpop.permute.xlu1 %6989  ;;  %v9312_v54 = vsel %vm2134_vm13, %v6972_v4, %v6976_v27  ;;  %v9315_v14 = vsel %vm2134_vm13, %v6977_v20, %v6981_v48 }
 0x1a6   : > { %11592 = vst [vmem:[#allocation188_spill] sm:$0xff] %v9309_v55  ;;  %11593 = vst [vmem:[#allocation189_spill] sm:$0xff] %v9312_v54  ;;  %v6985_v8 = vpop.permute.xlu0 %6984  ;;  %v6992_v5 = vunpack.i.h.bf16 %v6990_v30 }
 0x1a7   : > { %11594 = vst [vmem:[#allocation190_spill] sm:$0xff] %v9315_v14  ;;  %v6987_v32 = vunpack.i.h.bf16 %v6985_v8  ;;  %v6986_v16 = vunpack.i.l.bf16 %v6985_v8  ;;  %7244 = vrot.lane.b32.xlu1 %v9167_v42, %s7631_s3  ;;  %v9341_v8 = vsel %vm1982_vm12, %v6927_v6, %v6931_v7  ;;  %v6991_v6 = vunpack.i.l.bf16 %v6990_v30  ;;  %v9382_v30 = vld [vmem:[%s7684_s16 + $0x78] sm:$0xff] }
 0x1a8   : > { %7239 = vrot.lane.b32.xlu0 %v9167_v42, %s7630_s30  ;;  %11598 = vst [vmem:[#allocation194_spill] sm:$0xff] %v9341_v8  ;;  %vm4110_vm12 = vcmask 670720  }
 0x1a9   : > { %v9336_v34 = vsel %vm2134_vm13, %v6986_v16, %v6987_v32  ;;  %v9338_v4 = vpop.permute.xlu1 %6999  ;;  %v9344_v48 = vsel %vm2134_vm13, %v6982_v45, %v6986_v16  ;;  %v9363_v16 = vld [vmem:[%s7684_s16 + $0x70] sm:$0xff]  ;;  %v2287_v57 = vsel %vm2286_vm15, %v6991_v6, %v6992_v5 }
 0x1aa   : > { %11597 = vst [vmem:[#allocation193_spill] sm:$0xff] %v9336_v34  ;;  %11599 = vst [vmem:[#allocation195_spill] sm:$0xff] %v9344_v48  ;;  %v11338_v27 = vunpack.i.h.bf16 %v9338_v4  ;;  %v7001_v60 = vunpack.i.l.bf16 %v9338_v4  ;;  %v9348_v20 = vpop.permute.xlu0 %6994 }
 0x1ab   : > { %v11339_v51 = vunpack.i.l.bf16 %v9348_v20  ;;  %7254 = vrot.lane.b32.xlu1 %v9163_v24, %s7633_s5 }
 0x1ac   : > { %7249 = vrot.lane.b32.xlu0 %v9163_v24, %s7632_s4  ;;  %v2440_v45 = vsel %vm2438_vm14, %v7001_v60, %v11338_v27  ;;  %v9377_v24 = vpack.i.bf16 %v9363_v16, %v9149_v1  ;;  %v9385_v27 = vld [vmem:[%s7684_s16 + $0x80] sm:$0xff] }
 0x1ad   : > { %v9365_v7 = vpop.permute.xlu1 %7009  ;;  %v2288_v32 = vsel %vm2286_vm15, %v6992_v5, %v11339_v51  ;;  %11600 = vst [vmem:[#allocation196_spill] sm:$0xff] %v9385_v27  ;;  %v9401_v51 = vpack.i.bf16 %v9385_v27, %v9382_v30 }
 0x1ae   : > { %v9370_v43 = vpop.permute.xlu0 %7004  ;;  %v5688_v47 = vpack.c.bf16 %v2440_v45, %v2288_v32  ;;  %v7011_v32 = vunpack.i.l.bf16 %v9365_v7 }
 0x1af   : > { %v7006_v34 = vunpack.i.l.bf16 %v9370_v43  ;;  %7264 = vrot.lane.b32.xlu1 %v9167_v42, %s7633_s5 }
 0x1b0   : > { %7259 = vrot.lane.b32.xlu0 %v9167_v42, %s7632_s4  ;;  %5689 = vmatprep.subr.bf16.mxu0 %v5688_v47 }
 0x1b1   : > { %v9389_v45 = vpop.permute.xlu1 %7019  ;;  %v2439_v44 = vsel %vm2438_vm14, %v7006_v34, %v7001_v60 }
 0x1b2   : > { %v9393_v8 = vpop.permute.xlu0 %7014  ;;  %v5690_v48 = vpack.c.bf16 %v2439_v44, %v2287_v57  ;;  %v7021_v5 = vunpack.i.l.bf16 %v9389_v45  ;;  %v11601_v57 = vunpack.i.h.bf16 %v9365_v7 }
 0x1b3   : > { %v11347_v42 = vunpack.i.h.bf16 %v9393_v8  ;;  %v7016_v47 = vunpack.i.l.bf16 %v9393_v8  ;;  %7274 = vrot.lane.b32.xlu1 %v9377_v24, %s7635_s7 }
 0x1b4   : > { %7269 = vrot.lane.b32.xlu0 %v9377_v24, %s7634_s6  ;;  %5691 = vmatpush1.bf16.msra.mxu0 %v5690_v48  ;;  %v2592_v44 = vsel %vm2590_vm1, %v7011_v32, %v11601_v57 }
 0x1b5   : > { %v9406_v60 = vpop.permute.xlu1 %7029  ;;  %v2744_v34 = vsel %vm2742_vm2, %v7016_v47, %v11347_v42  ;;  %v2591_v42 = vsel %vm2590_vm1, %v7021_v5, %v7011_v32 }
 0x1b6   : > { %v9414_v6 = vpop.permute.xlu0 %7024  ;;  %v5692_v61 = vpack.c.bf16 %v2744_v34, %v2592_v44  ;;  %v11351_v48 = vunpack.i.h.bf16 %v9406_v60  ;;  %v7031_v57 = vunpack.i.l.bf16 %v9406_v60 }
 0x1b7   : > { %v7026_v55 = vunpack.i.l.bf16 %v9414_v6  ;;  %7284 = vrot.lane.b32.xlu1 %v9401_v51, %s7635_s7 }
 0x1b8   : > { %7279 = vrot.lane.b32.xlu0 %v9401_v51, %s7634_s6  ;;  %5693 = vmatprep.subr.bf16.mxu0 %v5692_v61 }
 0x1b9   : > { %v9423_v56 = vpop.permute.xlu1 %7039  ;;  %v2743_v14 = vsel %vm2742_vm2, %v7026_v55, %v7016_v47  ;;  %v2896_v55 = vsel %vm2894_vm3, %v7031_v57, %v11351_v48 }
 0x1ba   : > { %v9427_v44 = vpop.permute.xlu0 %7034  ;;  %v5694_v34 = vpack.c.bf16 %v2743_v14, %v2591_v42  ;;  %v7041_v61 = vunpack.i.l.bf16 %v9423_v56 }
 0x1bb   : > { %v11353_v35 = vunpack.i.h.bf16 %v9427_v44  ;;  %v7036_v54 = vunpack.i.l.bf16 %v9427_v44  ;;  %7294 = vrot.lane.b32.xlu1 %v9377_v24, %s7637_s13 }
 0x1bc   : > { %7289 = vrot.lane.b32.xlu0 %v9377_v24, %s7636_s8  ;;  %5695 = vmatpush1.bf16.msra.mxu0 %v5694_v34 }
 0x1bd   : > { %v9436_v32 = vpop.permute.xlu1 %7049  ;;  %v3048_v14 = vsel %vm3046_vm4, %v7036_v54, %v11353_v35  ;;  %v2895_v35 = vsel %vm2894_vm3, %v7041_v61, %v7031_v57 }
 0x1be   : > { %v9444_v42 = vpop.permute.xlu0 %7044  ;;  %v5696_v47 = vpack.c.bf16 %v3048_v14, %v2896_v55  ;;  %v11357_v34 = vunpack.i.h.bf16 %v9436_v32  ;;  %v7051_v48 = vunpack.i.l.bf16 %v9436_v32 }
 0x1bf   : > { %v7046_v5 = vunpack.i.l.bf16 %v9444_v42  ;;  %7304 = vrot.lane.b32.xlu1 %v9401_v51, %s7637_s13 }
 0x1c0   : > { %7299 = vrot.lane.b32.xlu0 %v9401_v51, %s7636_s8  ;;  %5697 = vmatprep.subr.bf16.mxu0 %v5696_v47 }
 0x1c1   : > { %v9453_v52 = vpop.permute.xlu1 %7059  ;;  %v3047_v9 = vsel %vm3046_vm4, %v7046_v5, %v7036_v54 }
 0x1c2   : > { %v9457_v55 = vpop.permute.xlu0 %7054  ;;  %v5698_v14 = vpack.c.bf16 %v3047_v9, %v2895_v35  ;;  %v7061_v57 = vunpack.i.l.bf16 %v9453_v52  ;;  %v3200_v9 = vsel %vm3198_vm5, %v7051_v48, %v11357_v34 }
 0x1c3   : > { %v11359_v36 = vunpack.i.h.bf16 %v9457_v55  ;;  %v7056_v50 = vunpack.i.l.bf16 %v9457_v55  ;;  %7314 = vrot.lane.b32.xlu1 %v9377_v24, %s7639_s15 }
 0x1c4   : > { %7309 = vrot.lane.b32.xlu0 %v9377_v24, %s7638_s14  ;;  %5699 = vmatpush1.bf16.msra.mxu0 %v5698_v14 }
 0x1c5   : > { %v9466_v61 = vpop.permute.xlu1 %7069  ;;  %v3352_v35 = vsel %vm3350_vm6, %v7056_v50, %v11359_v36  ;;  %v3199_v36 = vsel %vm3198_vm5, %v7061_v57, %v7051_v48 }
 0x1c6   : > { %v9474_v54 = vpop.permute.xlu0 %7064  ;;  %v5700_v47 = vpack.c.bf16 %v3352_v35, %v3200_v9  ;;  %v11363_v14 = vunpack.i.h.bf16 %v9466_v61  ;;  %v7071_v34 = vunpack.i.l.bf16 %v9466_v61 }
 0x1c7   : > { %v7066_v5 = vunpack.i.l.bf16 %v9474_v54  ;;  %7324 = vrot.lane.b32.xlu1 %v9401_v51, %s7639_s15 }
 0x1c8   : > { %7319 = vrot.lane.b32.xlu0 %v9401_v51, %s7638_s14  ;;  %5701 = vmatprep.subr.bf16.mxu0 %v5700_v47 }
 0x1c9   : > { %v9483_v49 = vpop.permute.xlu1 %7079  ;;  %v3351_v11 = vsel %vm3350_vm6, %v7066_v5, %v7056_v50  ;;  %v3504_v50 = vsel %vm3502_vm7, %v7071_v34, %v11363_v14 }
 0x1ca   : > { %v9487_v9 = vpop.permute.xlu0 %7074  ;;  %v5702_v35 = vpack.c.bf16 %v3351_v11, %v3199_v36  ;;  %v7081_v48 = vunpack.i.l.bf16 %v9483_v49 }
 0x1cb   : > { %v11364_v22 = vunpack.i.h.bf16 %v9487_v9  ;;  %v7076_v2 = vunpack.i.l.bf16 %v9487_v9  ;;  %7334 = vrot.lane.b32.xlu1 %v9377_v24, %s7641_s18 }
 0x1cc   : > { %7329 = vrot.lane.b32.xlu0 %v9377_v24, %s7640_s17  ;;  %5703 = vmatpush1.bf16.msra.mxu0 %v5702_v35 }
 0x1cd   : > { %v9496_v57 = vpop.permute.xlu1 %7089  ;;  %v3656_v11 = vsel %vm3654_vm8, %v7076_v2, %v11364_v22  ;;  %v3503_v22 = vsel %vm3502_vm7, %v7081_v48, %v7071_v34 }
 0x1ce   : > { %v9504_v36 = vpop.permute.xlu0 %7084  ;;  %v5704_v47 = vpack.c.bf16 %v3656_v11, %v3504_v50  ;;  %v11367_v24 = vunpack.i.h.bf16 %v9496_v57  ;;  %v7091_v35 = vunpack.i.l.bf16 %v9496_v57 }
 0x1cf   : > { %v7086_v5 = vunpack.i.l.bf16 %v9504_v36  ;;  %7344 = vrot.lane.b32.xlu1 %v9401_v51, %s7641_s18 }
 0x1d0   : > { %7339 = vrot.lane.b32.xlu0 %v9401_v51, %s7640_s17  ;;  %5705 = vmatprep.subr.bf16.mxu0 %v5704_v47 }
 0x1d1   : > { %v9513_v14 = vpop.permute.xlu1 %7099  ;;  %v3655_v28 = vsel %vm3654_vm8, %v7086_v5, %v7076_v2  ;;  %v185_v5 = vld [vmem:[%s7684_s16 + $0x28] sm:$0xff] }
 0x1d2   : > { %v9517_v50 = vpop.permute.xlu0 %7094  ;;  %v5706_v11 = vpack.c.bf16 %v3655_v28, %v3503_v22  ;;  %v7101_v34 = vunpack.i.l.bf16 %v9513_v14  ;;  %v3808_v22 = vsel %vm3806_vm9, %v7091_v35, %v11367_v24 }
 0x1d3   : > { %v11368_v46 = vunpack.i.h.bf16 %v9517_v50  ;;  %v7096_v51 = vunpack.i.l.bf16 %v9517_v50  ;;  %4082 = vrot.lane.b32.xlu1 %v9149_v1, %s7642_s21 }
 0x1d4   : > { %4080 = vrot.lane.b32.xlu0 %v9068_v10, %s7642_s21  ;;  %5707 = vmatpush1.bf16.msra.mxu0 %v5706_v11  ;;  %v7353_v10 = vpack.i.bf16 %v9382_v30, %v9363_v16  ;;  %v9543_v11 = vld [vmem:[%s7684_s16 + $0x88] sm:$0xff] }
 0x1d5   : > { %v4069_v2 = vpop.permute.xlu1 %4068  ;;  %v3960_v28 = vsel %vm3958_vm11, %v7096_v51, %v11368_v46 }
 0x1d6   : > { %v9532_v48 = vpop.permute.xlu0 %7104  ;;  %v5708_v47 = vpack.c.bf16 %v3960_v28, %v3808_v22  ;;  %v3807_v28 = vsel %vm3806_vm9, %v7101_v34, %v7091_v35  ;;  %v11603_v35 = vunpack.i.l.bf16 %v7827_v40 }
 0x1d7   : > { %v7106_v1 = vunpack.i.l.bf16 %v9532_v48  ;;  %4086 = vrot.lane.b32.xlu1 %v9382_v30, %s7642_s21 }
 0x1d8   : > { %4084 = vrot.lane.b32.xlu0 %v9363_v16, %s7642_s21  ;;  %5709 = vmatprep.subr.bf16.mxu0 %v5708_v47  ;;  %v7363_v16 = vpack.i.bf16 %v9543_v11, %v9385_v27  ;;  %v7007_v47 = vunpack.i.h.bf16 %v9370_v43 }
 0x1d9   : > { %v4067_v22 = vpop.permute.xlu1 %4066  ;;  %v3959_v24 = vsel %vm3958_vm11, %v7106_v1, %v7096_v51  ;;  %v11604_v51 = vunpack.i.h.bf16 %v7814_v33  ;;  %v184_v1 = vld [vmem:[%s7684_s16 + $0x20] sm:$0xff] }
 0x1da   : > { %v9547_v46 = vpop.permute.xlu0 %4070  ;;  %v5710_v21 = vpack.c.bf16 %v3959_v24, %v3807_v28  ;;  %v6997_v28 = vunpack.i.h.bf16 %v9348_v20  ;;  %v4111_v33 = vsel %vm4110_vm12, %v4067_v22, %v4069_v2 }
 0x1db   : > { %11602 = vst [vmem:[#allocation197_spill] sm:$0xff] %v9547_v46  ;;  %7354 = vrot.lane.b32.xlu1 %v7353_v10, %s7631_s3  ;;  %v4112_v30 = vsel %vm4110_vm12, %v4069_v2, %v9547_v46  ;;  %v316_v24 = vsel %vm310_vm0, %v11604_v51, %v11603_v35  ;;  %v5766_v35 = vpack.c.bf16 %v7823_v37, %v184_v1  ;;  %v11605_v46 = vunpack.i.h.bf16 %v9338_v4 }
 0x1dc   : > { %7349 = vrot.lane.b32.xlu0 %v7353_v10, %s7630_s30  ;;  %5711 = vmatpush1.bf16.msra.mxu0 %v5710_v21  ;;  %v9572_v21 = vld [vmem:[%s11162_s1] sm:$0xff]  ;;  %v7027_v1 = vunpack.i.h.bf16 %v9414_v6 }
 0x1dd   : > { %4799 = vmatprep.subr.mxu0 %v4112_v30  ;;  %v9562_v34 = vpop.permute.xlu1 %7114  ;;  %v5764_v30 = vpack.c.bf16 %v316_v24, %v185_v5  ;;  %v2441_v27 = vsel %vm2438_vm14, %v11605_v46, %v7007_v47  ;;  %v11607_v24 = vunpack.i.l.bf16 %v9348_v20  ;;  %v11608_v46 = vpack.c.bf16 %v7965_v38, %v7929_v58  ;;  %v9605_v20 = vld [vmem:[%s7684_s16 + $0x90] sm:$0xff] }
 0x1de   : > { %v7116_v41 = vunpack.i.l.bf16 %v9562_v34  ;;  %v9567_v13 = vpop.permute.xlu0 %7109 }
 0x1df   : > { %7364 = vrot.lane.b32.xlu1 %v7363_v16, %s7631_s3  ;;  %v11606_v2 = vunpack.i.l.bf16 %v9567_v13  ;;  %v2289_v4 = vsel %vm2286_vm15, %v11607_v24, %v6997_v28 }
 0x1e0   : > { %7359 = vrot.lane.b32.xlu0 %v7363_v16, %s7630_s30  ;;  %4800 = vmatpush1.msra.mxu0 %v4111_v33  ;;  %v2442_v51 = vsel %vm2438_vm14, %v7007_v47, %v7116_v41  ;;  %v5742_v47 = vpack.c.bf16 %v2441_v27, %v2289_v4  ;;  %v11609_v27 = vpack.c.bf16 %v7961_v23, %v7869_v0  ;;  %v11611_v0 = vunpack.i.h.bf16 %v9393_v8 }
 0x1e1   : > { %5765 = vmatprep.subr.bf16.mxu0 %v5764_v30  ;;  %v9585_v43 = vpop.permute.xlu1 %7124  ;;  %4812 = vmatmul.mubr.f32.vlgmr.msra.gmra.mrb[0].mxu0 %v9572_v21  ;;  %v2290_v5 = vsel %vm2286_vm15, %v6997_v28, %v11606_v2  ;;  %v9623_v33 = vpack.i.bf16 %v9605_v20, %v9543_v11  ;;  %v9633_v30 = vld [vmem:[%s7684_s16 + $0x98] sm:$0xff]  ;;  %v11613_v8 = vunpack.i.h.bf16 %v9365_v7  ;;  %v11615_v7 = vpack.c.bf16 %v8458_v18, %v8377_v15 }
 0x1e2   : > { %v9591_v22 = vpop.permute.xlu0 %7119  ;;  %5767 = vmatpush1.bf16.msra.mxu0 %v5766_v35  ;;  %v5740_v37 = vpack.c.bf16 %v2442_v51, %v2290_v5  ;;  %5649 = vmatprep.mubr.msk.f32.mxu0 %vm4743_vm10, %v8901_v31  ;;  %v7022_v31 = vunpack.i.h.bf16 %v9389_v45  ;;  %v2745_v23 = vsel %vm2742_vm2, %v11611_v0, %v7027_v1  ;;  %v7126_v15 = vunpack.i.l.bf16 %v9585_v43 }
 0x1e3   : > { %5769 = vmatprep.subr.bf16.mxu0 %v11608_v46  ;;  %7374 = vrot.lane.b32.xlu1 %v7353_v10, %s7633_s5  ;;  %v7047_v46 = vunpack.i.h.bf16 %v9444_v42  ;;  %v11616_v42 = vpack.c.bf16 %v8723_v12, %v8690_v3  ;;  %v7121_v12 = vunpack.i.l.bf16 %v9591_v22 }
 0x1e4   : > { %7369 = vrot.lane.b32.xlu0 %v7353_v10, %s7632_s4  ;;  %5741 = vmatprep.subr.bf16.mxu1 %v5740_v37  ;;  %v11610_v10 = vpack.c.bf16 %v8246_v62, %v8210_v39  ;;  %v9636_v39 = vld [vmem:[%s7684_s16 + $0xa0] sm:$0xff]  ;;  %v2593_v5 = vsel %vm2590_vm1, %v11613_v8, %v7022_v31  ;;  %v11614_v37 = vpack.c.bf16 %v8462_v29, %v8426_v25  ;;  %v7117_v8 = vunpack.i.h.bf16 %v9562_v34 }
 0x1e5   : > { %5743 = vmatpush1.bf16.msra.mxu1 %v5742_v47  ;;  %v9607_v28 = vpop.permute.xlu1 %7134  ;;  %v5746_v24 = vpack.c.bf16 %v2745_v23, %v2593_v5  ;;  %v7403_v4 = vpack.i.bf16 %v9636_v39, %v9633_v30  ;;  %v11622_v5 = vld [vmem:[#allocation143_spill] sm:$0xff] }
 0x1e6   : > { %v7136_v58 = vunpack.i.l.bf16 %v9607_v28  ;;  %v9611_v38 = vpop.permute.xlu0 %7129  ;;  %5771 = vmatpush1.bf16.msra.mxu0 %v11609_v27 }
 0x1e7   : > { %v7131_v6 = vunpack.i.l.bf16 %v9611_v38  ;;  %5773 = vmatprep.subr.bf16.mxu0 %v11610_v10  ;;  %7384 = vrot.lane.b32.xlu1 %v7363_v16, %s7633_s5  ;;  %v11618_v10 = vld [vmem:[#allocation109_spill] sm:$0xff] }
 0x1e8   : > { %7379 = vrot.lane.b32.xlu0 %v7363_v16, %s7632_s4  ;;  %v2746_v45 = vsel %vm2742_vm2, %v7027_v1, %v7136_v58  ;;  %v11612_v16 = vpack.c.bf16 %v8242_v63, %v8122_v53  ;;  %v7042_v63 = vunpack.i.h.bf16 %v9423_v56  ;;  %v11617_v1 = vunpack.i.h.bf16 %v9427_v44 }
 0x1e9   : > { %v9638_v62 = vpop.permute.xlu1 %7144  ;;  %v2594_v35 = vsel %vm2590_vm1, %v7022_v31, %v7131_v6  ;;  %v11621_v44 = vunpack.i.h.bf16 %v9406_v60  ;;  %v2444_v60 = vsel %vm2438_vm14, %v7117_v8, %v7126_v15 }
 0x1ea   : > { %v9643_v51 = vpop.permute.xlu0 %7139  ;;  %5775 = vmatpush1.bf16.msra.mxu0 %v11612_v16  ;;  %v5744_v2 = vpack.c.bf16 %v2746_v45, %v2594_v35  ;;  %v3049_v31 = vsel %vm3046_vm4, %v11617_v1, %v7047_v46  ;;  %v11619_v45 = vld [vmem:[#allocation100_spill] sm:$0xff]  ;;  %v7062_v16 = vunpack.i.h.bf16 %v9453_v52  ;;  %v11625_v1 = vld [vmem:[#allocation142_spill] sm:$0xff] }
 0x1eb   : > { %5777 = vmatprep.subr.bf16.mxu0 %v11614_v37  ;;  %7394 = vrot.lane.b32.xlu1 %v9623_v33, %s7635_s7  ;;  %v11620_v0 = vpack.c.bf16 %v11618_v10, %v11619_v45  ;;  %v2897_v35 = vsel %vm2894_vm3, %v11621_v44, %v7042_v63  ;;  %v11623_v37 = vld [vmem:[#allocation135_spill] sm:$0xff] }
 0x1ec   : > { %7389 = vrot.lane.b32.xlu0 %v9623_v33, %s7634_s6  ;;  %5745 = vmatprep.subr.bf16.mxu1 %v5744_v2  ;;  %v7067_v2 = vunpack.i.h.bf16 %v9474_v54  ;;  %v7146_v54 = vunpack.i.l.bf16 %v9638_v62 }
 0x1ed   : > { %5747 = vmatpush1.bf16.msra.mxu1 %v5746_v24  ;;  %v9661_v53 = vpop.permute.xlu1 %7154  ;;  %v11624_v24 = vpack.c.bf16 %v11622_v5, %v11623_v37  ;;  %v2443_v37 = vsel %vm2438_vm14, %v7116_v41, %v7117_v8 }
 0x1ee   : > { %v7156_v25 = vunpack.i.l.bf16 %v9661_v53  ;;  %v9665_v29 = vpop.permute.xlu0 %7149  ;;  %5779 = vmatpush1.bf16.msra.mxu0 %v11615_v7  ;;  %v7112_v7 = vunpack.i.h.bf16 %v9567_v13 }
 0x1ef   : > { %v7151_v47 = vunpack.i.l.bf16 %v9665_v29  ;;  %5781 = vmatprep.subr.bf16.mxu0 %v11616_v42  ;;  %7404 = vrot.lane.b32.xlu1 %v7403_v4, %s7635_s7 }
 0x1f0   : > { %7399 = vrot.lane.b32.xlu0 %v7403_v4, %s7634_s6  ;;  %v3050_v56 = vsel %vm3046_vm4, %v7047_v46, %v7156_v25  ;;  %v5750_v46 = vpack.c.bf16 %v3049_v31, %v2897_v35  ;;  %v11626_v31 = vld [vmem:[#allocation132_spill] sm:$0xff]  ;;  %v2292_v10 = vsel %vm2286_vm15, %v7112_v7, %v7121_v12  ;;  %v11630_v35 = vunpack.i.h.bf16 %v9457_v55 }
 0x1f1   : > { %v9683_v18 = vpop.permute.xlu1 %7164  ;;  %v2898_v3 = vsel %vm2894_vm3, %v7042_v63, %v7151_v47  ;;  %v7141_v63 = vunpack.i.l.bf16 %v9643_v51  ;;  %v5792_v34 = vpack.c.bf16 %v2444_v60, %v2292_v10 }
 0x1f2   : > { %v9689_v27 = vpop.permute.xlu0 %7159  ;;  %5783 = vmatpush1.bf16.msra.mxu0 %v11620_v0  ;;  %v5748_v23 = vpack.c.bf16 %v3050_v56, %v2898_v3  ;;  %v11627_v3 = vpack.c.bf16 %v11625_v1, %v11626_v31  ;;  %v11628_v0 = vpack.c.bf16 %v9222_v59, %v9186_v19  ;;  %v3353_v5 = vsel %vm3350_vm6, %v11630_v35, %v7067_v2 }
 0x1f3   : > { %5785 = vmatprep.subr.bf16.mxu0 %v11624_v24  ;;  %7414 = vrot.lane.b32.xlu1 %v9623_v33, %s7637_s13  ;;  %v7137_v24 = vunpack.i.h.bf16 %v9607_v28  ;;  %v11631_v59 = vunpack.i.l.bf16 %v9567_v13  ;;  %v7166_v55 = vunpack.i.l.bf16 %v9683_v18  ;;  %v7161_v8 = vunpack.i.l.bf16 %v9689_v27 }
 0x1f4   : > { %7409 = vrot.lane.b32.xlu0 %v9623_v33, %s7636_s8  ;;  %5749 = vmatprep.subr.bf16.mxu1 %v5748_v23  ;;  %v11629_v23 = vunpack.i.h.bf16 %v9436_v32  ;;  %v7082_v31 = vunpack.i.h.bf16 %v9483_v49 }
 0x1f5   : > { %5751 = vmatpush1.bf16.msra.mxu1 %v5750_v46  ;;  %v9708_v52 = vpop.permute.xlu1 %7174  ;;  %v7132_v46 = vunpack.i.h.bf16 %v9611_v38  ;;  %v2291_v32 = vsel %vm2286_vm15, %v11631_v59, %v7112_v7  ;;  %v2748_v60 = vsel %vm2742_vm2, %v7137_v24, %v7146_v54  ;;  %v2747_v49 = vsel %vm2742_vm2, %v7136_v58, %v7137_v24 }
 0x1f6   : > { %v7176_v42 = vunpack.i.l.bf16 %v9708_v52  ;;  %v9716_v56 = vpop.permute.xlu0 %7169  ;;  %5787 = vmatpush1.bf16.msra.mxu0 %v11627_v3  ;;  %v3201_v44 = vsel %vm3198_vm5, %v11629_v23, %v7062_v16  ;;  %v7157_v3 = vunpack.i.h.bf16 %v9661_v53  ;;  %v5794_v10 = vpack.c.bf16 %v2443_v37, %v2291_v32 }
 0x1f7   : > { %v7171_v45 = vunpack.i.l.bf16 %v9716_v56  ;;  %5789 = vmatprep.subr.bf16.mxu0 %v11628_v0  ;;  %7424 = vrot.lane.b32.xlu1 %v7403_v4, %s7637_s13  ;;  %v2596_v7 = vsel %vm2590_vm1, %v7132_v46, %v7141_v63  ;;  %v11633_v38 = vunpack.i.h.bf16 %v9466_v61  ;;  %v11634_v24 = vunpack.i.h.bf16 %v9487_v9 }
 0x1f8   : > { %7419 = vrot.lane.b32.xlu0 %v7403_v4, %s7636_s8  ;;  %v3354_v19 = vsel %vm3350_vm6, %v7067_v2, %v7176_v42  ;;  %v11632_v2 = vpack.c.bf16 %v9218_v26, %v9122_v17  ;;  %v5754_v17 = vpack.c.bf16 %v3353_v5, %v3201_v44  ;;  %v7152_v26 = vunpack.i.h.bf16 %v9665_v29 }
 0x1f9   : > { %v9748_v1 = vpop.permute.xlu1 %7184  ;;  %v3202_v41 = vsel %vm3198_vm5, %v7062_v16, %v7171_v45  ;;  %v7087_v16 = vunpack.i.h.bf16 %v9504_v36  ;;  %v2595_v36 = vsel %vm2590_vm1, %v7131_v6, %v7132_v46  ;;  %v5796_v23 = vpack.c.bf16 %v2748_v60, %v2596_v7 }
 0x1fa   : > { %v9754_v4 = vpop.permute.xlu0 %7179  ;;  %5791 = vmatpush1.bf16.msra.mxu0 %v11632_v2  ;;  %v5752_v13 = vpack.c.bf16 %v3354_v19, %v3202_v41  ;;  %v3052_v44 = vsel %vm3046_vm4, %v7157_v3, %v7166_v55  ;;  %v7186_v35 = vunpack.i.l.bf16 %v9748_v1  ;;  %v2900_v28 = vsel %vm2894_vm3, %v7152_v26, %v7161_v8 }
 0x1fb   : > { %5793 = vmatprep.subr.bf16.mxu0 %v5792_v34  ;;  %7434 = vrot.lane.b32.xlu1 %v9623_v33, %s7639_s15  ;;  %v7181_v5 = vunpack.i.l.bf16 %v9754_v4  ;;  %v3505_v6 = vsel %vm3502_vm7, %v11633_v38, %v7082_v31  ;;  %v3657_v46 = vsel %vm3654_vm8, %v11634_v24, %v7087_v16  ;;  %v7177_v59 = vunpack.i.h.bf16 %v9708_v52 }
 0x1fc   : > { %7429 = vrot.lane.b32.xlu0 %v9623_v33, %s7638_s14  ;;  %5753 = vmatprep.subr.bf16.mxu1 %v5752_v13  ;;  %v7172_v32 = vunpack.i.h.bf16 %v9716_v56  ;;  %v5798_v34 = vpack.c.bf16 %v2747_v49, %v2595_v36  ;;  %v3051_v61 = vsel %vm3046_vm4, %v7156_v25, %v7157_v3  ;;  %v2899_v9 = vsel %vm2894_vm3, %v7151_v47, %v7152_v26 }
 0x1fd   : > { %5755 = vmatpush1.bf16.msra.mxu1 %v5754_v17  ;;  %v7195_v0 = vpop.permute.xlu1 %7194  ;;  %v5800_v13 = vpack.c.bf16 %v3052_v44, %v2900_v28  ;;  %v3356_v25 = vsel %vm3350_vm6, %v7177_v59, %v7186_v35  ;;  %v7107_v29 = vunpack.i.h.bf16 %v9532_v48  ;;  %v5802_v26 = vpack.c.bf16 %v3051_v61, %v2899_v9 }
 0x1fe   : > { %v7196_v37 = vunpack.i.l.bf16 %v7195_v0  ;;  %v7190_v19 = vpop.permute.xlu0 %7189  ;;  %5795 = vmatpush1.bf16.msra.mxu0 %v5794_v10  ;;  %v3204_v53 = vsel %vm3198_vm5, %v7172_v32, %v7181_v5  ;;  %v3355_v49 = vsel %vm3350_vm6, %v7176_v42, %v7177_v59  ;;  %v3203_v48 = vsel %vm3198_vm5, %v7171_v45, %v7172_v32  ;;  %v11635_v42 = vld [vmem:[#allocation4_spill] sm:$0xff] }
 0x1ff   : > { %v7191_v58 = vunpack.i.l.bf16 %v7190_v19  ;;  %5797 = vmatprep.subr.bf16.mxu0 %v5796_v23  ;;  %3638 = vrot.lane.b32.xlu1 %v9633_v30, %s7639_s15  ;;  %v7192_v3 = vunpack.i.h.bf16 %v7190_v19  ;;  %v5804_v23 = vpack.c.bf16 %v3356_v25, %v3204_v53  ;;  %v7102_v44 = vunpack.i.h.bf16 %v9513_v14  ;;  %v11638_v25 = vld [vmem:[#allocation196_spill] sm:$0xff] }
 0x200   : > { %3486 = vrot.lane.b32.xlu0 %v9633_v30, %s7638_s14  ;;  %v3658_v41 = vsel %vm3654_vm8, %v7087_v16, %v7196_v37  ;;  %v7197_v16 = vunpack.i.h.bf16 %v7195_v0  ;;  %v6296_v56 = vunpack.i.l.bf16 %v11635_v42  ;;  %v11636_v14 = vunpack.i.h.bf16 %v9517_v50 }
 0x201   : > { %v9806_v2 = vpop.permute.xlu1 %7204  ;;  %v3506_v7 = vsel %vm3502_vm7, %v7082_v31, %v7191_v58  ;;  %v5758_v31 = vpack.c.bf16 %v3657_v46, %v3505_v6  ;;  %v3507_v6 = vsel %vm3502_vm7, %v7191_v58, %v7192_v3  ;;  %v5806_v24 = vpack.c.bf16 %v3355_v49, %v3203_v48  ;;  %v11639_v48 = vld [vmem:[#allocation3_spill] sm:$0xff] }
 0x202   : > { %v7206_v60 = vunpack.i.l.bf16 %v9806_v2  ;;  %v9810_v17 = vpop.permute.xlu0 %7199  ;;  %5799 = vmatpush1.bf16.msra.mxu0 %v5798_v34  ;;  %v5756_v10 = vpack.c.bf16 %v3658_v41, %v3506_v7  ;;  %v3961_v45 = vsel %vm3958_vm11, %v11636_v14, %v7107_v29  ;;  %v3659_v38 = vsel %vm3654_vm8, %v7196_v37, %v7197_v16 }
 0x203   : > { %v11377_v47 = vunpack.i.l.bf16 %v9810_v17  ;;  %5801 = vmatprep.subr.bf16.mxu0 %v5800_v13  ;;  %7444 = vrot.lane.b32.xlu1 %v9623_v33, %s7641_s18  ;;  %v11637_v58 = vunpack.i.h.bf16 %v9496_v57  ;;  %v6292_v7 = vunpack.i.h.bf16 %v7827_v40 }
 0x204   : > { %7439 = vrot.lane.b32.xlu0 %v9623_v33, %s7640_s17  ;;  %5757 = vmatprep.subr.bf16.mxu1 %v5756_v10  ;;  %v3660_v52 = vsel %vm3654_vm8, %v7197_v16, %v7206_v60 }
 0x205   : > { %5759 = vmatpush1.bf16.msra.mxu1 %v5758_v31  ;;  %v7215_v36 = vpop.permute.xlu1 %7214  ;;  %v3508_v33 = vsel %vm3502_vm7, %v7192_v3, %v11377_v47  ;;  %v3809_v13 = vsel %vm3806_vm9, %v11637_v58, %v7102_v44  ;;  %v318_v49 = vsel %vm310_vm0, %v6292_v7, %v6296_v56  ;;  %v11708_v47 = vld [vmem:[#allocation178_spill] sm:$0xff] }
 0x206   : > { %v7216_v0 = vunpack.i.l.bf16 %v7215_v36  ;;  %v7210_v19 = vpop.permute.xlu0 %7209  ;;  %5803 = vmatpush1.bf16.msra.mxu0 %v5802_v26  ;;  %v7217_v59 = vunpack.i.h.bf16 %v7215_v36  ;;  %v5808_v41 = vpack.c.bf16 %v3660_v52, %v3508_v33  ;;  %v5762_v53 = vpack.c.bf16 %v3961_v45, %v3809_v13  ;;  %v187_v26 = vld [vmem:[%s7684_s16 + $0x38] sm:$0xff]  ;;  %v186_v45 = vld [vmem:[%s7684_s16 + $0x30] sm:$0xff] }
 0x207   : > { %v7211_v28 = vunpack.i.l.bf16 %v7210_v19  ;;  %5805 = vmatprep.subr.bf16.mxu0 %v5804_v23  ;;  %3942 = vrot.lane.b32.xlu1 %v9633_v30, %s7641_s18  ;;  %v7212_v32 = vunpack.i.h.bf16 %v7210_v19  ;;  %v11374_v36 = vunpack.i.l.bf16 %v11639_v48  ;;  %v6297_v23 = vunpack.i.h.bf16 %v11635_v42  ;;  %v9916_v42 = vld [vmem:[%s11162_s1 + $0x8] sm:$0xff] }
 0x208   : > { %3790 = vrot.lane.b32.xlu0 %v9633_v30, %s7640_s17  ;;  %v3962_v46 = vsel %vm3958_vm11, %v7107_v29, %v7216_v0  ;;  %v5810_v29 = vpack.c.bf16 %v3659_v38, %v3507_v6  ;;  %v3963_v31 = vsel %vm3958_vm11, %v7216_v0, %v7217_v59  ;;  %v11640_v19 = vunpack.i.l.bf16 %v7827_v40 }
 0x209   : > { %v9848_v34 = vpop.permute.xlu1 %7224  ;;  %v3810_v61 = vsel %vm3806_vm9, %v7102_v44, %v7211_v28  ;;  %v3811_v16 = vsel %vm3806_vm9, %v7211_v28, %v7212_v32  ;;  %v11641_v28 = vld [vmem:[#allocation197_spill] sm:$0xff]  ;;  %v7453_v38 = vpack.i.bf16 %v9633_v30, %v9605_v20  ;;  %v5816_v6 = vpack.c.bf16 %v318_v49, %v187_v26 }
 0x20a   : > { %v11376_v50 = vunpack.i.l.bf16 %v9848_v34  ;;  %v9852_v9 = vpop.permute.xlu0 %7219  ;;  %5807 = vmatpush1.bf16.msra.mxu0 %v5806_v24  ;;  %v5760_v37 = vpack.c.bf16 %v3962_v46, %v3810_v61  ;;  %v317_v33 = vsel %vm310_vm0, %v11640_v19, %v6292_v7  ;;  %v5814_v40 = vpack.c.bf16 %v3963_v31, %v3811_v16  ;;  %v11642_v61 = vld [vmem:[#allocation21_spill] sm:$0xff] }
 0x20b   : > { %v11375_v10 = vunpack.i.l.bf16 %v9852_v9  ;;  %5809 = vmatprep.subr.bf16.mxu0 %v5808_v41  ;;  %4090 = vrot.lane.b32.xlu1 %v9543_v11, %s7642_s21  ;;  %v319_v41 = vsel %vm310_vm0, %v6296_v56, %v6297_v23  ;;  %v11645_v56 = vld [vmem:[#allocation17_spill] sm:$0xff] }
 0x20c   : > { %4088 = vrot.lane.b32.xlu0 %v11638_v25, %s7642_s21  ;;  %5761 = vmatprep.subr.bf16.mxu1 %v5760_v37  ;;  %v3964_v57 = vsel %vm3958_vm11, %v7217_v59, %v11376_v50  ;;  %v5818_v59 = vpack.c.bf16 %v317_v33, %v186_v45  ;;  %v11643_v37 = vld [vmem:[#allocation12_spill] sm:$0xff]  ;;  %v188_v25 = vld [vmem:[%s7684_s16 + $0x40] sm:$0xff]  ;;  %v9949_v45 = vld [vmem:[%s7684_s16 + $0xb0] sm:$0xff] }
 0x20d   : > { %5763 = vmatpush1.bf16.msra.mxu1 %v5762_v53  ;;  %v4075_v3 = vpop.permute.xlu1 %4074  ;;  %v3812_v11 = vsel %vm3806_vm9, %v7212_v32, %v11375_v10  ;;  %v189_v32 = vld [vmem:[%s7684_s16 + $0x48] sm:$0xff]  ;;  %v11644_v58 = vpack.c.bf16 %v11642_v61, %v11643_v37  ;;  %v5870_v16 = vpack.c.bf16 %v319_v41, %v188_v25  ;;  %v11654_v33 = vld [vmem:[#allocation47_spill] sm:$0xff]  ;;  %v11664_v37 = vld [vmem:[#allocation45_spill] sm:$0xff] }
 0x20e   : > { %v4073_v44 = vpop.permute.xlu0 %4072  ;;  %5811 = vmatpush1.bf16.msra.mxu0 %v5810_v29  ;;  %v5812_v0 = vpack.c.bf16 %v3964_v57, %v3812_v11  ;;  %v11646_v57 = vld [vmem:[#allocation11_spill] sm:$0xff]  ;;  %v11649_v11 = vld [vmem:[#allocation42_spill] sm:$0xff]  ;;  %v11663_v61 = vld [vmem:[#allocation52_spill] sm:$0xff] }
 0x20f   : > { %4094 = vrot.lane.b32.xlu1 %v9633_v30, %s7642_s21  ;;  %v4114_v52 = vsel %vm4110_vm12, %v4073_v44, %v4075_v3  ;;  %v4113_v14 = vsel %vm4110_vm12, %v11641_v28, %v4073_v44  ;;  %v320_v30 = vsel %vm310_vm0, %v6297_v23, %v11374_v36  ;;  %v11647_v31 = vpack.c.bf16 %v11645_v56, %v11646_v57  ;;  %v11651_v44 = vld [vmem:[#allocation22_spill] sm:$0xff]  ;;  %v11669_v56 = vld [vmem:[#allocation112_spill] sm:$0xff]  ;;  %v11697_v10 = vld [vmem:[#allocation101_spill] sm:$0xff] }
 0x210   : > { %4092 = vrot.lane.b32.xlu0 %v9605_v20, %s7642_s21  ;;  %4870 = vmatprep.subr.mxu1 %v4114_v52  ;;  %v5868_v53 = vpack.c.bf16 %v320_v30, %v189_v32  ;;  %v11655_v52 = vld [vmem:[#allocation41_spill] sm:$0xff]  ;;  %v11660_v32 = vld [vmem:[#allocation20_spill] sm:$0xff]  ;;  %v11661_v30 = vld [vmem:[#allocation10_spill] sm:$0xff] }
 0x211   : > { %5813 = vmatprep.subr.bf16.mxu0 %v5812_v0  ;;  %4871 = vmatpush1.msra.mxu1 %v4113_v14  ;;  %v9890_v24 = vpop.permute.xlu1 %4078  ;;  %v11652_v0 = vld [vmem:[#allocation15_spill] sm:$0xff]  ;;  %v11656_v28 = vpack.c.bf16 %v11654_v33, %v11655_v52  ;;  %v9946_v14 = vld [vmem:[%s7684_s16 + $0xa8] sm:$0xff]  ;;  %v11675_v33 = vld [vmem:[#allocation82_spill] sm:$0xff] }
 0x212   : > { %v4077_v46 = vpop.permute.xlu0 %4076  ;;  %5815 = vmatpush1.bf16.msra.mxu0 %v5814_v40  ;;  %5817 = vmatprep.subr.bf16.mxu1 %v5816_v6  ;;  %v11653_v19 = vpack.c.bf16 %v11651_v44, %v11652_v0  ;;  %v11657_v40 = vld [vmem:[#allocation81_spill] sm:$0xff]  ;;  %v11658_v6 = vld [vmem:[#allocation72_spill] sm:$0xff]  ;;  %v11676_v52 = vld [vmem:[#allocation75_spill] sm:$0xff] }
 0x213   : > { %4883 = vmatmul.mubr.f32.vlgmr.msra.gmra.mrb[0].mxu1 %v9572_v21  ;;  %7454 = vrot.lane.b32.xlu1 %v7453_v38, %s7631_s3  ;;  %v4116_v20 = vsel %vm4110_vm12, %v4077_v46, %v9890_v24  ;;  %v4115_v7 = vsel %vm4110_vm12, %v4075_v3, %v4077_v46  ;;  %v11648_v3 = vld [vmem:[#allocation51_spill] sm:$0xff]  ;;  %v11659_v46 = vpack.c.bf16 %v11657_v40, %v11658_v6  ;;  %v11670_v57 = vld [vmem:[#allocation104_spill] sm:$0xff] }
 0x214   : > { %5819 = vmatpush1.bf16.msra.mxu1 %v5818_v59  ;;  %7449 = vrot.lane.b32.xlu0 %v7453_v38, %s7630_s30  ;;  %v11650_v26 = vpack.c.bf16 %v11648_v3, %v11649_v11  ;;  %v7127_v3 = vunpack.i.h.bf16 %v9585_v43  ;;  %v7122_v11 = vunpack.i.h.bf16 %v9591_v22  ;;  %v11673_v44 = vld [vmem:[#allocation40_spill] sm:$0xff]  ;;  %v7162_v43 = vunpack.i.h.bf16 %v9689_v27 }
 0x215   : > { %4941 = vmatprep.subr.mxu0 %v4116_v20  ;;  %5821 = vmatprep.subr.bf16.mxu1 %v11644_v58  ;;  %v9907_v13 = vpop.permute.xlu1 %7234  ;;  %v11662_v20 = vpack.c.bf16 %v11660_v32, %v11661_v30  ;;  %v11665_v58 = vpack.c.bf16 %v11663_v61, %v11664_v37  ;;  %v11679_v32 = vld [vmem:[#allocation102_spill] sm:$0xff]  ;;  %v11681_v61 = vld [vmem:[#allocation147_spill] sm:$0xff]  ;;  %v11682_v37 = vld [vmem:[#allocation136_spill] sm:$0xff]  ;;  %v10029_v22 = vpack.i.bf16 %v9946_v14, %v9636_v39 }
 0x216   : > { %v9911_v29 = vpop.permute.xlu0 %7229  ;;  %4942 = vmatpush1.msra.mxu0 %v4115_v7  ;;  %5650 = vmatprep.mubr.msk.f32.mxu1 %vm4743_vm10, %v9916_v42  ;;  %v11666_v7 = vld [vmem:[#allocation77_spill] sm:$0xff]  ;;  %v7236_v40 = vunpack.i.l.bf16 %v9907_v13 }
 0x217   : > { %5869 = vmatprep.subr.bf16.mxu0 %v5868_v53  ;;  %2430 = vrot.lane.b32.xlu1 %v9636_v39, %s7631_s3  ;;  %v11667_v53 = vld [vmem:[#allocation71_spill] sm:$0xff]  ;;  %v7231_v6 = vunpack.i.l.bf16 %v9911_v29 }
 0x218   : > { %5823 = vmatpush1.bf16.msra.mxu1 %v11647_v31  ;;  %2278 = vrot.lane.b32.xlu0 %v9636_v39, %s7630_s30  ;;  %v11668_v25 = vpack.c.bf16 %v11666_v7, %v11667_v53  ;;  %v11671_v31 = vpack.c.bf16 %v11669_v56, %v11670_v57  ;;  %v2445_v53 = vsel %vm2438_vm14, %v7126_v15, %v7127_v3  ;;  %v7147_v56 = vunpack.i.h.bf16 %v9638_v62  ;;  %v11688_v15 = vld [vmem:[#allocation107_spill] sm:$0xff] }
 0x219   : > { %4954 = vmatmul.mubr.f32.vlgmr.msra.gmra.mrb[2].mxu0 %v9572_v21  ;;  %5825 = vmatprep.subr.bf16.mxu1 %v11650_v26  ;;  %v9931_v49 = vpop.permute.xlu1 %7244  ;;  %v11672_v26 = vld [vmem:[#allocation50_spill] sm:$0xff]  ;;  %v7142_v57 = vunpack.i.h.bf16 %v9643_v51  ;;  %v10073_v51 = vsel %vm2894_vm3, %v7161_v8, %v7162_v43 }
 0x21a   : > { %5871 = vmatpush1.bf16.msra.mxu0 %v5870_v16  ;;  %v9933_v23 = vpop.permute.xlu0 %7239  ;;  %5651 = vmatprep.mubr.msk.f32.mxu0 %vm4743_vm10, %v9916_v42  ;;  %v11674_v0 = vpack.c.bf16 %v11672_v26, %v11673_v44  ;;  %v11685_v26 = vld [vmem:[#allocation70_spill] sm:$0xff] }
 0x21b   : > { %5873 = vmatprep.subr.bf16.mxu0 %v11653_v19  ;;  %7464 = vrot.lane.b32.xlu1 %v7453_v38, %s7633_s5 }
 0x21c   : > { %5827 = vmatpush1.bf16.msra.mxu1 %v11656_v28  ;;  %7459 = vrot.lane.b32.xlu0 %v7453_v38, %s7632_s4  ;;  %v9968_v38 = vpack.i.bf16 %v9949_v45, %v9946_v14  ;;  %v11677_v28 = vpack.c.bf16 %v11675_v33, %v11676_v52  ;;  %v7167_v33 = vunpack.i.h.bf16 %v9683_v18  ;;  %v11687_v52 = vld [vmem:[#allocation113_spill] sm:$0xff] }
 0x21d   : > { %5829 = vmatprep.subr.bf16.mxu1 %v11659_v46  ;;  %v9954_v59 = vpop.permute.xlu1 %7254  ;;  %v11678_v46 = vld [vmem:[#allocation106_spill] sm:$0xff] }
 0x21e   : > { %5875 = vmatpush1.bf16.msra.mxu0 %v11662_v20  ;;  %v9959_v41 = vpop.permute.xlu0 %7249  ;;  %v11680_v30 = vpack.c.bf16 %v11678_v46, %v11679_v32  ;;  %v10000_v20 = vld [vmem:[%s7684_s16 + $0xb8] sm:$0xff]  ;;  %v7256_v46 = vunpack.i.l.bf16 %v9954_v59  ;;  %v10068_v62 = vsel %vm3046_vm4, %v7166_v55, %v7167_v33 }
 0x21f   : > { %5877 = vmatprep.subr.bf16.mxu0 %v11665_v58  ;;  %2734 = vrot.lane.b32.xlu1 %v9636_v39, %s7633_s5  ;;  %v11683_v58 = vpack.c.bf16 %v11681_v61, %v11682_v37  ;;  %v11378_v32 = vunpack.i.l.bf16 %v9959_v41  ;;  %v11691_v61 = vld [vmem:[#allocation134_spill] sm:$0xff] }
 0x220   : > { %5831 = vmatpush1.bf16.msra.mxu1 %v11668_v25  ;;  %2582 = vrot.lane.b32.xlu0 %v9636_v39, %s7632_s4  ;;  %v2293_v25 = vsel %vm2286_vm15, %v7121_v12, %v7122_v11  ;;  %v10033_v12 = vpack.i.bf16 %v10000_v20, %v9949_v45  ;;  %v2446_v39 = vsel %vm2438_vm14, %v7127_v3, %v7236_v40 }
 0x221   : > { %5833 = vmatprep.subr.bf16.mxu1 %v11671_v31  ;;  %v9978_v16 = vpop.permute.xlu1 %7264  ;;  %v11684_v31 = vld [vmem:[#allocation80_spill] sm:$0xff]  ;;  %v2597_v3 = vsel %vm2590_vm1, %v7141_v63, %v7142_v57  ;;  %v2598_v8 = vsel %vm2590_vm1, %v7142_v57, %v11378_v32  ;;  %v7207_v57 = vunpack.i.h.bf16 %v9806_v2  ;;  %v11709_v32 = vld [vmem:[#allocation171_spill] sm:$0xff] }
 0x222   : > { %5879 = vmatpush1.bf16.msra.mxu0 %v11674_v0  ;;  %v9985_v19 = vpop.permute.xlu0 %7259  ;;  %v11686_v44 = vpack.c.bf16 %v11684_v31, %v11685_v26  ;;  %v7187_v31 = vunpack.i.h.bf16 %v9748_v1  ;;  %v7182_v26 = vunpack.i.h.bf16 %v9754_v4  ;;  %v11699_v63 = vld [vmem:[#allocation148_spill] sm:$0xff] }
 0x223   : > { %5881 = vmatprep.subr.bf16.mxu0 %v11677_v28  ;;  %7474 = vrot.lane.b32.xlu1 %v9968_v38, %s7635_s7  ;;  %v11689_v28 = vpack.c.bf16 %v11687_v52, %v11688_v15  ;;  %v11693_v52 = vld [vmem:[#allocation177_spill] sm:$0xff]  ;;  %v11694_v15 = vld [vmem:[#allocation168_spill] sm:$0xff] }
 0x224   : > { %5835 = vmatpush1.bf16.msra.mxu1 %v11680_v30  ;;  %7469 = vrot.lane.b32.xlu0 %v9968_v38, %s7634_s6  ;;  %v11690_v30 = vld [vmem:[#allocation141_spill] sm:$0xff] }
 0x225   : > { %5837 = vmatprep.subr.bf16.mxu1 %v11683_v58  ;;  %v10005_v7 = vpop.permute.xlu1 %7274  ;;  %v11692_v37 = vpack.c.bf16 %v11690_v30, %v11691_v61  ;;  %v2294_v58 = vsel %vm2286_vm15, %v7122_v11, %v7231_v6  ;;  %v5846_v30 = vpack.c.bf16 %v2445_v53, %v2293_v25  ;;  %v2749_v61 = vsel %vm2742_vm2, %v7146_v54, %v7147_v56  ;;  %v11700_v53 = vld [vmem:[#allocation139_spill] sm:$0xff] }
 0x226   : > { %5883 = vmatpush1.bf16.msra.mxu0 %v11686_v44  ;;  %v10018_v0 = vpop.permute.xlu0 %7269  ;;  %v7237_v44 = vunpack.i.h.bf16 %v9907_v13  ;;  %v11380_v11 = vunpack.i.l.bf16 %v9931_v49  ;;  %v11696_v13 = vld [vmem:[#allocation111_spill] sm:$0xff]  ;;  %v7232_v54 = vunpack.i.h.bf16 %v9911_v29  ;;  %v11701_v25 = vpack.c.bf16 %v11699_v63, %v11700_v53  ;;  %v11706_v53 = vld [vmem:[#allocation133_spill] sm:$0xff] }
 0x227   : > { %5885 = vmatprep.subr.bf16.mxu0 %v11689_v28  ;;  %3038 = vrot.lane.b32.xlu1 %v10000_v20, %s7635_s7  ;;  %v11695_v28 = vpack.c.bf16 %v11693_v52, %v11694_v15  ;;  %v11698_v50 = vpack.c.bf16 %v11696_v13, %v11697_v10  ;;  %v7276_v18 = vunpack.i.l.bf16 %v10005_v7  ;;  %v11381_v55 = vunpack.i.l.bf16 %v10018_v0  ;;  %v11702_v10 = vld [vmem:[#allocation173_spill] sm:$0xff]  ;;  %v11703_v15 = vld [vmem:[#allocation167_spill] sm:$0xff] }
 0x228   : > { %5839 = vmatpush1.bf16.msra.mxu1 %v11692_v37  ;;  %2886 = vrot.lane.b32.xlu0 %v10000_v20, %s7634_s6  ;;  %v11379_v37 = vunpack.i.l.bf16 %v9933_v23  ;;  %v11704_v27 = vpack.c.bf16 %v11702_v10, %v11703_v15  ;;  %v2750_v29 = vsel %vm2742_vm2, %v7147_v56, %v7256_v46  ;;  %v7266_v13 = vunpack.i.l.bf16 %v9978_v16 }
 0x229   : > { %5841 = vmatprep.subr.bf16.mxu1 %v11695_v28  ;;  %v10050_v36 = vpop.permute.xlu1 %7284  ;;  %v2447_v28 = vsel %vm2438_vm14, %v7236_v40, %v7237_v44  ;;  %v7261_v63 = vunpack.i.l.bf16 %v9985_v19  ;;  %v2448_v40 = vsel %vm2438_vm14, %v7237_v44, %v11380_v11  ;;  %v7257_v15 = vunpack.i.h.bf16 %v9954_v59  ;;  %v11712_v11 = vld [vmem:[#allocation166_spill] sm:$0xff] }
 0x22a   : > { %5887 = vmatpush1.bf16.msra.mxu0 %v11698_v50  ;;  %v10063_v52 = vpop.permute.xlu0 %7279  ;;  %v5844_v50 = vpack.c.bf16 %v2446_v39, %v2294_v58  ;;  %v10099_v58 = vsel %vm3350_vm6, %v7186_v35, %v7187_v31  ;;  %v10106_v39 = vsel %vm3198_vm5, %v7181_v5, %v7182_v26  ;;  %v11705_v35 = vld [vmem:[#allocation146_spill] sm:$0xff]  ;;  %v2296_v5 = vsel %vm2286_vm15, %v7232_v54, %v11379_v37 }
 0x22b   : > { %5889 = vmatprep.subr.bf16.mxu0 %v11701_v25  ;;  %7484 = vrot.lane.b32.xlu1 %v9968_v38, %s7637_s13  ;;  %v11707_v25 = vpack.c.bf16 %v11705_v35, %v11706_v53  ;;  %v11710_v35 = vpack.c.bf16 %v11708_v47, %v11709_v32  ;;  %v5848_v53 = vpack.c.bf16 %v2750_v29, %v2598_v8  ;;  %v7286_v29 = vunpack.i.l.bf16 %v10050_v36 }
 0x22c   : > { %5843 = vmatpush1.bf16.msra.mxu1 %v11704_v27  ;;  %7479 = vrot.lane.b32.xlu0 %v9968_v38, %s7636_s8  ;;  %v7252_v27 = vunpack.i.h.bf16 %v9959_v41  ;;  %v3054_v47 = vsel %vm3046_vm4, %v7167_v33, %v7276_v18  ;;  %v5896_v32 = vpack.c.bf16 %v2448_v40, %v2296_v5  ;;  %v5854_v8 = vpack.c.bf16 %v10068_v62, %v10073_v51 }
 0x22d   : > { %5845 = vmatprep.subr.bf16.mxu1 %v5844_v50  ;;  %v10110_v56 = vpop.permute.xlu1 %7294  ;;  %v2295_v50 = vsel %vm2286_vm15, %v7231_v6, %v7232_v54  ;;  %v2902_v6 = vsel %vm2894_vm3, %v7162_v43, %v11381_v55  ;;  %v5850_v54 = vpack.c.bf16 %v2749_v61, %v2597_v3  ;;  %v11711_v43 = vld [vmem:[#allocation176_spill] sm:$0xff]  ;;  %v2752_v3 = vsel %vm2742_vm2, %v7257_v15, %v7266_v13 }
 0x22e   : > { %5891 = vmatpush1.bf16.msra.mxu0 %v11707_v25  ;;  %v10117_v10 = vpop.permute.xlu0 %7289  ;;  %v7296_v25 = vunpack.i.l.bf16 %v10110_v56  ;;  %v11713_v55 = vpack.c.bf16 %v11711_v43, %v11712_v11  ;;  %v2600_v61 = vsel %vm2590_vm1, %v7252_v27, %v7261_v63  ;;  %v10167_v62 = vsel %vm3654_vm8, %v7206_v60, %v7207_v57 }
 0x22f   : > { %5893 = vmatprep.subr.bf16.mxu0 %v11710_v35  ;;  %3342 = vrot.lane.b32.xlu1 %v10000_v20, %s7637_s13  ;;  %v7291_v37 = vunpack.i.l.bf16 %v10117_v10  ;;  %v7281_v35 = vunpack.i.l.bf16 %v10063_v52  ;;  %v7202_v11 = vunpack.i.h.bf16 %v9810_v17  ;;  %v5852_v51 = vpack.c.bf16 %v3054_v47, %v2902_v6 }
 0x230   : > { %5847 = vmatpush1.bf16.msra.mxu1 %v5846_v30  ;;  %3190 = vrot.lane.b32.xlu0 %v10000_v20, %s7636_s8  ;;  %v5858_v30 = vpack.c.bf16 %v10099_v58, %v10106_v39  ;;  %v7277_v58 = vunpack.i.h.bf16 %v10005_v7  ;;  %v7272_v39 = vunpack.i.h.bf16 %v10018_v0  ;;  %v2751_v5 = vsel %vm2742_vm2, %v7256_v46, %v7257_v15 }
 0x231   : > { %5849 = vmatprep.subr.bf16.mxu1 %v5848_v53  ;;  %v10143_v44 = vpop.permute.xlu1 %7304  ;;  %v3206_v60 = vsel %vm3198_vm5, %v7182_v26, %v7291_v37  ;;  %v11714_v40 = vunpack.i.l.bf16 %v9959_v41  ;;  %v5900_v4 = vpack.c.bf16 %v2752_v3, %v2600_v61  ;;  %v11715_v46 = vunpack.i.l.bf16 %v9810_v17 }
 0x232   : > { %5895 = vmatpush1.bf16.msra.mxu0 %v11713_v55  ;;  %v10154_v33 = vpop.permute.xlu0 %7299  ;;  %v5898_v55 = vpack.c.bf16 %v2447_v28, %v2295_v50  ;;  %v3358_v28 = vsel %vm3350_vm6, %v7187_v31, %v7296_v25  ;;  %v7306_v53 = vunpack.i.l.bf16 %v10143_v44  ;;  %v2904_v59 = vsel %vm2894_vm3, %v7272_v39, %v7281_v35 }
 0x233   : > { %5897 = vmatprep.subr.bf16.mxu0 %v5896_v32  ;;  %7494 = vrot.lane.b32.xlu1 %v10029_v22, %s7639_s15  ;;  %v2599_v50 = vsel %vm2590_vm1, %v11714_v40, %v7252_v27  ;;  %v11393_v26 = vunpack.i.l.bf16 %v10154_v33  ;;  %v3056_v41 = vsel %vm3046_vm4, %v7277_v58, %v7286_v29  ;;  %v3509_v31 = vsel %vm3502_vm7, %v11715_v46, %v7202_v11 }
 0x234   : > { %5851 = vmatpush1.bf16.msra.mxu1 %v5850_v54  ;;  %7489 = vrot.lane.b32.xlu0 %v10029_v22, %s7638_s14  ;;  %v7297_v15 = vunpack.i.h.bf16 %v10110_v56  ;;  %v5856_v32 = vpack.c.bf16 %v3358_v28, %v3206_v60  ;;  %v3055_v54 = vsel %vm3046_vm4, %v7276_v18, %v7277_v58  ;;  %v7292_v43 = vunpack.i.h.bf16 %v10117_v10 }
 0x235   : > { %5853 = vmatprep.subr.bf16.mxu1 %v5852_v51  ;;  %v7315_v6 = vpop.permute.xlu1 %7314  ;;  %v5902_v17 = vpack.c.bf16 %v2751_v5, %v2599_v50  ;;  %v11716_v3 = vunpack.i.l.bf16 %v10018_v0  ;;  %v7222_v28 = vunpack.i.h.bf16 %v9852_v9  ;;  %v5862_v46 = vpack.c.bf16 %v10167_v62, %v3509_v31 }
 0x236   : > { %5899 = vmatpush1.bf16.msra.mxu0 %v5898_v55  ;;  %v7316_v47 = vunpack.i.l.bf16 %v7315_v6  ;;  %v7310_v1 = vpop.permute.xlu0 %7309  ;;  %v5904_v55 = vpack.c.bf16 %v3056_v41, %v2904_v59  ;;  %v7317_v58 = vunpack.i.h.bf16 %v7315_v6  ;;  %v3208_v0 = vsel %vm3198_vm5, %v7292_v43, %v11393_v26  ;;  %v11785_v26 = vld [vmem:[#allocation170_spill] sm:$0xff] }
 0x237   : > { %5901 = vmatprep.subr.bf16.mxu0 %v5900_v4  ;;  %v7311_v27 = vunpack.i.l.bf16 %v7310_v1  ;;  %7504 = vrot.lane.b32.xlu1 %v10033_v12, %s7639_s15  ;;  %v2903_v51 = vsel %vm2894_vm3, %v11716_v3, %v7272_v39  ;;  %v7227_v39 = vunpack.i.h.bf16 %v9848_v34  ;;  %v3359_v4 = vsel %vm3350_vm6, %v7296_v25, %v7297_v15 }
 0x238   : > { %5855 = vmatpush1.bf16.msra.mxu1 %v5854_v8  ;;  %7499 = vrot.lane.b32.xlu0 %v10033_v12, %s7638_s14  ;;  %v3662_v61 = vsel %vm3654_vm8, %v7207_v57, %v7316_v47  ;;  %v3360_v8 = vsel %vm3350_vm6, %v7297_v15, %v7306_v53  ;;  %v5906_v40 = vpack.c.bf16 %v3055_v54, %v2903_v51  ;;  %v11717_v56 = vunpack.i.l.bf16 %v9848_v34  ;;  %v11719_v54 = vld [vmem:[#allocation6_spill] sm:$0xff]  ;;  %v4037_v51 = vld [vmem:[%s7684_s16 + $0xa0] sm:$0xff] }
 0x239   : > { %5857 = vmatprep.subr.bf16.mxu1 %v5856_v32  ;;  %v10218_v7 = vpop.permute.xlu1 %7324  ;;  %v3510_v18 = vsel %vm3502_vm7, %v7202_v11, %v7311_v27  ;;  %v7312_v11 = vunpack.i.h.bf16 %v7310_v1  ;;  %v3207_v6 = vsel %vm3198_vm5, %v7291_v37, %v7292_v43  ;;  %v5908_v1 = vpack.c.bf16 %v3360_v8, %v3208_v0 }
 0x23a   : > { %5903 = vmatpush1.bf16.msra.mxu0 %v5902_v17  ;;  %v11390_v2 = vunpack.i.l.bf16 %v10218_v7  ;;  %v10225_v60 = vpop.permute.xlu0 %7319  ;;  %v5860_v57 = vpack.c.bf16 %v3662_v61, %v3510_v18  ;;  %v3965_v25 = vsel %vm3958_vm11, %v11717_v56, %v7227_v39  ;;  %v11718_v10 = vunpack.i.l.bf16 %v9852_v9 }
 0x23b   : > { %5905 = vmatprep.subr.bf16.mxu0 %v5904_v55  ;;  %v11389_v5 = vunpack.i.l.bf16 %v10225_v60  ;;  %7514 = vrot.lane.b32.xlu1 %v10029_v22, %s7641_s18  ;;  %v6306_v43 = vunpack.i.l.bf16 %v11719_v54  ;;  %v3663_v17 = vsel %vm3654_vm8, %v7316_v47, %v7317_v58  ;;  %v5910_v34 = vpack.c.bf16 %v3359_v4, %v3207_v6  ;;  %v11720_v4 = vld [vmem:[#allocation5_spill] sm:$0xff] }
 0x23c   : > { %5859 = vmatpush1.bf16.msra.mxu1 %v5858_v30  ;;  %7509 = vrot.lane.b32.xlu0 %v10029_v22, %s7640_s17  ;;  %v3664_v50 = vsel %vm3654_vm8, %v7317_v58, %v11390_v2  ;;  %v3813_v37 = vsel %vm3806_vm9, %v11718_v10, %v7222_v28  ;;  %v3511_v62 = vsel %vm3502_vm7, %v7311_v27, %v7312_v11  ;;  %v11386_v6 = vunpack.i.l.bf16 %v11720_v4 }
 0x23d   : > { %5861 = vmatprep.subr.bf16.mxu1 %v5860_v57  ;;  %v7335_v59 = vpop.permute.xlu1 %7334  ;;  %v3512_v22 = vsel %vm3502_vm7, %v7312_v11, %v11389_v5  ;;  %v5866_v27 = vpack.c.bf16 %v3965_v25, %v3813_v37  ;;  %v5914_v57 = vpack.c.bf16 %v3663_v17, %v3511_v62  ;;  %v190_v25 = vld [vmem:[%s7684_s16 + $0x50] sm:$0xff]  ;;  %v11722_v62 = vld [vmem:[#allocation27_spill] sm:$0xff] }
 0x23e   : > { %5907 = vmatpush1.bf16.msra.mxu0 %v5906_v40  ;;  %v7336_v30 = vunpack.i.l.bf16 %v7335_v59  ;;  %v7330_v41 = vpop.permute.xlu0 %7329  ;;  %v5912_v32 = vpack.c.bf16 %v3664_v50, %v3512_v22  ;;  %v7337_v31 = vunpack.i.h.bf16 %v7335_v59  ;;  %v191_v40 = vld [vmem:[%s7684_s16 + $0x58] sm:$0xff] }
 0x23f   : > { %5909 = vmatprep.subr.bf16.mxu0 %v5908_v1  ;;  %v7331_v15 = vunpack.i.l.bf16 %v7330_v41  ;;  %7524 = vrot.lane.b32.xlu1 %v10033_v12, %s7641_s18  ;;  %v7332_v61 = vunpack.i.h.bf16 %v7330_v41  ;;  %v6307_v1 = vunpack.i.h.bf16 %v11719_v54 }
 0x240   : > { %5863 = vmatpush1.bf16.msra.mxu1 %v5862_v46  ;;  %7519 = vrot.lane.b32.xlu0 %v10033_v12, %s7640_s17  ;;  %v3966_v9 = vsel %vm3958_vm11, %v7227_v39, %v7336_v30  ;;  %v6302_v12 = vunpack.i.h.bf16 %v11639_v48  ;;  %v3967_v39 = vsel %vm3958_vm11, %v7336_v30, %v7337_v31  ;;  %v11721_v30 = vunpack.i.l.bf16 %v11639_v48 }
 0x241   : > { %v10264_v3 = vpop.permute.xlu1 %7344  ;;  %v3814_v55 = vsel %vm3806_vm9, %v7222_v28, %v7331_v15  ;;  %v3815_v28 = vsel %vm3806_vm9, %v7331_v15, %v7332_v61  ;;  %v324_v54 = vsel %vm310_vm0, %v6307_v1, %v11386_v6  ;;  %v323_v17 = vsel %vm310_vm0, %v6306_v43, %v6307_v1 }
 0x242   : > { %5911 = vmatpush1.bf16.msra.mxu0 %v5910_v34  ;;  %v11388_v18 = vunpack.i.l.bf16 %v10264_v3  ;;  %v10269_v47 = vpop.permute.xlu0 %7339  ;;  %v5864_v8 = vpack.c.bf16 %v3966_v9, %v3814_v55  ;;  %v322_v50 = vsel %vm310_vm0, %v6302_v12, %v6306_v43  ;;  %v321_v41 = vsel %vm310_vm0, %v11721_v30, %v6302_v12  ;;  %v192_v9 = vld [vmem:[%s7684_s16 + $0x60] sm:$0xff] }
 0x243   : > { %5913 = vmatprep.subr.bf16.mxu0 %v5912_v32  ;;  %v11387_v58 = vunpack.i.l.bf16 %v10269_v47  ;;  %4098 = vrot.lane.b32.xlu1 %v9946_v14, %s7642_s21  ;;  %v5918_v10 = vpack.c.bf16 %v3967_v39, %v3815_v28  ;;  %v5920_v37 = vpack.c.bf16 %v322_v50, %v191_v40  ;;  %v193_v32 = vld [vmem:[%s7684_s16 + $0x68] sm:$0xff]  ;;  %v5974_v55 = vpack.c.bf16 %v323_v17, %v192_v9  ;;  %v11725_v12 = vld [vmem:[#allocation19_spill] sm:$0xff]  ;;  %v11728_v39 = vld [vmem:[#allocation57_spill] sm:$0xff] }
 0x244   : > { %4096 = vrot.lane.b32.xlu0 %v4037_v51, %s7642_s21  ;;  %5865 = vmatprep.subr.bf16.mxu1 %v5864_v8  ;;  %v3968_v0 = vsel %vm3958_vm11, %v7337_v31, %v11388_v18  ;;  %v11723_v31 = vld [vmem:[#allocation16_spill] sm:$0xff]  ;;  %v5972_v51 = vpack.c.bf16 %v324_v54, %v193_v32  ;;  %v10327_v8 = vld [vmem:[%s11162_s1] sm:$0xff]  ;;  %v11729_v28 = vld [vmem:[#allocation46_spill] sm:$0xff] }
 0x245   : > { %5867 = vmatpush1.bf16.msra.mxu1 %v5866_v27  ;;  %v4083_v11 = vpop.permute.xlu1 %4082  ;;  %v3816_v14 = vsel %vm3806_vm9, %v7332_v61, %v11387_v58  ;;  %v11724_v61 = vpack.c.bf16 %v11722_v62, %v11723_v31  ;;  %v11726_v27 = vld [vmem:[#allocation14_spill] sm:$0xff]  ;;  %v11732_v40 = vld [vmem:[#allocation23_spill] sm:$0xff]  ;;  %v11744_v62 = vld [vmem:[#allocation53_spill] sm:$0xff] }
 0x246   : > { %5915 = vmatpush1.bf16.msra.mxu0 %v5914_v57  ;;  %v4081_v59 = vpop.permute.xlu0 %4080  ;;  %v5916_v22 = vpack.c.bf16 %v3968_v0, %v3816_v14  ;;  %v11727_v57 = vpack.c.bf16 %v11725_v12, %v11726_v27  ;;  %v11731_v14 = vld [vmem:[#allocation28_spill] sm:$0xff]  ;;  %v11740_v17 = vld [vmem:[#allocation87_spill] sm:$0xff]  ;;  %v11743_v9 = vld [vmem:[#allocation58_spill] sm:$0xff] }
 0x247   : > { %v4117_v46 = vsel %vm4110_vm12, %v9890_v24, %v4081_v59  ;;  %4102 = vrot.lane.b32.xlu1 %v10000_v20, %s7642_s21  ;;  %v4118_v56 = vsel %vm4110_vm12, %v4081_v59, %v4083_v11  ;;  %v5922_v24 = vpack.c.bf16 %v321_v41, %v190_v25  ;;  %v11733_v50 = vpack.c.bf16 %v11731_v14, %v11732_v40  ;;  %v11735_v25 = vld [vmem:[#allocation44_spill] sm:$0xff]  ;;  %v11747_v12 = vld [vmem:[#allocation74_spill] sm:$0xff] }
 0x248   : > { %4100 = vrot.lane.b32.xlu0 %v9949_v45, %s7642_s21  ;;  %5012 = vmatprep.subr.mxu1 %v4118_v56  ;;  %v11734_v56 = vld [vmem:[#allocation49_spill] sm:$0xff]  ;;  %v11745_v31 = vpack.c.bf16 %v11743_v9, %v11744_v62  ;;  %v7247_v40 = vunpack.i.h.bf16 %v9931_v49  ;;  %v7262_v9 = vunpack.i.h.bf16 %v9985_v19  ;;  %v7287_v19 = vunpack.i.h.bf16 %v10050_v36 }
 0x249   : > { %5917 = vmatprep.subr.bf16.mxu0 %v5916_v22  ;;  %5013 = vmatpush1.msra.mxu1 %v4117_v46  ;;  %v10299_v48 = vpop.permute.xlu1 %4086 }
 0x24a   : > { %5919 = vmatpush1.bf16.msra.mxu0 %v5918_v10  ;;  %v4085_v15 = vpop.permute.xlu0 %4084  ;;  %5921 = vmatprep.subr.bf16.mxu1 %v5920_v37  ;;  %v11736_v10 = vpack.c.bf16 %v11734_v56, %v11735_v25  ;;  %v11737_v37 = vld [vmem:[#allocation26_spill] sm:$0xff]  ;;  %v11753_v25 = vld [vmem:[#allocation108_spill] sm:$0xff] }
 0x24b   : > { %v4119_v45 = vsel %vm4110_vm12, %v4083_v11, %v4085_v15  ;;  %5025 = vmatmul.mubr.f32.vlgmr.msra.gmra.mrb[2].mxu1 %v9572_v21  ;;  %7534 = vrot.lane.b32.xlu1 %v9968_v38, %s7631_s3  ;;  %v4120_v34 = vsel %vm4110_vm12, %v4085_v15, %v10299_v48  ;;  %v11730_v11 = vpack.c.bf16 %v11728_v39, %v11729_v28  ;;  %v11738_v15 = vld [vmem:[#allocation13_spill] sm:$0xff]  ;;  %v11750_v39 = vld [vmem:[#allocation43_spill] sm:$0xff]  ;;  %v11752_v56 = vld [vmem:[#allocation118_spill] sm:$0xff] }
 0x24c   : > { %5923 = vmatpush1.bf16.msra.mxu1 %v5922_v24  ;;  %7529 = vrot.lane.b32.xlu0 %v9968_v38, %s7630_s30  ;;  %v11739_v24 = vpack.c.bf16 %v11737_v37, %v11738_v15  ;;  %v11755_v37 = vld [vmem:[#allocation88_spill] sm:$0xff]  ;;  %v11756_v15 = vld [vmem:[#allocation83_spill] sm:$0xff] }
 0x24d   : > { %5083 = vmatprep.subr.mxu0 %v4120_v34  ;;  %5925 = vmatprep.subr.bf16.mxu1 %v11724_v61  ;;  %v10318_v43 = vpop.permute.xlu1 %7354 }
 0x24e   : > { %5084 = vmatpush1.msra.mxu0 %v4119_v45  ;;  %v10320_v21 = vpop.permute.xlu0 %7349  ;;  %5652 = vmatprep.mubr.msk.f32.mxu1 %vm4743_vm10, %v9916_v42  ;;  %v11741_v45 = vld [vmem:[#allocation76_spill] sm:$0xff]  ;;  %v7357_v6 = vunpack.i.h.bf16 %v10318_v43 }
 0x24f   : > { %5973 = vmatprep.subr.bf16.mxu0 %v5972_v51  ;;  %5096 = vmatmul.mubr.f32.vlgmr.msra.gmra.mrb[4].mxu0 %v10327_v8  ;;  %v11742_v34 = vpack.c.bf16 %v11740_v17, %v11741_v45  ;;  %v10390_v51 = vld [vmem:[%s7684_s16 + $0xc0] sm:$0xff] }
 0x250   : > { %5927 = vmatpush1.bf16.msra.mxu1 %v11727_v57  ;;  %5975 = vmatpush1.bf16.msra.mxu0 %v5974_v55  ;;  %v10393_v55 = vld [vmem:[%s7684_s16 + $0xc8] sm:$0xff] }
 0x251   : > { %2436 = vrot.lane.b32.xlu1 %v10000_v20, %s7631_s3  ;;  %2284 = vrot.lane.b32.xlu0 %v10000_v20, %s7630_s30  ;;  %v10337_v0 = vpop.permute.xlu1 %7364  ;;  %v11749_v57 = vld [vmem:[#allocation56_spill] sm:$0xff]  ;;  %v10409_v14 = vpack.i.bf16 %v10393_v55, %v10390_v51  ;;  %s6220_s30 = smul.u32 168, %s11946_s9 }
 0x252   : > { %5929 = vmatprep.subr.bf16.mxu1 %v11730_v11  ;;  %5977 = vmatprep.subr.bf16.mxu0 %v11733_v50  ;;  %v11385_v1 = vunpack.i.h.bf16 %v10337_v0  ;;  %v7366_v59 = vunpack.i.l.bf16 %v10337_v0  ;;  %v10347_v22 = vpop.permute.xlu0 %7359  ;;  %v11751_v28 = vpack.c.bf16 %v11749_v57, %v11750_v39  ;;  %v7242_v50 = vunpack.i.h.bf16 %v9933_v23  ;;  %v11758_v57 = vld [vmem:[#allocation110_spill] sm:$0xff]  ;;  %v11759_v39 = vld [vmem:[#allocation105_spill] sm:$0xff] }
 0x253   : > { %v11384_v30 = vunpack.i.h.bf16 %v10347_v22  ;;  %v7361_v41 = vunpack.i.l.bf16 %v10347_v22  ;;  %5653 = vmatprep.mubr.msk.f32.mxu0 %vm4743_vm10, %v9916_v42 }
 0x254   : > { %v10358_v46 = vsel %vm2438_vm14, %v7366_v59, %v11385_v1  ;;  %5931 = vmatpush1.bf16.msra.mxu1 %v11736_v10  ;;  %5979 = vmatpush1.bf16.msra.mxu0 %v11739_v24  ;;  %v11754_v10 = vpack.c.bf16 %v11752_v56, %v11753_v25  ;;  %v11757_v24 = vpack.c.bf16 %v11755_v37, %v11756_v15  ;;  %v11761_v56 = vld [vmem:[#allocation86_spill] sm:$0xff]  ;;  %v11762_v25 = vld [vmem:[#allocation73_spill] sm:$0xff]  ;;  %v11771_v1 = vunpack.i.l.bf16 %v9933_v23 }
 0x255   : > { %v10371_v42 = vsel %vm2286_vm15, %v7361_v41, %v11384_v30  ;;  %7544 = vrot.lane.b32.xlu1 %v9968_v38, %s7633_s5  ;;  %7539 = vrot.lane.b32.xlu0 %v9968_v38, %s7632_s4  ;;  %v10377_v32 = vpop.permute.xlu1 %7374  ;;  %v11746_v38 = vld [vmem:[#allocation79_spill] sm:$0xff]  ;;  %v11775_v23 = vld [vmem:[#allocation117_spill] sm:$0xff] }
 0x256   : > { %5933 = vmatprep.subr.bf16.mxu1 %v11742_v34  ;;  %5981 = vmatprep.subr.bf16.mxu0 %v11745_v31  ;;  %v10387_v61 = vpop.permute.xlu0 %7369  ;;  %v11748_v27 = vpack.c.bf16 %v11746_v38, %v11747_v12  ;;  %v7267_v34 = vunpack.i.h.bf16 %v9978_v16  ;;  %v7356_v38 = vunpack.i.l.bf16 %v10318_v43  ;;  %v7351_v12 = vunpack.i.l.bf16 %v10320_v21  ;;  %v11782_v43 = vld [vmem:[#allocation149_spill] sm:$0xff] }
 0x258   : > { %5935 = vmatpush1.bf16.msra.mxu1 %v11748_v27  ;;  %5983 = vmatpush1.bf16.msra.mxu0 %v11751_v28  ;;  %v11760_v28 = vpack.c.bf16 %v11758_v57, %v11759_v39  ;;  %v11764_v57 = vld [vmem:[#allocation153_spill] sm:$0xff]  ;;  %v11765_v39 = vld [vmem:[#allocation140_spill] sm:$0xff]  ;;  %v2298_v16 = vsel %vm2286_vm15, %v7242_v50, %v7351_v12 }
 0x259   : > { %2740 = vrot.lane.b32.xlu1 %v10000_v20, %s7633_s5  ;;  %2588 = vrot.lane.b32.xlu0 %v10000_v20, %s7632_s4  ;;  %v10405_v11 = vpop.permute.xlu1 %7384  ;;  %s10954_s4 = scalar_lea.vmem %s11163_s2, %s6220_s30 }
 0x25a   : > { %5937 = vmatprep.subr.bf16.mxu1 %v11754_v10  ;;  %5985 = vmatprep.subr.bf16.mxu0 %v11757_v24  ;;  %v11383_v20 = vunpack.i.h.bf16 %v10405_v11  ;;  %v11391_v17 = vunpack.i.l.bf16 %v10405_v11  ;;  %v10421_v45 = vpop.permute.xlu0 %7379  ;;  %v11763_v10 = vpack.c.bf16 %v11761_v56, %v11762_v25  ;;  %v11767_v56 = vld [vmem:[#allocation119_spill] sm:$0xff]  ;;  %v11768_v25 = vld [vmem:[#allocation116_spill] sm:$0xff]  ;;  %v2297_v24 = vsel %vm2286_vm15, %v11771_v1, %v7242_v50 }
 0x25b   : > { %v11382_v62 = vunpack.i.h.bf16 %v10421_v45  ;;  %v11392_v31 = vunpack.i.l.bf16 %v10421_v45  ;;  %v11776_v1 = vld [vmem:[#allocation103_spill] sm:$0xff] }
 0x25c   : > { %v10434_v27 = vsel %vm2742_vm2, %v11391_v17, %v11383_v20  ;;  %5939 = vmatpush1.bf16.msra.mxu1 %v11760_v28  ;;  %5987 = vmatpush1.bf16.msra.mxu0 %v11763_v10  ;;  %v11766_v28 = vpack.c.bf16 %v11764_v57, %v11765_v39  ;;  %v11769_v10 = vpack.c.bf16 %v11767_v56, %v11768_v25  ;;  %v11770_v20 = vunpack.i.l.bf16 %v9931_v49  ;;  %v11772_v56 = vld [vmem:[#allocation145_spill] sm:$0xff] }
 0x25d   : > { %v10447_v37 = vsel %vm2590_vm1, %v11392_v31, %v11382_v62  ;;  %7554 = vrot.lane.b32.xlu1 %v10409_v14, %s7635_s7  ;;  %7549 = vrot.lane.b32.xlu0 %v10409_v14, %s7634_s6  ;;  %v10453_v15 = vpop.permute.xlu1 %7394  ;;  %v10466_v62 = vld [vmem:[%s7684_s16 + $0xd0] sm:$0xff]  ;;  %v10477_v57 = vsel %vm2742_vm2, %v7266_v13, %v7267_v34  ;;  %v10482_v39 = vsel %vm2590_vm1, %v7261_v63, %v7262_v9  ;;  %v7371_v49 = vunpack.i.l.bf16 %v10387_v61 }
 0x25e   : > { %5941 = vmatprep.subr.bf16.mxu1 %v11766_v28  ;;  %5989 = vmatprep.subr.bf16.mxu0 %v11769_v10  ;;  %v10463_v54 = vpop.permute.xlu0 %7389  ;;  %v2449_v30 = vsel %vm2438_vm14, %v11770_v20, %v7247_v40  ;;  %v7376_v28 = vunpack.i.l.bf16 %v10377_v32  ;;  %v11773_v20 = vld [vmem:[#allocation138_spill] sm:$0xff]  ;;  %v11777_v10 = vpack.c.bf16 %v11775_v23, %v11776_v1  ;;  %v2450_v13 = vsel %vm2438_vm14, %v7247_v40, %v7356_v38  ;;  %v11779_v23 = vld [vmem:[#allocation172_spill] sm:$0xff] }
 0x25f   : > { %v11774_v25 = vpack.c.bf16 %v11772_v56, %v11773_v20  ;;  %v7282_v63 = vunpack.i.h.bf16 %v10063_v52  ;;  %v7307_v20 = vunpack.i.h.bf16 %v10143_v44  ;;  %v7352_v40 = vunpack.i.h.bf16 %v10320_v21  ;;  %v11784_v21 = vld [vmem:[#allocation175_spill] sm:$0xff] }
 0x260   : > { %5991 = vmatpush1.bf16.msra.mxu0 %v11777_v10  ;;  %v11781_v10 = vld [vmem:[#allocation154_spill] sm:$0xff]  ;;  %v5948_v5 = vpack.c.bf16 %v2450_v13, %v2298_v16  ;;  %v5950_v2 = vpack.c.bf16 %v2449_v30, %v2297_v24  ;;  %v2452_v17 = vsel %vm2438_vm14, %v7357_v6, %v7366_v59  ;;  %v5954_v31 = vpack.c.bf16 %v10477_v57, %v10482_v39  ;;  %v11792_v16 = vld [vmem:[#allocation184_spill] sm:$0xff]  ;;  %v11793_v13 = vld [vmem:[#allocation179_spill] sm:$0xff] }
 0x261   : > { %5943 = vmatpush1.bf16.msra.mxu1 %v11774_v25  ;;  %3044 = vrot.lane.b32.xlu1 %v10466_v62, %s7635_s7  ;;  %v10501_v56 = vpop.permute.xlu1 %7404  ;;  %v11778_v25 = vld [vmem:[#allocation183_spill] sm:$0xff]  ;;  %v11783_v58 = vpack.c.bf16 %v11781_v10, %v11782_v43  ;;  %v11786_v50 = vpack.c.bf16 %v11784_v21, %v11785_v26  ;;  %v2754_v30 = vsel %vm2742_vm2, %v7267_v34, %v7376_v28  ;;  %v7391_v57 = vunpack.i.l.bf16 %v10463_v54 }
 0x262   : > { %2892 = vrot.lane.b32.xlu0 %v10466_v62, %s7634_s6  ;;  %v11780_v1 = vpack.c.bf16 %v11778_v25, %v11779_v23  ;;  %v10512_v18 = vpop.permute.xlu0 %7399  ;;  %v11787_v25 = vld [vmem:[#allocation152_spill] sm:$0xff]  ;;  %v11788_v23 = vld [vmem:[#allocation137_spill] sm:$0xff]  ;;  %v2300_v59 = vsel %vm2286_vm15, %v7352_v40, %v7361_v41  ;;  %v10537_v26 = vsel %vm3046_vm4, %v7286_v29, %v7287_v19  ;;  %v10542_v24 = vsel %vm2894_vm3, %v7281_v35, %v7282_v63 }
 0x263   : > { %5993 = vmatprep.subr.bf16.mxu0 %v11783_v58  ;;  %v2602_v58 = vsel %vm2590_vm1, %v7262_v9, %v7371_v49  ;;  %v7396_v9 = vunpack.i.l.bf16 %v10453_v15  ;;  %v10557_v36 = vsel %vm3350_vm6, %v7306_v53, %v7307_v20  ;;  %v11790_v52 = vunpack.i.h.bf16 %v10154_v33 }
 0x264   : > { %5945 = vmatprep.subr.bf16.mxu1 %v11780_v1  ;;  %v11789_v1 = vpack.c.bf16 %v11787_v25, %v11788_v23  ;;  %v11791_v29 = vunpack.i.l.bf16 %v10154_v33  ;;  %v7377_v34 = vunpack.i.h.bf16 %v10377_v32  ;;  %v7372_v39 = vunpack.i.h.bf16 %v10387_v61 }
 0x265   : > { %5947 = vmatpush1.bf16.msra.mxu1 %v11786_v50  ;;  %7564 = vrot.lane.b32.xlu1 %v10409_v14, %s7637_s13  ;;  %v10550_v41 = vpop.permute.xlu1 %7414  ;;  %v11794_v50 = vpack.c.bf16 %v11792_v16, %v11793_v13  ;;  %v2451_v53 = vsel %vm2438_vm14, %v7356_v38, %v7357_v6  ;;  %v2299_v43 = vsel %vm2286_vm15, %v7351_v12, %v7352_v40  ;;  %v7406_v23 = vunpack.i.l.bf16 %v10501_v56 }
 0x266   : > { %5995 = vmatpush1.bf16.msra.mxu0 %v11789_v1  ;;  %7559 = vrot.lane.b32.xlu0 %v10409_v14, %s7636_s8  ;;  %v10564_v35 = vsel %vm3198_vm5, %v11791_v29, %v11790_v52  ;;  %v10571_v10 = vpop.permute.xlu0 %7409  ;;  %v5952_v21 = vpack.c.bf16 %v2754_v30, %v2602_v58  ;;  %v6000_v25 = vpack.c.bf16 %v2452_v17, %v2300_v59  ;;  %v7401_v1 = vunpack.i.l.bf16 %v10512_v18  ;;  %v11795_v52 = vld [vmem:[#allocation182_spill] sm:$0xff]  ;;  %v11796_v29 = vld [vmem:[#allocation169_spill] sm:$0xff] }
 0x267   : > { %5949 = vmatprep.subr.bf16.mxu1 %v5948_v5  ;;  %5997 = vmatprep.subr.bf16.mxu0 %v11794_v50  ;;  %v11797_v5 = vpack.c.bf16 %v11795_v52, %v11796_v29  ;;  %v11798_v16 = vunpack.i.l.bf16 %v10421_v45  ;;  %v11799_v50 = vunpack.i.l.bf16 %v10405_v11  ;;  %v7416_v38 = vunpack.i.l.bf16 %v10550_v41 }
 0x268   : > { %v7411_v17 = vunpack.i.l.bf16 %v10571_v10  ;;  %v2906_v12 = vsel %vm2894_vm3, %v7282_v63, %v7391_v57  ;;  %v3058_v40 = vsel %vm3046_vm4, %v7287_v19, %v7396_v9  ;;  %v6002_v58 = vpack.c.bf16 %v2451_v53, %v2299_v43 }
 0x269   : > { %5951 = vmatpush1.bf16.msra.mxu1 %v5950_v2  ;;  %v2604_v13 = vsel %vm2590_vm1, %v7372_v39, %v11798_v16  ;;  %v2756_v6 = vsel %vm2742_vm2, %v7377_v34, %v11799_v50  ;;  %3348 = vrot.lane.b32.xlu1 %v10466_v62, %s7637_s13  ;;  %v10592_v2 = vpop.permute.xlu1 %7424  ;;  %v7397_v30 = vunpack.i.h.bf16 %v10453_v15  ;;  %v7392_v59 = vunpack.i.h.bf16 %v10463_v54 }
 0x26a   : > { %5999 = vmatpush1.bf16.msra.mxu0 %v11797_v5  ;;  %3196 = vrot.lane.b32.xlu0 %v10466_v62, %s7636_s8  ;;  %v10598_v52 = vpop.permute.xlu0 %7419  ;;  %v5958_v29 = vpack.c.bf16 %v10537_v26, %v10542_v24  ;;  %v5962_v5 = vpack.c.bf16 %v10557_v36, %v10564_v35  ;;  %v2755_v63 = vsel %vm2742_vm2, %v7376_v28, %v7377_v34  ;;  %v7327_v54 = vunpack.i.h.bf16 %v10218_v7 }
 0x26b   : > { %5953 = vmatprep.subr.bf16.mxu1 %v5952_v21  ;;  %6001 = vmatprep.subr.bf16.mxu0 %v6000_v25  ;;  %v2603_v15 = vsel %vm2590_vm1, %v7371_v49, %v7372_v39  ;;  %v6004_v19 = vpack.c.bf16 %v2756_v6, %v2604_v13  ;;  %v5956_v53 = vpack.c.bf16 %v3058_v40, %v2906_v12  ;;  %v7426_v28 = vunpack.i.l.bf16 %v10592_v2 }
 0x26c   : > { %v2908_v26 = vsel %vm2894_vm3, %v7392_v59, %v7401_v1  ;;  %v3060_v32 = vsel %vm3046_vm4, %v7397_v30, %v7406_v23  ;;  %v7421_v61 = vunpack.i.l.bf16 %v10598_v52  ;;  %v11800_v49 = vunpack.i.h.bf16 %v10154_v33 }
 0x26d   : > { %5955 = vmatpush1.bf16.msra.mxu1 %v5954_v31  ;;  %7574 = vrot.lane.b32.xlu1 %v10409_v14, %s7639_s15  ;;  %v7435_v31 = vpop.permute.xlu1 %7434  ;;  %v3362_v36 = vsel %vm3350_vm6, %v7307_v20, %v7416_v38  ;;  %v7322_v35 = vunpack.i.h.bf16 %v10225_v60  ;;  %v6006_v34 = vpack.c.bf16 %v2755_v63, %v2603_v15  ;;  %v3059_v39 = vsel %vm3046_vm4, %v7396_v9, %v7397_v30 }
 0x26e   : > { %6003 = vmatpush1.bf16.msra.mxu0 %v6002_v58  ;;  %7569 = vrot.lane.b32.xlu0 %v10409_v14, %s7638_s14  ;;  %v3210_v24 = vsel %vm3198_vm5, %v11800_v49, %v7411_v17  ;;  %v7436_v43 = vunpack.i.l.bf16 %v7435_v31  ;;  %v7430_v21 = vpop.permute.xlu0 %7429  ;;  %v2907_v25 = vsel %vm2894_vm3, %v7391_v57, %v7392_v59  ;;  %v7417_v16 = vunpack.i.h.bf16 %v10550_v41 }
 0x26f   : > { %5957 = vmatprep.subr.bf16.mxu1 %v5956_v53  ;;  %6005 = vmatprep.subr.bf16.mxu0 %v6004_v19  ;;  %v7412_v33 = vunpack.i.h.bf16 %v10571_v10  ;;  %v7431_v13 = vunpack.i.l.bf16 %v7430_v21  ;;  %v5960_v44 = vpack.c.bf16 %v3362_v36, %v3210_v24  ;;  %v6008_v20 = vpack.c.bf16 %v3060_v32, %v2908_v26 }
 0x270   : > { %v3666_v50 = vsel %vm3654_vm8, %v7327_v54, %v7436_v43  ;;  %v3364_v10 = vsel %vm3350_vm6, %v7417_v16, %v7426_v28  ;;  %v11801_v6 = vunpack.i.l.bf16 %v10218_v7  ;;  %v6010_v40 = vpack.c.bf16 %v3059_v39, %v2907_v25 }
 0x271   : > { %5959 = vmatpush1.bf16.msra.mxu1 %v5958_v29  ;;  %3652 = vrot.lane.b32.xlu1 %v10466_v62, %s7639_s15  ;;  %v10639_v9 = vpop.permute.xlu1 %3638  ;;  %v3514_v57 = vsel %vm3502_vm7, %v7322_v35, %v7431_v13  ;;  %v3212_v41 = vsel %vm3198_vm5, %v7412_v33, %v7421_v61  ;;  %v7437_v58 = vunpack.i.h.bf16 %v7435_v31  ;;  %v11802_v29 = vunpack.i.l.bf16 %v10225_v60 }
 0x272   : > { %6007 = vmatpush1.bf16.msra.mxu0 %v6006_v34  ;;  %3500 = vrot.lane.b32.xlu0 %v10466_v62, %s7638_s14  ;;  %v3665_v12 = vsel %vm3654_vm8, %v11801_v6, %v7327_v54  ;;  %v10651_v30 = vpop.permute.xlu0 %3486  ;;  %v5964_v59 = vpack.c.bf16 %v3666_v50, %v3514_v57  ;;  %v3363_v15 = vsel %vm3350_vm6, %v7416_v38, %v7417_v16  ;;  %v7432_v53 = vunpack.i.h.bf16 %v7430_v21 }
 0x273   : > { %5961 = vmatprep.subr.bf16.mxu1 %v5960_v44  ;;  %6009 = vmatprep.subr.bf16.mxu0 %v6008_v20  ;;  %v3513_v63 = vsel %vm3502_vm7, %v11802_v29, %v7322_v35  ;;  %v3211_v19 = vsel %vm3198_vm5, %v7411_v17, %v7412_v33  ;;  %v6012_v7 = vpack.c.bf16 %v3364_v10, %v3212_v41  ;;  %v7347_v54 = vunpack.i.h.bf16 %v10264_v3  ;;  %v11805_v20 = vld [vmem:[#allocation8_spill] sm:$0xff]  ;;  %v11806_v29 = vld [vmem:[#allocation7_spill] sm:$0xff] }
 0x274   : > { %v7342_v26 = vunpack.i.h.bf16 %v10269_v47  ;;  %v3668_v32 = vsel %vm3654_vm8, %v7437_v58, %v10639_v9  ;;  %v3516_v60 = vsel %vm3502_vm7, %v7432_v53, %v10651_v30  ;;  %v5966_v17 = vpack.c.bf16 %v3665_v12, %v3513_v63 }
 0x275   : > { %5963 = vmatpush1.bf16.msra.mxu1 %v5962_v5  ;;  %7584 = vrot.lane.b32.xlu1 %v10409_v14, %s7641_s18  ;;  %v7445_v38 = vpop.permute.xlu1 %7444  ;;  %v6014_v5 = vpack.c.bf16 %v3363_v15, %v3211_v19  ;;  %v3667_v31 = vsel %vm3654_vm8, %v7436_v43, %v7437_v58  ;;  %v3515_v36 = vsel %vm3502_vm7, %v7431_v13, %v7432_v53  ;;  %v11804_v43 = vunpack.i.l.bf16 %v10269_v47 }
 0x276   : > { %6011 = vmatpush1.bf16.msra.mxu0 %v6010_v40  ;;  %7579 = vrot.lane.b32.xlu0 %v10409_v14, %s7640_s17  ;;  %v7446_v49 = vunpack.i.l.bf16 %v7445_v38  ;;  %v7440_v24 = vpop.permute.xlu0 %7439  ;;  %v7447_v35 = vunpack.i.h.bf16 %v7445_v38  ;;  %v6016_v21 = vpack.c.bf16 %v3668_v32, %v3516_v60  ;;  %v11803_v14 = vunpack.i.l.bf16 %v10264_v3 }
 0x277   : > { %5965 = vmatprep.subr.bf16.mxu1 %v5964_v59  ;;  %6013 = vmatprep.subr.bf16.mxu0 %v6012_v7  ;;  %v7442_v34 = vunpack.i.h.bf16 %v7440_v24  ;;  %v7441_v39 = vunpack.i.l.bf16 %v7440_v24  ;;  %v3817_v33 = vsel %vm3806_vm9, %v11804_v43, %v7342_v26  ;;  %v6316_v50 = vunpack.i.l.bf16 %v11805_v20 }
 0x278   : > { %v3970_v25 = vsel %vm3958_vm11, %v7347_v54, %v7446_v49  ;;  %v3969_v16 = vsel %vm3958_vm11, %v11803_v14, %v7347_v54  ;;  %v6018_v57 = vpack.c.bf16 %v3667_v31, %v3515_v36  ;;  %v6312_v10 = vunpack.i.h.bf16 %v11720_v4  ;;  %v195_v54 = vld [vmem:[%s7684_s16 + $0x78] sm:$0xff]  ;;  %v197_v31 = vld [vmem:[%s7684_s16 + $0x88] sm:$0xff]  ;;  %v196_v36 = vld [vmem:[%s7684_s16 + $0x80] sm:$0xff] }
 0x279   : > { %5967 = vmatpush1.bf16.msra.mxu1 %v5966_v17  ;;  %3956 = vrot.lane.b32.xlu1 %v10466_v62, %s7641_s18  ;;  %v10681_v13 = vpop.permute.xlu1 %3942  ;;  %v3818_v44 = vsel %vm3806_vm9, %v7342_v26, %v7441_v39  ;;  %v3971_v6 = vsel %vm3958_vm11, %v7446_v49, %v7447_v35  ;;  %v3819_v12 = vsel %vm3806_vm9, %v7441_v39, %v7442_v34  ;;  %v6321_v63 = vunpack.i.l.bf16 %v11806_v29  ;;  %v11808_v39 = vld [vmem:[#allocation33_spill] sm:$0xff] }
 0x27a   : > { %6015 = vmatpush1.bf16.msra.mxu0 %v6014_v5  ;;  %3804 = vrot.lane.b32.xlu0 %v10466_v62, %s7640_s17  ;;  %v3972_v3 = vsel %vm3958_vm11, %v7447_v35, %v10681_v13  ;;  %v10687_v47 = vpop.permute.xlu0 %3790  ;;  %v5968_v41 = vpack.c.bf16 %v3970_v25, %v3818_v44  ;;  %v5970_v58 = vpack.c.bf16 %v3969_v16, %v3817_v33  ;;  %v6317_v15 = vunpack.i.h.bf16 %v11805_v20  ;;  %v10736_v20 = vld [vmem:[%s11162_s1 + $0x8] sm:$0xff] }
 0x27b   : > { %6017 = vmatprep.subr.bf16.mxu0 %v6016_v21  ;;  %v3820_v40 = vsel %vm3806_vm9, %v7442_v34, %v10687_v47  ;;  %v6022_v53 = vpack.c.bf16 %v3971_v6, %v3819_v12  ;;  %v326_v26 = vsel %vm310_vm0, %v6312_v10, %v6316_v50  ;;  %v11807_v32 = vunpack.i.l.bf16 %v11720_v4  ;;  %v11809_v21 = vld [vmem:[#allocation25_spill] sm:$0xff] }
 0x27c   : > { %v6020_v59 = vpack.c.bf16 %v3972_v3, %v3820_v40  ;;  %5969 = vmatprep.subr.bf16.mxu1 %v5968_v41  ;;  %v6024_v5 = vpack.c.bf16 %v326_v26, %v195_v54  ;;  %v328_v4 = vsel %vm310_vm0, %v6317_v15, %v6321_v63  ;;  %v327_v49 = vsel %vm310_vm0, %v6316_v50, %v6317_v15  ;;  %v11811_v50 = vld [vmem:[#allocation24_spill] sm:$0xff]  ;;  %v11814_v41 = vld [vmem:[#allocation34_spill] sm:$0xff] }
 0x27d   : > { %4106 = vrot.lane.b32.xlu1 %v10393_v55, %s7642_s21  ;;  %v4091_v19 = vpop.permute.xlu1 %4090  ;;  %5971 = vmatpush1.bf16.msra.mxu1 %v5970_v58  ;;  %v325_v60 = vsel %vm310_vm0, %v11807_v32, %v6312_v10  ;;  %v6076_v34 = vpack.c.bf16 %v328_v4, %v197_v31  ;;  %v11810_v25 = vpack.c.bf16 %v11808_v39, %v11809_v21  ;;  %v11815_v10 = vld [vmem:[#allocation31_spill] sm:$0xff]  ;;  %v11817_v12 = vunpack.i.h.bf16 %v10337_v0  ;;  %v11822_v26 = vld [vmem:[#allocation32_spill] sm:$0xff]  ;;  %v11829_v31 = vld [vmem:[#allocation61_spill] sm:$0xff] }
 0x27e   : > { %6019 = vmatpush1.bf16.msra.mxu0 %v6018_v57  ;;  %4104 = vrot.lane.b32.xlu0 %v10390_v51, %s7642_s21  ;;  %v4089_v7 = vpop.permute.xlu0 %4088  ;;  %v194_v51 = vld [vmem:[%s7684_s16 + $0x70] sm:$0xff]  ;;  %v6078_v16 = vpack.c.bf16 %v327_v49, %v196_v36  ;;  %v11812_v57 = vld [vmem:[#allocation18_spill] sm:$0xff]  ;;  %v11816_v6 = vpack.c.bf16 %v11814_v41, %v11815_v10  ;;  %v11818_v58 = vld [vmem:[#allocation63_spill] sm:$0xff]  ;;  %v11843_v10 = vunpack.i.h.bf16 %v10405_v11 }
 0x27f   : > { %6021 = vmatprep.subr.bf16.mxu0 %v6020_v59  ;;  %v4121_v55 = vsel %vm4110_vm12, %v10299_v48, %v4089_v7  ;;  %v4122_v38 = vsel %vm4110_vm12, %v4089_v7, %v4091_v19  ;;  %v6026_v24 = vpack.c.bf16 %v325_v60, %v194_v51  ;;  %v11813_v3 = vpack.c.bf16 %v11811_v50, %v11812_v57  ;;  %v11819_v59 = vld [vmem:[#allocation55_spill] sm:$0xff]  ;;  %v11832_v49 = vld [vmem:[#allocation85_spill] sm:$0xff]  ;;  %v11840_v57 = vld [vmem:[#allocation94_spill] sm:$0xff] }
 0x280   : > { %5154 = vmatprep.subr.mxu1 %v4122_v38  ;;  %v11820_v15 = vpack.c.bf16 %v11818_v58, %v11819_v59  ;;  %v11823_v32 = vld [vmem:[#allocation35_spill] sm:$0xff]  ;;  %v11826_v38 = vld [vmem:[#allocation48_spill] sm:$0xff]  ;;  %v11835_v39 = vld [vmem:[#allocation65_spill] sm:$0xff] }
 0x281   : > { %v10711_v17 = vpop.permute.xlu1 %4094  ;;  %5155 = vmatpush1.msra.mxu1 %v4121_v55  ;;  %v11824_v60 = vpack.c.bf16 %v11822_v26, %v11823_v32  ;;  %v11825_v55 = vld [vmem:[#allocation54_spill] sm:$0xff]  ;;  %v11848_v32 = vld [vmem:[#allocation92_spill] sm:$0xff]  ;;  %v11851_v11 = vld [vmem:[#allocation115_spill] sm:$0xff] }
 0x282   : > { %6023 = vmatpush1.bf16.msra.mxu0 %v6022_v53  ;;  %4108 = vrot.lane.b32.xlu0 %v10466_v62, %s7642_s21  ;;  %v4093_v48 = vpop.permute.xlu0 %4092  ;;  %v11821_v53 = vunpack.i.h.bf16 %v10347_v22  ;;  %v11827_v51 = vpack.c.bf16 %v11825_v55, %v11826_v38  ;;  %v11831_v22 = vld [vmem:[#allocation93_spill] sm:$0xff]  ;;  %v11852_v38 = vld [vmem:[#allocation114_spill] sm:$0xff] }
 0x283   : > { %v4123_v35 = vsel %vm4110_vm12, %v4091_v19, %v4093_v48  ;;  %6025 = vmatprep.subr.bf16.mxu1 %v6024_v5  ;;  %5167 = vmatmul.mubr.f32.vlgmr.msra.gmra.mrb[4].mxu1 %v10327_v8  ;;  %v4124_v62 = vsel %vm4110_vm12, %v4093_v48, %v10711_v17  ;;  %v11828_v5 = vld [vmem:[#allocation64_spill] sm:$0xff]  ;;  %v11833_v48 = vpack.c.bf16 %v11831_v22, %v11832_v49  ;;  %v11857_v22 = vld [vmem:[#allocation159_spill] sm:$0xff] }
 0x284   : > { %6027 = vmatpush1.bf16.msra.mxu1 %v6026_v24  ;;  %5225 = vmatprep.subr.mxu0 %v4124_v62  ;;  %v11830_v4 = vpack.c.bf16 %v11828_v5, %v11829_v31  ;;  %v11854_v5 = vld [vmem:[#allocation126_spill] sm:$0xff]  ;;  %v11855_v31 = vld [vmem:[#allocation125_spill] sm:$0xff]  ;;  %v11858_v49 = vld [vmem:[#allocation151_spill] sm:$0xff] }
 0x285   : > { %6029 = vmatprep.subr.bf16.mxu1 %v11810_v25  ;;  %v10726_v14 = vpop.permute.xlu1 %7454  ;;  %5654 = vmatprep.mubr.msk.f32.mxu1 %vm4743_vm10, %v10736_v20  ;;  %v11837_v25 = vld [vmem:[#allocation84_spill] sm:$0xff] }
 0x286   : > { %5226 = vmatpush1.msra.mxu0 %v4123_v35  ;;  %v7456_v43 = vunpack.i.l.bf16 %v10726_v14  ;;  %v10729_v33 = vpop.permute.xlu0 %7449 }
 0x287   : > { %6077 = vmatprep.subr.bf16.mxu0 %v6076_v34  ;;  %5238 = vmatmul.mubr.f32.vlgmr.msra.gmra.mrb[6].mxu0 %v10327_v8  ;;  %v7451_v44 = vunpack.i.l.bf16 %v10729_v33  ;;  %v11834_v34 = vld [vmem:[#allocation62_spill] sm:$0xff] }
 0x288   : > { %6079 = vmatpush1.bf16.msra.mxu0 %v6078_v16  ;;  %6031 = vmatpush1.bf16.msra.mxu1 %v11813_v3  ;;  %v2454_v40 = vsel %vm2438_vm14, %v11817_v12, %v7456_v43  ;;  %v11836_v21 = vpack.c.bf16 %v11834_v34, %v11835_v39  ;;  %v11838_v16 = vld [vmem:[#allocation78_spill] sm:$0xff]  ;;  %v11841_v3 = vld [vmem:[#allocation91_spill] sm:$0xff]  ;;  %v11844_v12 = vld [vmem:[#allocation124_spill] sm:$0xff] }
 0x289   : > { %6081 = vmatprep.subr.bf16.mxu0 %v11816_v6  ;;  %6033 = vmatprep.subr.bf16.mxu1 %v11820_v15  ;;  %v10754_v19 = vpop.permute.xlu1 %2430  ;;  %v2302_v7 = vsel %vm2286_vm15, %v11821_v53, %v7451_v44  ;;  %v11839_v50 = vpack.c.bf16 %v11837_v25, %v11838_v16  ;;  %v11842_v41 = vpack.c.bf16 %v11840_v57, %v11841_v3  ;;  %v11847_v15 = vunpack.i.h.bf16 %v10421_v45  ;;  %v11860_v39 = vld [vmem:[#allocation123_spill] sm:$0xff]  ;;  %v11864_v57 = vld [vmem:[#allocation144_spill] sm:$0xff] }
 0x28a   : > { %5655 = vmatprep.mubr.msk.f32.mxu0 %vm4743_vm10, %v10736_v20  ;;  %v10763_v54 = vpop.permute.xlu0 %2278  ;;  %v6052_v0 = vpack.c.bf16 %v2454_v40, %v2302_v7  ;;  %v11845_v40 = vld [vmem:[#allocation122_spill] sm:$0xff]  ;;  %v11859_v45 = vpack.c.bf16 %v11857_v22, %v11858_v49  ;;  %v7407_v16 = vunpack.i.h.bf16 %v10501_v56  ;;  %v7427_v56 = vunpack.i.h.bf16 %v10592_v2 }
 0x28b   : > { %v11846_v58 = vpack.c.bf16 %v11844_v12, %v11845_v40  ;;  %v7402_v12 = vunpack.i.h.bf16 %v10512_v18  ;;  %v7457_v40 = vunpack.i.h.bf16 %v10726_v14  ;;  %v11882_v14 = vld [vmem:[#allocation191_spill] sm:$0xff] }
 0x28c   : > { %6083 = vmatpush1.bf16.msra.mxu0 %v11824_v60  ;;  %6035 = vmatpush1.bf16.msra.mxu1 %v11827_v51  ;;  %v11849_v60 = vld [vmem:[#allocation95_spill] sm:$0xff]  ;;  %v11853_v51 = vpack.c.bf16 %v11851_v11, %v11852_v38 }
 0x28d   : > { %6085 = vmatprep.subr.bf16.mxu0 %v11830_v4  ;;  %6037 = vmatprep.subr.bf16.mxu1 %v11833_v48  ;;  %v7465_v24 = vpop.permute.xlu1 %7464  ;;  %v11850_v55 = vpack.c.bf16 %v11848_v32, %v11849_v60  ;;  %v11856_v4 = vpack.c.bf16 %v11854_v5, %v11855_v31  ;;  %v2456_v11 = vsel %vm2438_vm14, %v7457_v40, %v10754_v19  ;;  %v11873_v5 = vld [vmem:[#allocation161_spill] sm:$0xff] }
 0x28e   : > { %v7466_v36 = vunpack.i.l.bf16 %v7465_v24  ;;  %v10777_v35 = vpop.permute.xlu0 %7459 }
 0x28f   : > { %v7461_v62 = vunpack.i.l.bf16 %v10777_v35 }
 0x290   : > { %6087 = vmatpush1.bf16.msra.mxu0 %v11836_v21  ;;  %6039 = vmatpush1.bf16.msra.mxu1 %v11839_v50  ;;  %v2758_v6 = vsel %vm2742_vm2, %v11843_v10, %v7466_v36  ;;  %v11861_v21 = vld [vmem:[#allocation120_spill] sm:$0xff]  ;;  %v11863_v50 = vld [vmem:[#allocation150_spill] sm:$0xff]  ;;  %v11867_v10 = vld [vmem:[#allocation157_spill] sm:$0xff] }
 0x291   : > { %6089 = vmatprep.subr.bf16.mxu0 %v11842_v41  ;;  %6041 = vmatprep.subr.bf16.mxu1 %v11846_v58  ;;  %v10795_v59 = vpop.permute.xlu1 %2734  ;;  %v2606_v53 = vsel %vm2590_vm1, %v11847_v15, %v7461_v62  ;;  %v11862_v25 = vpack.c.bf16 %v11860_v39, %v11861_v21  ;;  %v11865_v3 = vpack.c.bf16 %v11863_v50, %v11864_v57  ;;  %v11866_v41 = vld [vmem:[#allocation160_spill] sm:$0xff]  ;;  %v7452_v58 = vunpack.i.h.bf16 %v10729_v33  ;;  %v11869_v15 = vld [vmem:[#allocation189_spill] sm:$0xff]  ;;  %v11876_v39 = vld [vmem:[#allocation174_spill] sm:$0xff] }
 0x292   : > { %v10800_v7 = vpop.permute.xlu0 %2582  ;;  %v6056_v26 = vpack.c.bf16 %v2758_v6, %v2606_v53  ;;  %v11868_v6 = vpack.c.bf16 %v11866_v41, %v11867_v10  ;;  %v11870_v53 = vld [vmem:[#allocation181_spill] sm:$0xff]  ;;  %v11879_v50 = vld [vmem:[#allocation187_spill] sm:$0xff]  ;;  %v7462_v41 = vunpack.i.h.bf16 %v10777_v35 }
 0x293   : > { %v11871_v32 = vpack.c.bf16 %v11869_v15, %v11870_v53  ;;  %v2304_v38 = vsel %vm2286_vm15, %v7452_v58, %v10763_v54  ;;  %v2455_v15 = vsel %vm2438_vm14, %v7456_v43, %v7457_v40  ;;  %v2303_v53 = vsel %vm2286_vm15, %v7451_v44, %v7452_v58 }
 0x294   : > { %6091 = vmatpush1.bf16.msra.mxu0 %v11850_v55  ;;  %6043 = vmatpush1.bf16.msra.mxu1 %v11853_v51  ;;  %v11872_v51 = vld [vmem:[#allocation158_spill] sm:$0xff]  ;;  %v6104_v18 = vpack.c.bf16 %v2456_v11, %v2304_v38  ;;  %v11884_v44 = vpack.c.bf16 %v10358_v46, %v10371_v42  ;;  %v6106_v11 = vpack.c.bf16 %v2455_v15, %v2303_v53 }
 0x295   : > { %6093 = vmatprep.subr.bf16.mxu0 %v11856_v4  ;;  %6045 = vmatprep.subr.bf16.mxu1 %v11859_v45  ;;  %v10814_v48 = vpop.permute.xlu1 %7474  ;;  %v11874_v31 = vpack.c.bf16 %v11872_v51, %v11873_v5  ;;  %v10848_v4 = vsel %vm3046_vm4, %v7406_v23, %v7407_v16  ;;  %v11875_v45 = vld [vmem:[#allocation180_spill] sm:$0xff]  ;;  %v7467_v23 = vunpack.i.h.bf16 %v7465_v24  ;;  %v2608_v24 = vsel %vm2590_vm1, %v7462_v41, %v10800_v7 }
 0x296   : > { %v10816_v34 = vpop.permute.xlu0 %7469  ;;  %v7476_v22 = vunpack.i.l.bf16 %v10814_v48  ;;  %v11877_v21 = vpack.c.bf16 %v11875_v45, %v11876_v39  ;;  %v11881_v51 = vld [vmem:[#allocation188_spill] sm:$0xff]  ;;  %v2607_v38 = vsel %vm2590_vm1, %v7461_v62, %v7462_v41 }
 0x297   : > { %v7471_v49 = vunpack.i.l.bf16 %v10816_v34  ;;  %v7472_v35 = vunpack.i.h.bf16 %v10816_v34  ;;  %v11883_v5 = vpack.c.bf16 %v11881_v51, %v11882_v14 }
 0x298   : > { %6095 = vmatpush1.bf16.msra.mxu0 %v11862_v25  ;;  %6047 = vmatpush1.bf16.msra.mxu1 %v11865_v3  ;;  %v11878_v25 = vld [vmem:[#allocation190_spill] sm:$0xff]  ;;  %v2909_v3 = vsel %vm2894_vm3, %v7401_v1, %v7402_v12  ;;  %v2760_v1 = vsel %vm2742_vm2, %v7467_v23, %v10795_v59  ;;  %v3062_v58 = vsel %vm3046_vm4, %v7407_v16, %v7476_v22 }
 0x299   : > { %6097 = vmatprep.subr.bf16.mxu0 %v11868_v6  ;;  %6049 = vmatprep.subr.bf16.mxu1 %v11871_v32  ;;  %v10834_v60 = vpop.permute.xlu1 %3038  ;;  %v11880_v57 = vpack.c.bf16 %v11878_v25, %v11879_v50  ;;  %v7422_v6 = vunpack.i.h.bf16 %v10598_v52  ;;  %v2910_v40 = vsel %vm2894_vm3, %v7402_v12, %v7471_v49  ;;  %v6062_v12 = vpack.c.bf16 %v10848_v4, %v2909_v3 }
 0x29a   : > { %v10836_v55 = vpop.permute.xlu0 %2886  ;;  %v6060_v62 = vpack.c.bf16 %v3062_v58, %v2910_v40  ;;  %v2911_v52 = vsel %vm2894_vm3, %v7471_v49, %v7472_v35 }
 0x29b   : > { %v2912_v46 = vsel %vm2894_vm3, %v7472_v35, %v10836_v55 }
 0x29c   : > { %6099 = vmatpush1.bf16.msra.mxu0 %v11874_v31  ;;  %6051 = vmatpush1.bf16.msra.mxu1 %v11877_v21  ;;  %v6108_v31 = vpack.c.bf16 %v2760_v1, %v2608_v24  ;;  %v11885_v21 = vpack.c.bf16 %v10434_v27, %v10447_v37 }
 0x29d   : > { %6101 = vmatprep.subr.bf16.mxu0 %v11880_v57  ;;  %6053 = vmatprep.subr.bf16.mxu1 %v6052_v0  ;;  %v7485_v10 = vpop.permute.xlu1 %7484  ;;  %v7477_v0 = vunpack.i.h.bf16 %v10814_v48  ;;  %v2759_v48 = vsel %vm2742_vm2, %v7466_v36, %v7467_v23  ;;  %v3365_v36 = vsel %vm3350_vm6, %v7426_v28, %v7427_v56 }
 0x29e   : > { %v7480_v32 = vpop.permute.xlu0 %7479  ;;  %v7486_v43 = vunpack.i.l.bf16 %v7485_v10  ;;  %v7487_v16 = vunpack.i.h.bf16 %v7485_v10  ;;  %v6110_v2 = vpack.c.bf16 %v2759_v48, %v2607_v38 }
 0x29f   : > { %v7481_v33 = vunpack.i.l.bf16 %v7480_v32  ;;  %v3064_v45 = vsel %vm3046_vm4, %v7477_v0, %v10834_v60  ;;  %v7482_v39 = vunpack.i.h.bf16 %v7480_v32  ;;  %v3063_v28 = vsel %vm3046_vm4, %v7476_v22, %v7477_v0 }
 0x2a0   : > { %6103 = vmatpush1.bf16.msra.mxu0 %v11883_v5  ;;  %6055 = vmatpush1.bf16.msra.mxu1 %v11884_v44  ;;  %v3366_v4 = vsel %vm3350_vm6, %v7427_v56, %v7486_v43  ;;  %v6112_v50 = vpack.c.bf16 %v3064_v45, %v2912_v46  ;;  %v6114_v22 = vpack.c.bf16 %v3063_v28, %v2911_v52 }
 0x2a1   : > { %6105 = vmatprep.subr.bf16.mxu0 %v6104_v18  ;;  %6057 = vmatprep.subr.bf16.mxu1 %v6056_v26  ;;  %v10885_v34 = vpop.permute.xlu1 %3342  ;;  %v3213_v26 = vsel %vm3198_vm5, %v7421_v61, %v7422_v6  ;;  %v3214_v25 = vsel %vm3198_vm5, %v7422_v6, %v7481_v33  ;;  %v3367_v49 = vsel %vm3350_vm6, %v7486_v43, %v7487_v16 }
 0x2a2   : > { %v10892_v42 = vpop.permute.xlu0 %3190  ;;  %v3368_v57 = vsel %vm3350_vm6, %v7487_v16, %v10885_v34  ;;  %v6066_v41 = vpack.c.bf16 %v3365_v36, %v3213_v26  ;;  %v6064_v6 = vpack.c.bf16 %v3366_v4, %v3214_v25  ;;  %v3215_v53 = vsel %vm3198_vm5, %v7481_v33, %v7482_v39 }
 0x2a3   : > { %v3216_v27 = vsel %vm3198_vm5, %v7482_v39, %v10892_v42  ;;  %v6322_v26 = vunpack.i.h.bf16 %v11806_v29  ;;  %v11886_v39 = vld [vmem:[#allocation9_spill] sm:$0xff] }
 0x2a4   : > { %6107 = vmatpush1.bf16.msra.mxu0 %v6106_v11  ;;  %6059 = vmatpush1.bf16.msra.mxu1 %v11885_v21  ;;  %v6116_v18 = vpack.c.bf16 %v3368_v57, %v3216_v27  ;;  %v6326_v21 = vunpack.i.l.bf16 %v11886_v39 }
 0x2a5   : > { %6109 = vmatprep.subr.bf16.mxu0 %v6108_v31  ;;  %6061 = vmatprep.subr.bf16.mxu1 %v6060_v62  ;;  %v7495_v61 = vpop.permute.xlu1 %7494 }
 0x2a6   : > { %v7497_v37 = vunpack.i.h.bf16 %v7495_v61  ;;  %v7496_v3 = vunpack.i.l.bf16 %v7495_v61  ;;  %v7490_v23 = vpop.permute.xlu0 %7489 }
 0x2a7   : > { %v7492_v10 = vunpack.i.h.bf16 %v7490_v23  ;;  %v7491_v56 = vunpack.i.l.bf16 %v7490_v23 }
 0x2a8   : > { %6111 = vmatpush1.bf16.msra.mxu0 %v6110_v2  ;;  %6063 = vmatpush1.bf16.msra.mxu1 %v6062_v12  ;;  %v3670_v15 = vsel %vm3654_vm8, %v7496_v3, %v7497_v37  ;;  %v3669_v32 = vsel %vm3654_vm8, %v10639_v9, %v7496_v3 }
 0x2a9   : > { %6113 = vmatprep.subr.bf16.mxu0 %v6112_v50  ;;  %6065 = vmatprep.subr.bf16.mxu1 %v6064_v6  ;;  %v10917_v1 = vpop.permute.xlu1 %7504  ;;  %v3518_v24 = vsel %vm3502_vm7, %v7491_v56, %v7492_v10  ;;  %v3517_v0 = vsel %vm3502_vm7, %v10651_v30, %v7491_v56  ;;  %v6118_v30 = vpack.c.bf16 %v3367_v49, %v3215_v53  ;;  %v199_v6 = vld [vmem:[%s7684_s16 + $0x98] sm:$0xff]  ;;  %v6327_v53 = vunpack.i.h.bf16 %v11886_v39 }
 0x2aa   : > { %v7507_v35 = vunpack.i.h.bf16 %v10917_v1  ;;  %v7506_v51 = vunpack.i.l.bf16 %v10917_v1  ;;  %v10924_v14 = vpop.permute.xlu0 %7499  ;;  %v6068_v5 = vpack.c.bf16 %v3670_v15, %v3518_v24  ;;  %v6070_v44 = vpack.c.bf16 %v3669_v32, %v3517_v0  ;;  %v198_v0 = vld [vmem:[%s7684_s16 + $0x90] sm:$0xff] }
 0x2ab   : > { %v7502_v43 = vunpack.i.h.bf16 %v10924_v14  ;;  %v7501_v33 = vunpack.i.l.bf16 %v10924_v14  ;;  %v329_v15 = vsel %vm310_vm0, %v6321_v63, %v6322_v26 }
 0x2ac   : > { %6115 = vmatpush1.bf16.msra.mxu0 %v6114_v22  ;;  %6067 = vmatpush1.bf16.msra.mxu1 %v6066_v41  ;;  %v3672_v9 = vsel %vm3654_vm8, %v7506_v51, %v7507_v35  ;;  %v3671_v40 = vsel %vm3654_vm8, %v7497_v37, %v7506_v51  ;;  %v330_v22 = vsel %vm310_vm0, %v6322_v26, %v6326_v21  ;;  %v11890_v26 = vld [vmem:[#allocation30_spill] sm:$0xff] }
 0x2ad   : > { %6117 = vmatprep.subr.bf16.mxu0 %v6116_v18  ;;  %6069 = vmatprep.subr.bf16.mxu1 %v6068_v5  ;;  %v7515_v58 = vpop.permute.xlu1 %7514  ;;  %v3520_v11 = vsel %vm3502_vm7, %v7501_v33, %v7502_v43  ;;  %v3519_v48 = vsel %vm3502_vm7, %v7492_v10, %v7501_v33  ;;  %v6128_v33 = vpack.c.bf16 %v330_v22, %v199_v6  ;;  %v11905_v6 = vld [vmem:[#allocation90_spill] sm:$0xff]  ;;  %v11906_v22 = vld [vmem:[#allocation89_spill] sm:$0xff] }
 0x2ae   : > { %v7517_v38 = vunpack.i.h.bf16 %v7515_v58  ;;  %v7516_v31 = vunpack.i.l.bf16 %v7515_v58  ;;  %v7510_v45 = vpop.permute.xlu0 %7509  ;;  %v6120_v46 = vpack.c.bf16 %v3672_v9, %v3520_v11  ;;  %v6122_v25 = vpack.c.bf16 %v3671_v40, %v3519_v48  ;;  %v11887_v58 = vld [vmem:[#allocation39_spill] sm:$0xff]  ;;  %v11888_v11 = vld [vmem:[#allocation38_spill] sm:$0xff] }
 0x2af   : > { %v7512_v12 = vunpack.i.h.bf16 %v7510_v45  ;;  %v7511_v36 = vunpack.i.l.bf16 %v7510_v45  ;;  %v6130_v63 = vpack.c.bf16 %v329_v15, %v198_v0  ;;  %v331_v9 = vsel %vm310_vm0, %v6326_v21, %v6327_v53  ;;  %v11893_v21 = vld [vmem:[#allocation69_spill] sm:$0xff]  ;;  %v11908_v15 = vld [vmem:[#allocation67_spill] sm:$0xff]  ;;  %v11909_v53 = vld [vmem:[#allocation66_spill] sm:$0xff] }
 0x2b0   : > { %6119 = vmatpush1.bf16.msra.mxu0 %v6118_v30  ;;  %v3973_v62 = vsel %vm3958_vm11, %v10681_v13, %v7516_v31  ;;  %6071 = vmatpush1.bf16.msra.mxu1 %v6070_v44  ;;  %v3974_v16 = vsel %vm3958_vm11, %v7516_v31, %v7517_v38  ;;  %v200_v44 = vld [vmem:[%s7684_s16 + $0xa0] sm:$0xff]  ;;  %v11889_v48 = vpack.c.bf16 %v11887_v58, %v11888_v11  ;;  %v11911_v0 = vld [vmem:[#allocation130_spill] sm:$0xff]  ;;  %v11914_v58 = vld [vmem:[#allocation121_spill] sm:$0xff] }
 0x2b1   : > { %6121 = vmatprep.subr.bf16.mxu0 %v6120_v46  ;;  %v3821_v4 = vsel %vm3806_vm9, %v10687_v47, %v7511_v36  ;;  %v10944_v2 = vpop.permute.xlu1 %7524  ;;  %v3822_v28 = vsel %vm3806_vm9, %v7511_v36, %v7512_v12  ;;  %v6181_v31 = vpack.c.bf16 %v331_v9, %v200_v44  ;;  %v11915_v11 = vld [vmem:[#allocation127_spill] sm:$0xff] }
 0x2b2   : > { %v6074_v52 = vpack.c.bf16 %v3973_v62, %v3821_v4  ;;  %v7527_v50 = vunpack.i.h.bf16 %v10944_v2  ;;  %v7526_v61 = vunpack.i.l.bf16 %v10944_v2  ;;  %v10949_v13 = vpop.permute.xlu0 %7519  ;;  %v6072_v57 = vpack.c.bf16 %v3974_v16, %v3822_v28  ;;  %v11891_v62 = vld [vmem:[#allocation29_spill] sm:$0xff] }
 0x2b3   : > { %v7522_v47 = vunpack.i.h.bf16 %v10949_v13  ;;  %v7521_v27 = vunpack.i.l.bf16 %v10949_v13  ;;  %v11892_v16 = vpack.c.bf16 %v11890_v26, %v11891_v62  ;;  %v11918_v26 = vld [vmem:[#allocation96_spill] sm:$0xff] }
 0x2b4   : > { %6123 = vmatpush1.bf16.msra.mxu0 %v6122_v25  ;;  %v3975_v37 = vsel %vm3958_vm11, %v7517_v38, %v7526_v61  ;;  %6073 = vmatprep.subr.bf16.mxu1 %v6072_v57  ;;  %v3976_v3 = vsel %vm3958_vm11, %v7526_v61, %v7527_v50  ;;  %v4813_v23 = vpop.f32.mrb[0].mxu0  ;;  %v11894_v25 = vld [vmem:[#allocation68_spill] sm:$0xff] }
 0x2b5   : > { %v3823_v41 = vsel %vm3806_vm9, %v7512_v12, %v7521_v27  ;;  %6075 = vmatpush1.bf16.msra.mxu1 %v6074_v52  ;;  %v4099_v10 = vpop.permute.xlu1 %4098  ;;  %v3824_v56 = vsel %vm3806_vm9, %v7521_v27, %v7522_v47  ;;  %5527 = vst [vmem:[%s10954_s4] sm:$0xff] %v4813_v23  ;;  %v4815_v49 = vpop.f32.mrb[1].mxu0  ;;  %v7643_v12 = vmov 0.0|0.0   ;;  %v11895_v4 = vpack.c.bf16 %v11893_v21, %v11894_v25  ;;  %v11896_v57 = vld [vmem:[#allocation60_spill] sm:$0xff]  ;;  %v11897_v27 = vld [vmem:[#allocation59_spill] sm:$0xff] }
 0x2b6   : > { %v6126_v18 = vpack.c.bf16 %v3975_v37, %v3823_v41  ;;  %v4097_v32 = vpop.permute.xlu0 %4096  ;;  %v6124_v24 = vpack.c.bf16 %v3976_v3, %v3824_v56  ;;  %5528 = vst [vmem:[%s10954_s4 + $0x8] sm:$0xff] %v4815_v49  ;;  %v11898_v37 = vpack.c.bf16 %v11896_v57, %v11897_v27  ;;  %v11900_v3 = vld [vmem:[#allocation36_spill] sm:$0xff]  ;;  %v11902_v41 = vld [vmem:[#allocation99_spill] sm:$0xff]  ;;  %v11907_v49 = vpack.c.bf16 %v11905_v6, %v11906_v22 }
 0x2b7   : > { %v4125_v51 = vsel %vm4110_vm12, %v10711_v17, %v4097_v32  ;;  %v4126_v5 = vsel %vm4110_vm12, %v4097_v32, %v4099_v10  ;;  %v11923_v25 = vld [vmem:[#allocation156_spill] sm:$0xff]  ;;  %v11927_v27 = vld [vmem:[#allocation131_spill] sm:$0xff] }
 0x2b8   : > { %5296 = vmatprep.subr.mxu1 %v4126_v5  ;;  %6125 = vmatprep.subr.bf16.mxu0 %v6124_v24  ;;  %v11926_v57 = vld [vmem:[#allocation128_spill] sm:$0xff] }
 0x2b9   : > { %5297 = vmatpush1.msra.mxu1 %v4125_v51  ;;  %6127 = vmatpush1.bf16.msra.mxu0 %v6126_v18  ;;  %v10978_v29 = vpop.permute.xlu1 %4102  ;;  %v11910_v18 = vpack.c.bf16 %v11908_v15, %v11909_v53  ;;  %v11912_v51 = vld [vmem:[#allocation129_spill] sm:$0xff] }
 0x2ba   : > { %v4101_v30 = vpop.permute.xlu0 %4100  ;;  %6129 = vmatprep.subr.bf16.mxu1 %v6128_v33  ;;  %5309 = vmatmul.mubr.f32.vlgmr.msra.gmra.mrb[6].mxu1 %v10327_v8  ;;  %v11913_v5 = vpack.c.bf16 %v11911_v0, %v11912_v51  ;;  %v11932_v0 = vld [vmem:[#allocation186_spill] sm:$0xff]  ;;  %v11933_v51 = vld [vmem:[#allocation185_spill] sm:$0xff] }
 0x2bb   : > { %v4127_v40 = vsel %vm4110_vm12, %v4099_v10, %v4101_v30  ;;  %6131 = vmatpush1.bf16.msra.mxu1 %v6130_v63  ;;  %v4128_v17 = vsel %vm4110_vm12, %v4101_v30, %v10978_v29  ;;  %5656 = vmatprep.mubr.msk.f32.mxu1 %vm4743_vm10, %v10736_v20  ;;  %v11903_v10 = vld [vmem:[#allocation98_spill] sm:$0xff] }
 0x2bc   : > { %5367 = vmatprep.subr.mxu0 %v4128_v17  ;;  %6133 = vmatprep.subr.bf16.mxu1 %v11889_v48  ;;  %v11904_v56 = vpack.c.bf16 %v11902_v41, %v11903_v10  ;;  %v11916_v48 = vpack.c.bf16 %v11914_v58, %v11915_v11  ;;  %v11929_v10 = vld [vmem:[#allocation195_spill] sm:$0xff] }
 0x2bd   : > { %5368 = vmatpush1.msra.mxu0 %v4127_v40  ;;  %v10991_v38 = vpop.permute.xlu1 %7534 }
 0x2be   : > { %v7536_v45 = vunpack.i.l.bf16 %v10991_v38  ;;  %v10994_v46 = vpop.permute.xlu0 %7529  ;;  %6180 = vmatprep.subr.bf16.mxu0 %v7643_v12  ;;  %5380 = vmatmul.mubr.f32.vlgmr.msra.gmra.mrb[8].mxu0 %v10327_v8  ;;  %v7537_v9 = vunpack.i.h.bf16 %v10991_v38 }
 0x2bf   : > { %v7531_v36 = vunpack.i.l.bf16 %v10994_v46  ;;  %6135 = vmatpush1.bf16.msra.mxu1 %v11892_v16  ;;  %6182 = vmatpush1.bf16.msra.mxu0 %v6181_v31  ;;  %v7532_v30 = vunpack.i.h.bf16 %v10994_v46  ;;  %v11917_v31 = vld [vmem:[#allocation97_spill] sm:$0xff] }
 0x2c0   : > { %v2457_v39 = vsel %vm2438_vm14, %v10754_v19, %v7536_v45  ;;  %6137 = vmatprep.subr.bf16.mxu1 %v11895_v4  ;;  %6183 = vmatprep.subr.bf16.mxu0 %v7643_v12  ;;  %v11899_v19 = vld [vmem:[#allocation37_spill] sm:$0xff]  ;;  %v11919_v62 = vpack.c.bf16 %v11917_v31, %v11918_v26  ;;  %v11924_v4 = vld [vmem:[#allocation155_spill] sm:$0xff] }
 0x2c1   : > { %v2305_v28 = vsel %vm2286_vm15, %v10763_v54, %v7531_v36  ;;  %5657 = vmatprep.mubr.msk.f32.mxu0 %vm4743_vm10, %v10736_v20  ;;  %v11901_v23 = vpack.c.bf16 %v11899_v19, %v11900_v3  ;;  %v11920_v16 = vld [vmem:[#allocation165_spill] sm:$0xff]  ;;  %v2306_v19 = vsel %vm2286_vm15, %v7531_v36, %v7532_v30  ;;  %v2458_v3 = vsel %vm2438_vm14, %v7536_v45, %v7537_v9 }
 0x2c2   : > { %v6158_v8 = vpack.c.bf16 %v2457_v39, %v2305_v28  ;;  %v11925_v28 = vpack.c.bf16 %v11923_v25, %v11924_v4  ;;  %v6156_v22 = vpack.c.bf16 %v2458_v3, %v2306_v19  ;;  %v11938_v26 = vld [vmem:[#allocation193_spill] sm:$0xff] }
 0x2c3   : > { %v2437_v52 = vpop.permute.xlu1 %2436  ;;  %v2285_v61 = vpop.permute.xlu0 %2284  ;;  %6139 = vmatpush1.bf16.msra.mxu1 %v11898_v37  ;;  %6185 = vmatpush1.bf16.msra.mxu0 %v11901_v23  ;;  %v11928_v37 = vpack.c.bf16 %v11926_v57, %v11927_v27 }
 0x2c4   : > { %6141 = vmatprep.subr.bf16.mxu1 %v11904_v56  ;;  %6186 = vmatprep.subr.bf16.mxu0 %v7643_v12  ;;  %v11930_v56 = vld [vmem:[#allocation194_spill] sm:$0xff] }
 0x2c7   : > { %v11022_v54 = vpop.permute.xlu1 %7544  ;;  %v11024_v20 = vpop.permute.xlu0 %7539  ;;  %6143 = vmatpush1.bf16.msra.mxu1 %v11907_v49  ;;  %6188 = vmatpush1.bf16.msra.mxu0 %v11910_v18 }
 0x2c8   : > { %v7546_v32 = vunpack.i.l.bf16 %v11022_v54  ;;  %v7541_v24 = vunpack.i.l.bf16 %v11024_v20  ;;  %6145 = vmatprep.subr.bf16.mxu1 %v11913_v5  ;;  %6189 = vmatprep.subr.bf16.mxu0 %v7643_v12  ;;  %v7547_v38 = vunpack.i.h.bf16 %v11022_v54  ;;  %v11934_v5 = vpack.c.bf16 %v11932_v0, %v11933_v51 }
 0x2ca   : > { %v2761_v33 = vsel %vm2742_vm2, %v10795_v59, %v7546_v32  ;;  %v2609_v63 = vsel %vm2590_vm1, %v10800_v7, %v7541_v24  ;;  %v11921_v59 = vld [vmem:[#allocation164_spill] sm:$0xff]  ;;  %v7542_v7 = vunpack.i.h.bf16 %v11024_v20  ;;  %v11931_v20 = vpack.c.bf16 %v11929_v10, %v11930_v56 }
 0x2cb   : > { %v6162_v44 = vpack.c.bf16 %v2761_v33, %v2609_v63  ;;  %v2741_v40 = vpop.permute.xlu1 %2740  ;;  %v2589_v17 = vpop.permute.xlu0 %2588  ;;  %6147 = vmatpush1.bf16.msra.mxu1 %v11916_v48  ;;  %6191 = vmatpush1.bf16.msra.mxu0 %v11919_v62  ;;  %v11922_v39 = vpack.c.bf16 %v11920_v16, %v11921_v59  ;;  %v11935_v33 = vld [vmem:[#allocation163_spill] sm:$0xff]  ;;  %v11936_v63 = vld [vmem:[#allocation162_spill] sm:$0xff]  ;;  %v11939_v62 = vld [vmem:[#allocation192_spill] sm:$0xff] }
 0x2cc   : > { %6192 = vmatprep.subr.bf16.mxu0 %v7643_v12  ;;  %v2610_v49 = vsel %vm2590_vm1, %v7541_v24, %v7542_v7  ;;  %v11937_v58 = vpack.c.bf16 %v11935_v33, %v11936_v63  ;;  %v2307_v24 = vsel %vm2286_vm15, %v7532_v30, %v2285_v61  ;;  %v11940_v16 = vpack.c.bf16 %v11938_v26, %v11939_v62 }
 0x2cd   : > { %6149 = vmatprep.subr.bf16.mxu1 %v11922_v39  ;;  %v2763_v61 = vsel %vm2742_vm2, %v7547_v38, %v2741_v40 }
 0x2cf   : > { %v7555_v46 = vpop.permute.xlu1 %7554  ;;  %v7550_v21 = vpop.permute.xlu0 %7549  ;;  %6151 = vmatpush1.bf16.msra.mxu1 %v11925_v28  ;;  %6194 = vmatpush1.bf16.msra.mxu0 %v11928_v37 }
 0x2d0   : > { %v7556_v23 = vunpack.i.l.bf16 %v7555_v46  ;;  %v7551_v41 = vunpack.i.l.bf16 %v7550_v21  ;;  %6153 = vmatprep.subr.bf16.mxu1 %v11931_v20  ;;  %6195 = vmatprep.subr.bf16.mxu0 %v7643_v12  ;;  %v7557_v36 = vunpack.i.h.bf16 %v7555_v46  ;;  %v7552_v15 = vunpack.i.h.bf16 %v7550_v21 }
 0x2d2   : > { %v3065_v54 = vsel %vm3046_vm4, %v10834_v60, %v7556_v23  ;;  %v2913_v6 = vsel %vm2894_vm3, %v10836_v55, %v7551_v41  ;;  %v2762_v60 = vsel %vm2742_vm2, %v7546_v32, %v7547_v38  ;;  %v2459_v55 = vsel %vm2438_vm14, %v7537_v9, %v2437_v52 }
 0x2d3   : > { %v6166_v45 = vpack.c.bf16 %v3065_v54, %v2913_v6  ;;  %v3045_v53 = vpop.permute.xlu1 %3044  ;;  %6155 = vmatpush1.bf16.msra.mxu1 %v11934_v5  ;;  %6197 = vmatpush1.bf16.msra.mxu0 %v11937_v58  ;;  %v6160_v11 = vpack.c.bf16 %v2762_v60, %v2610_v49  ;;  %v2914_v59 = vsel %vm2894_vm3, %v7551_v41, %v7552_v15 }
 0x2d4   : > { %v2893_v18 = vpop.permute.xlu0 %2892  ;;  %6157 = vmatprep.subr.bf16.mxu1 %v6156_v22  ;;  %6198 = vmatprep.subr.bf16.mxu0 %v7643_v12  ;;  %v3066_v39 = vsel %vm3046_vm4, %v7556_v23, %v7557_v36  ;;  %v6202_v52 = vpack.c.bf16 %v2459_v55, %v2307_v24  ;;  %v3067_v37 = vsel %vm3046_vm4, %v7557_v36, %v3045_v53 }
 0x2d5   : > { %v6164_v9 = vpack.c.bf16 %v3066_v39, %v2914_v59  ;;  %v2915_v19 = vsel %vm2894_vm3, %v7552_v15, %v2893_v18 }
 0x2d6   : > { %v6208_v56 = vpack.c.bf16 %v3067_v37, %v2915_v19 }
 0x2d7   : > { %v7565_v48 = vpop.permute.xlu1 %7564  ;;  %6159 = vmatpush1.bf16.msra.mxu1 %v6158_v8  ;;  %6200 = vmatpush1.bf16.msra.mxu0 %v11940_v16  ;;  %v2611_v8 = vsel %vm2590_vm1, %v7542_v7, %v2589_v17 }
 0x2d8   : > { %v7560_v31 = vpop.permute.xlu0 %7559  ;;  %v7567_v32 = vunpack.i.h.bf16 %v7565_v48  ;;  %v7566_v46 = vunpack.i.l.bf16 %v7565_v48  ;;  %6161 = vmatprep.subr.bf16.mxu1 %v6160_v11  ;;  %6201 = vmatprep.subr.bf16.mxu0 %v7643_v12  ;;  %v6205_v27 = vpack.c.bf16 %v2763_v61, %v2611_v8 }
 0x2d9   : > { %v7562_v21 = vunpack.i.h.bf16 %v7560_v31  ;;  %v7561_v25 = vunpack.i.l.bf16 %v7560_v31 }
 0x2da   : > { %v3370_v57 = vsel %vm3350_vm6, %v7566_v46, %v7567_v32  ;;  %v3369_v40 = vsel %vm3350_vm6, %v10885_v34, %v7566_v46 }
 0x2db   : > { %v3349_v30 = vpop.permute.xlu1 %3348  ;;  %6163 = vmatpush1.bf16.msra.mxu1 %v6162_v44  ;;  %6203 = vmatpush1.bf16.msra.mxu0 %v6202_v52  ;;  %v3218_v28 = vsel %vm3198_vm5, %v7561_v25, %v7562_v21  ;;  %v3217_v17 = vsel %vm3198_vm5, %v10892_v42, %v7561_v25  ;;  %v7644_v25 = vmov 0.0   ;;  %v7592_v52 = vld [vmem:[%s11162_s1] sm:$0xff] }
 0x2dc   : > { %v3197_v4 = vpop.permute.xlu0 %3196  ;;  %6165 = vmatprep.subr.bf16.mxu1 %v6164_v9  ;;  %6204 = vmatprep.subr.bf16.mxu0 %v7643_v12  ;;  %v6168_v44 = vpack.c.bf16 %v3370_v57, %v3218_v28  ;;  %v6170_v20 = vpack.c.bf16 %v3369_v40, %v3217_v17  ;;  %v3371_v54 = vsel %vm3350_vm6, %v7567_v32, %v3349_v30 }
 0x2dd   : > { %v3219_v34 = vsel %vm3198_vm5, %v7562_v21, %v3197_v4 }
 0x2de   : > { %v6211_v53 = vpack.c.bf16 %v3371_v54, %v3219_v34 }
 0x2df   : > { %v7575_v7 = vpop.permute.xlu1 %7574  ;;  %6167 = vmatpush1.bf16.msra.mxu1 %v6166_v45  ;;  %6206 = vmatpush1.bf16.msra.mxu0 %v6205_v27 }
 0x2e0   : > { %v7570_v38 = vpop.permute.xlu0 %7569  ;;  %v7577_v3 = vunpack.i.h.bf16 %v7575_v7  ;;  %v7576_v23 = vunpack.i.l.bf16 %v7575_v7  ;;  %6169 = vmatprep.subr.bf16.mxu1 %v6168_v44  ;;  %6207 = vmatprep.subr.bf16.mxu0 %v7643_v12 }
 0x2e1   : > { %v7572_v41 = vunpack.i.h.bf16 %v7570_v38  ;;  %v7571_v10 = vunpack.i.l.bf16 %v7570_v38 }
 0x2e2   : > { %v3673_v42 = vsel %vm3654_vm8, %v7507_v35, %v7576_v23  ;;  %v3674_v49 = vsel %vm3654_vm8, %v7576_v23, %v7577_v3 }
 0x2e3   : > { %v3521_v6 = vsel %vm3502_vm7, %v7502_v43, %v7571_v10  ;;  %v3522_v22 = vsel %vm3502_vm7, %v7571_v10, %v7572_v41  ;;  %v3653_v36 = vpop.permute.xlu1 %3652  ;;  %6171 = vmatpush1.bf16.msra.mxu1 %v6170_v20  ;;  %6209 = vmatpush1.bf16.msra.mxu0 %v6208_v56 }
 0x2e4   : > { %v3501_v15 = vpop.permute.xlu0 %3500  ;;  %v6172_v45 = vpack.c.bf16 %v3674_v49, %v3522_v22  ;;  %6210 = vmatprep.subr.bf16.mxu0 %v7643_v12  ;;  %v6174_v1 = vpack.c.bf16 %v3673_v42, %v3521_v6  ;;  %v3675_v35 = vsel %vm3654_vm8, %v7577_v3, %v3653_v36 }
 0x2e5   : > { %v3523_v14 = vsel %vm3502_vm7, %v7572_v41, %v3501_v15 }
 0x2e6   : > { %6173 = vmatprep.subr.bf16.mxu1 %v6172_v45  ;;  %v4884_v43 = vpop.f32.mrb[0].mxu1  ;;  %v6214_v60 = vpack.c.bf16 %v3675_v35, %v3523_v14 }
 0x2e7   : > { %v7585_v18 = vpop.permute.xlu1 %7584  ;;  %6175 = vmatpush1.bf16.msra.mxu1 %v6174_v1  ;;  %6212 = vmatpush1.bf16.msra.mxu0 %v6211_v53  ;;  %5529 = vst [vmem:[%s10954_s4 + $0x10] sm:$0xff] %v4884_v43  ;;  %v4886_v58 = vpop.f32.mrb[1].mxu1 }
 0x2e8   : > { %v7580_v0 = vpop.permute.xlu0 %7579  ;;  %v7587_v51 = vunpack.i.h.bf16 %v7585_v18  ;;  %v7586_v5 = vunpack.i.l.bf16 %v7585_v18  ;;  %6213 = vmatprep.subr.bf16.mxu0 %v7643_v12  ;;  %5530 = vst [vmem:[%s10954_s4 + $0x18] sm:$0xff] %v4886_v58 }
 0x2e9   : > { %v7582_v33 = vunpack.i.h.bf16 %v7580_v0  ;;  %v7581_v63 = vunpack.i.l.bf16 %v7580_v0 }
 0x2ea   : > { %v3977_v55 = vsel %vm3958_vm11, %v7527_v50, %v7586_v5  ;;  %v3978_v48 = vsel %vm3958_vm11, %v7586_v5, %v7587_v51 }
 0x2eb   : > { %v3825_v24 = vsel %vm3806_vm9, %v7522_v47, %v7581_v63  ;;  %v3826_v11 = vsel %vm3806_vm9, %v7581_v63, %v7582_v33  ;;  %v3957_v26 = vpop.permute.xlu1 %3956  ;;  %6215 = vmatpush1.bf16.msra.mxu0 %v6214_v60 }
 0x2ec   : > { %v6178_v31 = vpack.c.bf16 %v3977_v55, %v3825_v24  ;;  %v3805_v62 = vpop.permute.xlu0 %3804  ;;  %v6176_v16 = vpack.c.bf16 %v3978_v48, %v3826_v11  ;;  %v3979_v59 = vsel %vm3958_vm11, %v7587_v51, %v3957_v26  ;;  %6216 = vmatprep.subr.bf16.mxu0 %v7643_v12  ;;  %v4955_v50 = vpop.f32.mrb[2].mxu0 }
 0x2ed   : > { %v3827_v2 = vsel %vm3806_vm9, %v7582_v33, %v3805_v62  ;;  %5531 = vst [vmem:[%s10954_s4 + $0x20] sm:$0xff] %v4955_v50  ;;  %v4957_v47 = vpop.f32.mrb[3].mxu0 }
 0x2ee   : > { %v6217_v13 = vpack.c.bf16 %v3979_v59, %v3827_v2  ;;  %6177 = vmatprep.subr.bf16.mxu1 %v6176_v16  ;;  %5532 = vst [vmem:[%s10954_s4 + $0x28] sm:$0xff] %v4957_v47 }
 0x2ef   : > { %6179 = vmatpush1.bf16.msra.mxu1 %v6178_v31  ;;  %v4107_v39 = vpop.permute.xlu1 %4106 }
 0x2f0   : > { %v4105_v32 = vpop.permute.xlu0 %4104  ;;  %6218 = vmatpush1.bf16.msra.mxu0 %v6217_v13 }
 0x2f1   : > { %v4129_v46 = vsel %vm4110_vm12, %v10978_v29, %v4105_v32  ;;  %v4130_v21 = vsel %vm4110_vm12, %v4105_v32, %v4107_v39  ;;  %5509 = vmatprep.subr.mxu0 %v7644_v25 }
 0x2f2   : > { %5438 = vmatprep.subr.mxu1 %v4130_v21 }
 0x2f3   : > { %5439 = vmatpush1.msra.mxu1 %v4129_v46 }
 0x2f4   : > { %v4109_v12 = vpop.permute.xlu0 %4108  ;;  %5451 = vmatmul.mubr.f32.vlgmr.msra.gmra.mrb[8].mxu1 %v7592_v52 }
 0x2f5   : > { %v4131_v61 = vsel %vm4110_vm12, %v4107_v39, %v4109_v12 }
 0x2f6   : > { %5510 = vmatpush1.msra.mxu0 %v4131_v61 }
 0x2f7   : > { %5522 = vmatmul.mubr.f32.vlgmr.msra.gmra.mrb[10].mxu0 %v7592_v52 }
 0x31e   : > { %v5026_v29 = vpop.f32.mrb[2].mxu1 }
 0x31f   : > { %5533 = vst [vmem:[%s10954_s4 + $0x30] sm:$0xff] %v5026_v29  ;;  %v5028_v8 = vpop.f32.mrb[3].mxu1 }
 0x320   : > { %5534 = vst [vmem:[%s10954_s4 + $0x38] sm:$0xff] %v5028_v8 }
 0x322   : > { %v5097_v9 = vpop.f32.mrb[4].mxu0 }
 0x323   : > { %5535 = vst [vmem:[%s10954_s4 + $0x40] sm:$0xff] %v5097_v9  ;;  %v5099_v30 = vpop.f32.mrb[5].mxu0 }
 0x324   : > { %5536 = vst [vmem:[%s10954_s4 + $0x48] sm:$0xff] %v5099_v30 }
 0x356   : > { %v5168_v4 = vpop.f32.mrb[4].mxu1 }
 0x357   : > { %5537 = vst [vmem:[%s10954_s4 + $0x50] sm:$0xff] %v5168_v4  ;;  %v5170_v28 = vpop.f32.mrb[5].mxu1 }
 0x358   : > { %5538 = vst [vmem:[%s10954_s4 + $0x58] sm:$0xff] %v5170_v28 }
 0x35a   : > { %v5239_v57 = vpop.f32.mrb[6].mxu0 }
 0x35b   : > { %5539 = vst [vmem:[%s10954_s4 + $0x60] sm:$0xff] %v5239_v57  ;;  %v5241_v27 = vpop.f32.mrb[7].mxu0 }
 0x35c   : > { %5540 = vst [vmem:[%s10954_s4 + $0x68] sm:$0xff] %v5241_v27 }
 0x38d   : > { %v5310_v37 = vpop.f32.mrb[6].mxu1 }
 0x38e   : > { %5541 = vst [vmem:[%s10954_s4 + $0x70] sm:$0xff] %v5310_v37  ;;  %v5312_v19 = vpop.f32.mrb[7].mxu1 }
 0x38f   : > { %5542 = vst [vmem:[%s10954_s4 + $0x78] sm:$0xff] %v5312_v19 }
 0x391   : > { %v5381_v40 = vpop.f32.mrb[8].mxu0 }
 0x392   : > { %5543 = vst [vmem:[%s10954_s4 + $0x80] sm:$0xff] %v5381_v40  ;;  %v5383_v17 = vpop.f32.mrb[9].mxu0 }
 0x393   : > { %5544 = vst [vmem:[%s10954_s4 + $0x88] sm:$0xff] %v5383_v17 }
 0x3c7   : > { %v5452_v44 = vpop.f32.mrb[8].mxu1 }
 0x3c8   : > { %5545 = vst [vmem:[%s10954_s4 + $0x90] sm:$0xff] %v5452_v44  ;;  %v5454_v7 = vpop.f32.mrb[9].mxu1 }
 0x3c9   : > { %5546 = vst [vmem:[%s10954_s4 + $0x98] sm:$0xff] %v5454_v7 }
 0x3ca   : > { %v5523_v38 = vpop.f32.mrb[10].mxu0 }
 0x3cb   : > { %5547 = vst [vmem:[%s10954_s4 + $0xa0] sm:$0xff] %v5523_v38  ;;  %v5525_v3 = vpop.f32.mrb[11].mxu0 }
 0x3cc PF: > { %s12_s11 = sadd.s32 1, %s7615_s11   ;;  %s11941_s9 = smov %s7611_s10 }
 0x3cd   : > { %p9_p5 = scmp.ge.s32.totalorder %s12_s11, 4   ;;  %s11942_s10 = smov %s11944_s12 }
 0x3cf   :  { %11 = sbr.rel (!%p9_p5) target bundleno = 2 (0x2), region = 58 }

</bundles_post_ra>
